<compile_context>
chip_gen: v7x
topology: tpu7x:2x2x1
jax: 0.10.0
libtpu: 0.0.40
codegen_flags: <defaults>
</compile_context>

<pallas_src>
import functools

import jax
import jax.numpy as jnp
from jax.experimental import pallas as pl
from jax.experimental.pallas import tpu as pltpu

F32 = jnp.float32
BF16 = jnp.bfloat16


# -------------------------- generation-aware limits --------------------------

def _vmem_limit_bytes():
    """~3/4 of physical VMEM, capped at 100 MiB (v5e/v6e: 128 MiB, v7x: 64)."""
    cap = 128 * 1024 * 1024
    try:
        info = pltpu.get_tpu_info()
        cap = int(getattr(info, "vmem_capacity_bytes", cap))
    except Exception:
        pass
    return min((cap * 3) // 4, 100 * 1024 * 1024)


_VMEM_LIMIT = _vmem_limit_bytes()


def _pick_bb(batch, cap=8):
    """Largest divisor of `batch` not exceeding `cap` (batch block size)."""
    bb = min(batch, cap)
    while batch % bb:
        bb -= 1
    return bb


def _const_spec(arr):
    """BlockSpec for a weight: whole array, constant index map, single-buffered."""
    nd = arr.ndim
    idx = lambda i, _n=nd: (0,) * _n
    if hasattr(pl, "Buffered"):
        try:
            return pl.BlockSpec(arr.shape, idx, pipeline_mode=pl.Buffered(1))
        except TypeError:   # older jax without pipeline_mode kwarg
            pass
    return pl.BlockSpec(arr.shape, idx)


# ------------------------------ in-kernel math ------------------------------

def _ln(x, g, b, eps):
    """LayerNorm over the last dim; x: (R, N) f32, g/b: (1, N) f32."""
    mu = jnp.mean(x, axis=-1, keepdims=True)
    var = jnp.mean(jnp.square(x - mu), axis=-1, keepdims=True)
    return (x - mu) * jax.lax.rsqrt(var + eps) * g + b


def _softmax_rows(s):
    """Row softmax in f32 with EUP approx-reciprocal for the denominator."""
    m = jnp.max(s, axis=-1, keepdims=True)
    p = jnp.exp(s - m)
    return p * pl.reciprocal(jnp.sum(p, axis=-1, keepdims=True), approx=True)


def _gelu(x):
    # tanh-approximate gelu: transcendental goes to the EUP slot (nearly free
    # next to the FFN matmuls).  Exact-erf HF gelu differs by <~1e-3.
    return jax.nn.gelu(x, approximate=True)


def _self_attn_ctx(q_all, k_all, v_all, num_heads, bb, sq):
    """Per-head softmax attention within each batch element of the block.

    q_all/k_all/v_all: (bb*sq, H) f32 (scale already folded into q).
    Returns the lane-dense concatenated context (bb*sq, H) f32; the output
    projection is done as ONE (M,H)@(H,H) matmul by the caller.
    """
    _, H = q_all.shape
    D = H // num_heads
    rows = []
    for b in range(bb):
        rs = slice(b * sq, (b + 1) * sq)
        heads = []
        for h in range(num_heads):
            cs = slice(h * D, (h + 1) * D)
            s = jax.lax.dot_general(                       # q @ k^T ("nt")
                q_all[rs, cs].astype(BF16), k_all[rs, cs].astype(BF16),
                (((1,), (1,)), ((), ())), preferred_element_type=F32)
            p = _softmax_rows(s)
            heads.append(jnp.dot(p.astype(BF16), v_all[rs, cs].astype(BF16),
                                 preferred_element_type=F32))
        rows.append(jnp.concatenate(heads, axis=-1))
    return jnp.concatenate(rows, axis=0)


def _cross_attn_ctx(q_all, ckv_ref, bias_ref, num_heads, bb, sq):
    """Cross-attention context against precomputed encoder K/V (bf16 ref)."""
    _, H = q_all.shape
    D = H // num_heads
    rows = []
    for b in range(bb):
        rs = slice(b * sq, (b + 1) * sq)
        bias = bias_ref[b]                                  # (1, Tk) f32
        heads = []
        for h in range(num_heads):
            kh = ckv_ref[b, :, h * D:(h + 1) * D]           # (Tk, D) bf16
            vh = ckv_ref[b, :, H + h * D:H + (h + 1) * D]   # (Tk, D) bf16
            s = jax.lax.dot_general(
                q_all[rs, h * D:(h + 1) * D].astype(BF16), kh,
                (((1,), (1,)), ((), ())), preferred_element_type=F32)
            s = s + bias
            p = _softmax_rows(s)
            heads.append(jnp.dot(p.astype(BF16), vh, preferred_element_type=F32))
        rows.append(jnp.concatenate(heads, axis=-1))
    return jnp.concatenate(rows, axis=0)


# ------------------------------ Pallas kernels ------------------------------

def _layernorm_kernel(x_ref, g_ref, b_ref, o_ref, *, eps):
    o_ref[...] = _ln(x_ref[...].astype(F32), g_ref[...], b_ref[...],
                     eps).astype(o_ref.dtype)


def layernorm2d(x2, g, b, eps):
    """LayerNorm over last dim of a small 2-D array (whole array in VMEM)."""
    return pl.pallas_call(
        functools.partial(_layernorm_kernel, eps=eps),
        out_shape=jax.ShapeDtypeStruct(x2.shape, F32),
        in_specs=[pl.BlockSpec(memory_space=pltpu.MemorySpace.VMEM)] * 3,
        out_specs=pl.BlockSpec(memory_space=pltpu.MemorySpace.VMEM),
    )(x2, g, b)


def _kv_proj_kernel(x_ref, w_ref, b_ref, o_ref):
    y = jnp.dot(x_ref[...].astype(BF16), w_ref[...],
                preferred_element_type=F32) + b_ref[...]
    o_ref[...] = y.astype(o_ref.dtype)


def cross_kv_proj(x, w_kv, b_kv, *, tm=1024):
    """Fused K/V projection of the encoder stream: [B,T,E] @ [E,2H] -> bf16."""
    B, T, E = x.shape
    H2 = w_kv.shape[1]
    M = B * T
    x2 = x.reshape(M, E)
    tm = min(tm, M)
    out = pl.pallas_call(
        _kv_proj_kernel,
        out_shape=jax.ShapeDtypeStruct((M, H2), BF16),
        grid=(pl.cdiv(M, tm),),
        in_specs=[
            pl.BlockSpec((tm, E), lambda i: (i, 0)),
            _const_spec(w_kv),
            _const_spec(b_kv),
        ],
        out_specs=pl.BlockSpec((tm, H2), lambda i: (i, 0)),
        compiler_params=pltpu.CompilerParams(
            dimension_semantics=("parallel",),
            vmem_limit_bytes=_VMEM_LIMIT),
        cost_estimate=pl.CostEstimate(
            flops=2 * M * E * H2, transcendentals=0,
            bytes_accessed=M * E * 4 + E * H2 * 2 + M * H2 * 2),
    )(x2, w_kv, b_kv)
    return out.reshape(B, T, H2)


def _qformer_layer_kernel(*refs, num_heads, has_cross, eps, bb, sq):
    if has_cross:
        (h_ref, ckv_ref, bias_ref,
         qkv_w, qkv_b, sa_ow, sa_ob, sa_g, sa_b,
         ca_qw, ca_qb, ca_ow, ca_ob, ca_g, ca_b,
         ff_iw, ff_ib, ff_ow, ff_ob, ff_g, ff_b,
         o_ref) = refs
    else:
        (h_ref,
         qkv_w, qkv_b, sa_ow, sa_ob, sa_g, sa_b,
         ff_iw, ff_ib, ff_ow, ff_ob, ff_g, ff_b,
         o_ref) = refs

    h = h_ref[...].astype(F32)                              # (bb*Sq, H)
    _, H = h.shape
    D = H // num_heads
    scale = 1.0 / float(D) ** 0.5

    # ---- self-attention: fused QKV, per-head softmax, ONE output proj ----
    qkv = jnp.dot(h.astype(BF16), qkv_w[...],
                  preferred_element_type=F32) + qkv_b[...]
    q_all = qkv[:, :H] * scale          # fold 1/sqrt(D) once into Q
    ctx = _self_attn_ctx(q_all, qkv[:, H:2 * H], qkv[:, 2 * H:],
                         num_heads, bb, sq)
    attn = jnp.dot(ctx.astype(BF16), sa_ow[...],
                   preferred_element_type=F32) + sa_ob[...]
    h = _ln(attn + h, sa_g[...], sa_b[...], eps)

    # ---- cross-attention against precomputed encoder K/V + add & LN ----
    if has_cross:
        q = (jnp.dot(h.astype(BF16), ca_qw[...],
                     preferred_element_type=F32) + ca_qb[...]) * scale
        ctx = _cross_attn_ctx(q, ckv_ref, bias_ref, num_heads, bb, sq)
        attn = jnp.dot(ctx.astype(BF16), ca_ow[...],
                       preferred_element_type=F32) + ca_ob[...]
        h = _ln(attn + h, ca_g[...], ca_b[...], eps)

    # ---- feed-forward (tanh-gelu) + add & LN ----
    inter = jnp.dot(h.astype(BF16), ff_iw[...],
                    preferred_element_type=F32) + ff_ib[...]
    inter = _gelu(inter)
    out = jnp.dot(inter.astype(BF16), ff_ow[...],
                  preferred_element_type=F32) + ff_ob[...]
    o_ref[...] = _ln(out + h, ff_g[...], ff_b[...], eps).astype(o_ref.dtype)


def _layer_cost(M, sq, H, inter, Tk, num_heads, has_cross):
    flops = 2 * M * H * (3 * H)            # fused QKV
    flops += 2 * M * sq * H * 2            # self-attn scores + ctx
    flops += 2 * M * H * H                 # self out-proj
    if has_cross:
        flops += 2 * M * H * H             # cross q-proj
        flops += 2 * M * Tk * H * 2        # cross scores + ctx
        flops += 2 * M * H * H             # cross out-proj
    flops += 2 * M * H * inter * 2         # FFN in + out
    trans = M * inter + M * sq * num_heads
    wbytes = 2 * (3 * H * H + H * H + H * inter + inter * H)
    abytes = 2 * M * H * 4
    if has_cross:
        trans += M * Tk * num_heads
        wbytes += 2 * 2 * H * H
        B = M // sq
        abytes += B * Tk * 2 * H * 2 + B * Tk * 4
    return pl.CostEstimate(flops=int(flops), transcendentals=int(trans),
                           bytes_accessed=int(wbytes + abytes))


def qformer_layer(hidden2, lp, cross_kv, enc_bias, *, num_heads, has_cross,
                  eps, batch, sq, bb, intermediate):
    """One fused Q-Former layer.  hidden2: [B*Sq, H] f32 (flat batch)."""
    M, H = hidden2.shape
    sa, ff = lp["self_attn"], lp["ffn"]

    inputs = [hidden2]
    in_specs = [pl.BlockSpec((bb * sq, H), lambda i: (i, 0))]
    Tk = 0
    if has_cross:
        Tk = cross_kv.shape[1]
        # NOTE: the (bb, Tk, 2H) cross-K/V block scales with Tk; for very long
        # encoder streams on v7x, reduce `bb` (wrapper) to stay within VMEM.
        inputs += [cross_kv, enc_bias]
        in_specs += [pl.BlockSpec((bb, Tk, 2 * H), lambda i: (i, 0, 0)),
                     pl.BlockSpec((bb, 1, Tk), lambda i: (i, 0, 0))]

    def add_weight(arr):
        inputs.append(arr)
        in_specs.append(_const_spec(arr))

    for arr in (sa["qkv_w"], sa["qkv_b"], sa["o_w"], sa["o_b"],
                sa["ln_g"], sa["ln_b"]):
        add_weight(arr)
    if has_cross:
        ca = lp["cross_attn"]
        for arr in (ca["q_w"], ca["q_b"], ca["o_w"], ca["o_b"],
                    ca["ln_g"], ca["ln_b"]):
            add_weight(arr)
    for arr in (ff["i_w"], ff["i_b"], ff["o_w"], ff["o_b"],
                ff["ln_g"], ff["ln_b"]):
        add_weight(arr)

    return pl.pallas_call(
        functools.partial(_qformer_layer_kernel, num_heads=num_heads,
                          has_cross=has_cross, eps=eps, bb=bb, sq=sq),
        out_shape=jax.ShapeDtypeStruct((M, H), F32),
        grid=(batch // bb,),
        in_specs=in_specs,
        out_specs=pl.BlockSpec((bb * sq, H), lambda i: (i, 0)),
        compiler_params=pltpu.CompilerParams(
            dimension_semantics=("parallel",),
            vmem_limit_bytes=_VMEM_LIMIT),
        cost_estimate=_layer_cost(M, sq, H, intermediate, Tk,
                                  num_heads, has_cross),
    )(*inputs)


def _proj_norm_kernel(h_ref, w_ref, b_ref, g_ref, bb_ref, o_ref, *, eps):
    y = jnp.dot(h_ref[...].astype(BF16), w_ref[...],
                preferred_element_type=F32) + b_ref[...]
    o_ref[...] = _ln(y, g_ref[...], bb_ref[...], eps).astype(o_ref.dtype)


def proj_norm(hidden2, w, b, g, beta, eps, *, batch, sq, bb):
    """Fused final Linear(H->L) + LayerNorm(L) on the flat [B*Sq, H] stream."""
    M, H = hidden2.shape
    L = w.shape[1]
    return pl.pallas_call(
        functools.partial(_proj_norm_kernel, eps=eps),
        out_shape=jax.ShapeDtypeStruct((M, L), F32),
        grid=(batch // bb,),
        in_specs=[pl.BlockSpec((bb * sq, H), lambda i: (i, 0)),
                  _const_spec(w), _const_spec(b),
                  _const_spec(g), _const_spec(beta)],
        out_specs=pl.BlockSpec((bb * sq, L), lambda i: (i, 0)),
        compiler_params=pltpu.CompilerParams(
            dimension_semantics=("parallel",),
            vmem_limit_bytes=_VMEM_LIMIT),
        cost_estimate=pl.CostEstimate(
            flops=2 * M * H * L, transcendentals=0,
            bytes_accessed=M * H * 4 + H * L * 2 + M * L * 4),
    )(hidden2, w, b, g, beta)


# --------------------------- Q-Former composition ---------------------------

def encoder_projector_qformer(params, x, atts, cfg):
    B = x.shape[0]
    Sq, H = cfg["query_len"], cfg["hidden_size"]
    eps = cfg["qformer_ln_eps"]
    bb = _pick_bb(B, cap=8)

    # LN(query) is batch-independent: compute once on (Sq, H), broadcast, and
    # keep the hidden stream flat as (B*Sq, H) so all dense matmuls see
    # M = bb*Sq rows per grid step.
    q0 = layernorm2d(params["query"].reshape(Sq, H),
                     params["emb_ln_g"], params["emb_ln_b"], eps)
    hidden2 = jnp.broadcast_to(q0[None], (B, Sq, H)).reshape(B * Sq, H)

    # HF extended encoder attention mask: (1 - mask) * finfo(f32).min, added
    # to the scores (finite, so fully-masked rows degenerate to a uniform
    # softmax exactly like the HF reference).
    enc_bias = ((1.0 - atts.astype(F32)) * jnp.finfo(F32).min)[:, None, :]

    for li in range(cfg["num_layers"]):
        lp = params["layers"][li]
        has_cross = (li % cfg["cross_attention_frequency"] == 0)
        cross_kv = None
        if has_cross:
            ca = lp["cross_attn"]
            cross_kv = cross_kv_proj(x, ca["kv_w"], ca["kv_b"])
        # TODO(synk): P10 cross-call prefetch of layer li+1 weights.
        hidden2 = qformer_layer(hidden2, lp, cross_kv, enc_bias,
                                num_heads=cfg["num_heads"],
                                has_cross=has_cross, eps=eps,
                                batch=B, sq=Sq, bb=bb,
                                intermediate=cfg["intermediate_size"])

    out2 = proj_norm(hidden2, params["proj_w"], params["proj_b"],
                     params["norm_g"], params["norm_b"], 1e-5,
                     batch=B, sq=Sq, bb=bb)
    return out2.reshape(B, Sq, cfg["llm_dim"])


# ------------------------- deterministic parameters -------------------------

def init_params(key, cfg):
    H, E = cfg["hidden_size"], cfg["encoder_dim"]
    I, L = cfg["intermediate_size"], cfg["llm_dim"]
    keys = iter(jax.random.split(key, 512))

    def dense(din, dout):
        w = (jax.random.normal(next(keys), (din, dout), F32) * 0.02).astype(BF16)
        b = jax.random.normal(next(keys), (1, dout), F32) * 0.02
        return w, b

    def ln(d):
        return jnp.ones((1, d), F32), jnp.zeros((1, d), F32)

    params = {"query": jax.random.normal(next(keys),
                                         (1, cfg["query_len"], H), F32)}
    params["emb_ln_g"], params["emb_ln_b"] = ln(H)

    layers = []
    for li in range(cfg["num_layers"]):
        lp = {}
        sa = {}
        sa["qkv_w"], sa["qkv_b"] = dense(H, 3 * H)     # fused Q/K/V
        sa["o_w"], sa["o_b"] = dense(H, H)
        sa["ln_g"], sa["ln_b"] = ln(H)
        lp["self_attn"] = sa
        if li % cfg["cross_attention_frequency"] == 0:
            ca = {}
            ca["q_w"], ca["q_b"] = dense(H, H)
            ca["kv_w"], ca["kv_b"] = dense(E, 2 * H)   # fused K/V (encoder)
            ca["o_w"], ca["o_b"] = dense(H, H)
            ca["ln_g"], ca["ln_b"] = ln(H)
            lp["cross_attn"] = ca
        ff = {}
        ff["i_w"], ff["i_b"] = dense(H, I)
        ff["o_w"], ff["o_b"] = dense(I, H)
        ff["ln_g"], ff["ln_b"] = ln(H)
        lp["ffn"] = ff
        layers.append(lp)
    params["layers"] = layers

    params["proj_w"], params["proj_b"] = dense(H, L)
    params["norm_g"], params["norm_b"] = ln(L)
    return params


# ----------------------------------- main -----------------------------------

if __name__ == "__main__":
    # Small synthetic Q-Former config (real Blip2QFormerConfig defaults are
    # hidden=768/heads=12/intermediate=3072; scaled down per task instructions).
    cfg = dict(
        encoder_dim=32,            # config.encoder_dim
        llm_dim=48,                # config.llm_dim
        hidden_size=32,            # Blip2QFormerConfig.hidden_size (scaled)
        num_heads=4,
        intermediate_size=64,
        num_layers=2,              # config.qformer_layers
        cross_attention_frequency=2,
        query_len=8,               # config.query_len
        qformer_ln_eps=1e-12,      # Blip2QFormerConfig.layer_norm_eps
    )

    key = jax.random.PRNGKey(0)
    kp, kx = jax.random.split(key)
    params = init_params(kp, cfg)

    B, T_enc = 2, 16
    x = jax.random.normal(kx, (B, T_enc, cfg["encoder_dim"]), F32)
    atts = jnp.ones((B, T_enc), dtype=jnp.int32).at[1, 12:].set(0)  # ragged

    fwd = jax.jit(functools.partial(encoder_projector_qformer, cfg=cfg))
    out = fwd(params, x, atts)
    out = jax.block_until_ready(out)

    assert out.shape == (B, cfg["query_len"], cfg["llm_dim"]), out.shape
    assert bool(jnp.all(jnp.isfinite(out)))
    print("KERNEL_OK")
</pallas_src>

<mosaic_0001>
module attributes {stable_mosaic.version = 11 : i64} {
  func.func @_layernorm_kernel(%arg0: memref<8x32xf32, #tpu.memory_space<vmem>>, %arg1: memref<1x32xf32, #tpu.memory_space<vmem>>, %arg2: memref<1x32xf32, #tpu.memory_space<vmem>>, %arg3: memref<8x32xf32, #tpu.memory_space<vmem>>) attributes {dimension_semantics = [], scalar_prefetch = 0 : i64, scratch_operands = 0 : i64, tpu.core_type = #tpu.core_type<tc>} {
    %c0 = arith.constant 0 : index
    %c0_0 = arith.constant 0 : index
    %0 = vector.load %arg0[%c0, %c0_0] : memref<8x32xf32, #tpu.memory_space<vmem>>, vector<8x32xf32>
    %c0_1 = arith.constant 0 : index
    %c0_2 = arith.constant 0 : index
    %1 = vector.load %arg1[%c0_1, %c0_2] : memref<1x32xf32, #tpu.memory_space<vmem>>, vector<1x32xf32>
    %c0_3 = arith.constant 0 : index
    %c0_4 = arith.constant 0 : index
    %2 = vector.load %arg2[%c0_3, %c0_4] : memref<1x32xf32, #tpu.memory_space<vmem>>, vector<1x32xf32>
    %cst = arith.constant dense<0.000000e+00> : vector<8xf32>
    %3 = vector.multi_reduction <add>, %0, %cst [1] : vector<8x32xf32> to vector<8xf32>
    %4 = vector.shape_cast %3 : vector<8xf32> to vector<8x1xf32>
    %cst_5 = arith.constant 3.200000e+01 : f32
    %5 = vector.broadcast %cst_5 : f32 to vector<8x1xf32>
    %6 = arith.divf %4, %5 : vector<8x1xf32>
    %7 = vector.broadcast %6 : vector<8x1xf32> to vector<8x32xf32>
    %8 = arith.subf %0, %7 : vector<8x32xf32>
    %9 = arith.mulf %8, %8 : vector<8x32xf32>
    %cst_6 = arith.constant dense<0.000000e+00> : vector<8xf32>
    %10 = vector.multi_reduction <add>, %9, %cst_6 [1] : vector<8x32xf32> to vector<8xf32>
    %11 = vector.shape_cast %10 : vector<8xf32> to vector<8x1xf32>
    %cst_7 = arith.constant 3.200000e+01 : f32
    %12 = vector.broadcast %cst_7 : f32 to vector<8x1xf32>
    %13 = arith.divf %11, %12 : vector<8x1xf32>
    %14 = vector.broadcast %6 : vector<8x1xf32> to vector<8x32xf32>
    %15 = arith.subf %0, %14 : vector<8x32xf32>
    %cst_8 = arith.constant 9.99999996E-13 : f32
    %16 = vector.broadcast %cst_8 : f32 to vector<8x1xf32>
    %17 = arith.addf %13, %16 : vector<8x1xf32>
    %18 = math.rsqrt %17 : vector<8x1xf32>
    %19 = vector.broadcast %18 : vector<8x1xf32> to vector<8x32xf32>
    %20 = arith.mulf %15, %19 : vector<8x32xf32>
    %21 = vector.broadcast %1 : vector<1x32xf32> to vector<8x32xf32>
    %22 = arith.mulf %20, %21 : vector<8x32xf32>
    %23 = vector.broadcast %2 : vector<1x32xf32> to vector<8x32xf32>
    %24 = arith.addf %22, %23 : vector<8x32xf32>
    %c0_9 = arith.constant 0 : index
    %c0_10 = arith.constant 0 : index
    %25 = vector.load %arg3[%c0_9, %c0_10] : memref<8x32xf32, #tpu.memory_space<vmem>>, vector<8x32xf32>
    tpu.vector_store %arg3[%c0_9, %c0_10], %24 {strides = array<i32>} : memref<8x32xf32, #tpu.memory_space<vmem>>, vector<8x32xf32>,
    return
  }
}

module attributes {stable_mosaic.version = 11 : i64} {
  func.func @_kv_proj_kernel(%arg0: i32, %arg1: memref<32x32xf32, #tpu.memory_space<vmem>>, %arg2: memref<32x64xbf16, #tpu.memory_space<vmem>>, %arg3: memref<1x64xf32, #tpu.memory_space<vmem>>, %arg4: memref<32x64xbf16, #tpu.memory_space<vmem>>) attributes {dimension_semantics = [#tpu.dimension_semantics<parallel>], iteration_bounds = array<i64: 1>, scalar_prefetch = 0 : i64, scratch_operands = 0 : i64, tpu.core_type = #tpu.core_type<tc>, window_params = [{transform_indices = @transform_0, window_bounds = array<i64: 32, 32>}, {pipeline_mode = #tpu.pipeline_mode<synchronous>, transform_indices = @transform_1, window_bounds = array<i64: 32, 64>}, {pipeline_mode = #tpu.pipeline_mode<synchronous>, transform_indices = @transform_2, window_bounds = array<i64: 1, 64>}, {transform_indices = @transform_3, window_bounds = array<i64: 32, 64>}]} {
    %c0 = arith.constant 0 : index
    %c0_0 = arith.constant 0 : index
    %0 = vector.load %arg1[%c0, %c0_0] : memref<32x32xf32, #tpu.memory_space<vmem>>, vector<32x32xf32>
    %1 = arith.truncf %0 : vector<32x32xf32> to vector<32x32xbf16>
    %c0_1 = arith.constant 0 : index
    %c0_2 = arith.constant 0 : index
    %2 = vector.load %arg2[%c0_1, %c0_2] : memref<32x64xbf16, #tpu.memory_space<vmem>>, vector<32x64xbf16>
    %cst = arith.constant dense<0.000000e+00> : vector<32x64xf32>
    %3 = tpu.matmul %1, %2, %cst {dimension_numbers = #tpu.dot_dimension_numbers<[1], [0], [0], [1], [0, 0, 1, 1], [], []>} : vector<32x32xbf16>, vector<32x64xbf16>, vector<32x64xf32> -> vector<32x64xf32>
    %c0_3 = arith.constant 0 : index
    %c0_4 = arith.constant 0 : index
    %4 = vector.load %arg3[%c0_3, %c0_4] : memref<1x64xf32, #tpu.memory_space<vmem>>, vector<1x64xf32>
    %5 = vector.broadcast %4 : vector<1x64xf32> to vector<32x64xf32>
    %6 = arith.addf %3, %5 : vector<32x64xf32>
    %7 = arith.truncf %6 : vector<32x64xf32> to vector<32x64xbf16>
    %c0_5 = arith.constant 0 : index
    %c0_6 = arith.constant 0 : index
    %8 = vector.load %arg4[%c0_5, %c0_6] : memref<32x64xbf16, #tpu.memory_space<vmem>>, vector<32x64xbf16>
    tpu.vector_store %arg4[%c0_5, %c0_6], %7 {strides = array<i32>} : memref<32x64xbf16, #tpu.memory_space<vmem>>, vector<32x64xbf16>,
    return
  }
  func.func @transform_0(%arg0: i32) -> (i32, i32) {
    %c0_i32 = arith.constant 0 : i32
    %c0_i32_0 = arith.constant 0 : i32
    return %arg0, %c0_i32 : i32, i32
  }
  func.func @transform_1(%arg0: i32) -> (i32, i32) {
    %c0_i32 = arith.constant 0 : i32
    %c0_i32_0 = arith.constant 0 : i32
    %c0_i32_1 = arith.constant 0 : i32
    return %c0_i32, %c0_i32_0 : i32, i32
  }
  func.func @transform_2(%arg0: i32) -> (i32, i32) {
    %c0_i32 = arith.constant 0 : i32
    %c0_i32_0 = arith.constant 0 : i32
    %c0_i32_1 = arith.constant 0 : i32
    return %c0_i32, %c0_i32_0 : i32, i32
  }
  func.func @transform_3(%arg0: i32) -> (i32, i32) {
    %c0_i32 = arith.constant 0 : i32
    %c0_i32_0 = arith.constant 0 : i32
    return %arg0, %c0_i32 : i32, i32
  }
}

module attributes {stable_mosaic.version = 11 : i64} {
  func.func @_qformer_layer_kernel(%arg0: i32, %arg1: memref<16x32xf32, #tpu.memory_space<vmem>>, %arg2: memref<2x16x64xbf16, #tpu.memory_space<vmem>>, %arg3: memref<2x1x16xf32, #tpu.memory_space<vmem>>, %arg4: memref<32x96xbf16, #tpu.memory_space<vmem>>, %arg5: memref<1x96xf32, #tpu.memory_space<vmem>>, %arg6: memref<32x32xbf16, #tpu.memory_space<vmem>>, %arg7: memref<1x32xf32, #tpu.memory_space<vmem>>, %arg8: memref<1x32xf32, #tpu.memory_space<vmem>>, %arg9: memref<1x32xf32, #tpu.memory_space<vmem>>, %arg10: memref<32x32xbf16, #tpu.memory_space<vmem>>, %arg11: memref<1x32xf32, #tpu.memory_space<vmem>>, %arg12: memref<32x32xbf16, #tpu.memory_space<vmem>>, %arg13: memref<1x32xf32, #tpu.memory_space<vmem>>, %arg14: memref<1x32xf32, #tpu.memory_space<vmem>>, %arg15: memref<1x32xf32, #tpu.memory_space<vmem>>, %arg16: memref<32x64xbf16, #tpu.memory_space<vmem>>, %arg17: memref<1x64xf32, #tpu.memory_space<vmem>>, %arg18: memref<64x32xbf16, #tpu.memory_space<vmem>>, %arg19: memref<1x32xf32, #tpu.memory_space<vmem>>, %arg20: memref<1x32xf32, #tpu.memory_space<vmem>>, %arg21: memref<1x32xf32, #tpu.memory_space<vmem>>, %arg22: memref<16x32xf32, #tpu.memory_space<vmem>>) attributes {dimension_semantics = [#tpu.dimension_semantics<parallel>], iteration_bounds = array<i64: 1>, scalar_prefetch = 0 : i64, scratch_operands = 0 : i64, tpu.core_type = #tpu.core_type<tc>, window_params = [{transform_indices = @transform_0, window_bounds = array<i64: 16, 32>}, {transform_indices = @transform_1, window_bounds = array<i64: 2, 16, 64>}, {transform_indices = @transform_2, window_bounds = array<i64: 2, 1, 16>}, {pipeline_mode = #tpu.pipeline_mode<synchronous>, transform_indices = @transform_3, window_bounds = array<i64: 32, 96>}, {pipeline_mode = #tpu.pipeline_mode<synchronous>, transform_indices = @transform_4, window_bounds = array<i64: 1, 96>}, {pipeline_mode = #tpu.pipeline_mode<synchronous>, transform_indices = @transform_5, window_bounds = array<i64: 32, 32>}, {pipeline_mode = #tpu.pipeline_mode<synchronous>, transform_indices = @transform_6, window_bounds = array<i64: 1, 32>}, {pipeline_mode = #tpu.pipeline_mode<synchronous>, transform_indices = @transform_7, window_bounds = array<i64: 1, 32>}, {pipeline_mode = #tpu.pipeline_mode<synchronous>, transform_indices = @transform_8, window_bounds = array<i64: 1, 32>}, {pipeline_mode = #tpu.pipeline_mode<synchronous>, transform_indices = @transform_9, window_bounds = array<i64: 32, 32>}, {pipeline_mode = #tpu.pipeline_mode<synchronous>, transform_indices = @transform_10, window_bounds = array<i64: 1, 32>}, {pipeline_mode = #tpu.pipeline_mode<synchronous>, transform_indices = @transform_11, window_bounds = array<i64: 32, 32>}, {pipeline_mode = #tpu.pipeline_mode<synchronous>, transform_indices = @transform_12, window_bounds = array<i64: 1, 32>}, {pipeline_mode = #tpu.pipeline_mode<synchronous>, transform_indices = @transform_13, window_bounds = array<i64: 1, 32>}, {pipeline_mode = #tpu.pipeline_mode<synchronous>, transform_indices = @transform_14, window_bounds = array<i64: 1, 32>}, {pipeline_mode = #tpu.pipeline_mode<synchronous>, transform_indices = @transform_15, window_bounds = array<i64: 32, 64>}, {pipeline_mode = #tpu.pipeline_mode<synchronous>, transform_indices = @transform_16, window_bounds = array<i64: 1, 64>}, {pipeline_mode = #tpu.pipeline_mode<synchronous>, transform_indices = @transform_17, window_bounds = array<i64: 64, 32>}, {pipeline_mode = #tpu.pipeline_mode<synchronous>, transform_indices = @transform_18, window_bounds = array<i64: 1, 32>}, {pipeline_mode = #tpu.pipeline_mode<synchronous>, transform_indices = @transform_19, window_bounds = array<i64: 1, 32>}, {pipeline_mode = #tpu.pipeline_mode<synchronous>, transform_indices = @transform_20, window_bounds = array<i64: 1, 32>}, {transform_indices = @transform_21, window_bounds = array<i64: 16, 32>}]} {
    %c0 = arith.constant 0 : index
    %c0_0 = arith.constant 0 : index
    %0 = vector.load %arg1[%c0, %c0_0] : memref<16x32xf32, #tpu.memory_space<vmem>>, vector<16x32xf32>
    %1 = arith.truncf %0 : vector<16x32xf32> to vector<16x32xbf16>
    %c0_1 = arith.constant 0 : index
    %c0_2 = arith.constant 0 : index
    %2 = vector.load %arg4[%c0_1, %c0_2] : memref<32x96xbf16, #tpu.memory_space<vmem>>, vector<32x96xbf16>
    %cst = arith.constant dense<0.000000e+00> : vector<16x96xf32>
    %3 = tpu.matmul %1, %2, %cst {dimension_numbers = #tpu.dot_dimension_numbers<[1], [0], [0], [1], [0, 0, 1, 1], [], []>} : vector<16x32xbf16>, vector<32x96xbf16>, vector<16x96xf32> -> vector<16x96xf32>
    %c0_3 = arith.constant 0 : index
    %c0_4 = arith.constant 0 : index
    %4 = vector.load %arg5[%c0_3, %c0_4] : memref<1x96xf32, #tpu.memory_space<vmem>>, vector<1x96xf32>
    %5 = vector.broadcast %4 : vector<1x96xf32> to vector<16x96xf32>
    %6 = arith.addf %3, %5 : vector<16x96xf32>
    %7 = vector.extract_strided_slice %6 {offsets = [0, 0], sizes = [16, 32], strides = [1, 1]} : vector<16x96xf32> to vector<16x32xf32>
    %cst_5 = arith.constant 0.353553385 : f32
    %8 = vector.broadcast %cst_5 : f32 to vector<16x32xf32>
    %9 = arith.mulf %7, %8 : vector<16x32xf32>
    %10 = vector.extract_strided_slice %6 {offsets = [0, 32], sizes = [16, 32], strides = [1, 1]} : vector<16x96xf32> to vector<16x32xf32>
    %11 = vector.extract_strided_slice %6 {offsets = [0, 64], sizes = [16, 32], strides = [1, 1]} : vector<16x96xf32> to vector<16x32xf32>
    %12 = vector.extract_strided_slice %9 {offsets = [0, 0], sizes = [8, 8], strides = [1, 1]} : vector<16x32xf32> to vector<8x8xf32>
    %13 = arith.truncf %12 : vector<8x8xf32> to vector<8x8xbf16>
    %14 = vector.extract_strided_slice %10 {offsets = [0, 0], sizes = [8, 8], strides = [1, 1]} : vector<16x32xf32> to vector<8x8xf32>
    %15 = arith.truncf %14 : vector<8x8xf32> to vector<8x8xbf16>
    %cst_6 = arith.constant dense<0.000000e+00> : vector<8x8xf32>
    %16 = tpu.matmul %13, %15, %cst_6 {dimension_numbers = #tpu.dot_dimension_numbers<[1], [1], [0], [0], [0, 0, 1, 0], [], []>} : vector<8x8xbf16>, vector<8x8xbf16>, vector<8x8xf32> -> vector<8x8xf32>
    %cst_7 = arith.constant dense<0xFF800000> : vector<8xf32>
    %17 = vector.multi_reduction <maximumf>, %16, %cst_7 [1] : vector<8x8xf32> to vector<8xf32>
    %18 = vector.shape_cast %17 : vector<8xf32> to vector<8x1xf32>
    %19 = vector.broadcast %18 : vector<8x1xf32> to vector<8x8xf32>
    %20 = arith.subf %16, %19 : vector<8x8xf32>
    %21 = math.exp %20 : vector<8x8xf32>
    %cst_8 = arith.constant dense<0.000000e+00> : vector<8xf32>
    %22 = vector.multi_reduction <add>, %21, %cst_8 [1] : vector<8x8xf32> to vector<8xf32>
    %23 = vector.shape_cast %22 : vector<8xf32> to vector<8x1xf32>
    %24 = tpu.reciprocal %23 {approx = true} : vector<8x1xf32> -> vector<8x1xf32>
    %25 = vector.broadcast %24 : vector<8x1xf32> to vector<8x8xf32>
    %26 = arith.mulf %21, %25 : vector<8x8xf32>
    %27 = arith.truncf %26 : vector<8x8xf32> to vector<8x8xbf16>
    %28 = vector.extract_strided_slice %11 {offsets = [0, 0], sizes = [8, 8], strides = [1, 1]} : vector<16x32xf32> to vector<8x8xf32>
    %29 = arith.truncf %28 : vector<8x8xf32> to vector<8x8xbf16>
    %cst_9 = arith.constant dense<0.000000e+00> : vector<8x8xf32>
    %30 = tpu.matmul %27, %29, %cst_9 {dimension_numbers = #tpu.dot_dimension_numbers<[1], [0], [0], [1], [0, 0, 1, 1], [], []>} : vector<8x8xbf16>, vector<8x8xbf16>, vector<8x8xf32> -> vector<8x8xf32>
    %31 = vector.extract_strided_slice %9 {offsets = [0, 8], sizes = [8, 8], strides = [1, 1]} : vector<16x32xf32> to vector<8x8xf32>
    %32 = arith.truncf %31 : vector<8x8xf32> to vector<8x8xbf16>
    %33 = vector.extract_strided_slice %10 {offsets = [0, 8], sizes = [8, 8], strides = [1, 1]} : vector<16x32xf32> to vector<8x8xf32>
    %34 = arith.truncf %33 : vector<8x8xf32> to vector<8x8xbf16>
    %cst_10 = arith.constant dense<0.000000e+00> : vector<8x8xf32>
    %35 = tpu.matmul %32, %34, %cst_10 {dimension_numbers = #tpu.dot_dimension_numbers<[1], [1], [0], [0], [0, 0, 1, 0], [], []>} : vector<8x8xbf16>, vector<8x8xbf16>, vector<8x8xf32> -> vector<8x8xf32>
    %cst_11 = arith.constant dense<0xFF800000> : vector<8xf32>
    %36 = vector.multi_reduction <maximumf>, %35, %cst_11 [1] : vector<8x8xf32> to vector<8xf32>
    %37 = vector.shape_cast %36 : vector<8xf32> to vector<8x1xf32>
    %38 = vector.broadcast %37 : vector<8x1xf32> to vector<8x8xf32>
    %39 = arith.subf %35, %38 : vector<8x8xf32>
    %40 = math.exp %39 : vector<8x8xf32>
    %cst_12 = arith.constant dense<0.000000e+00> : vector<8xf32>
    %41 = vector.multi_reduction <add>, %40, %cst_12 [1] : vector<8x8xf32> to vector<8xf32>
    %42 = vector.shape_cast %41 : vector<8xf32> to vector<8x1xf32>
    %43 = tpu.reciprocal %42 {approx = true} : vector<8x1xf32> -> vector<8x1xf32>
    %44 = vector.broadcast %43 : vector<8x1xf32> to vector<8x8xf32>
    %45 = arith.mulf %40, %44 : vector<8x8xf32>
    %46 = arith.truncf %45 : vector<8x8xf32> to vector<8x8xbf16>
    %47 = vector.extract_strided_slice %11 {offsets = [0, 8], sizes = [8, 8], strides = [1, 1]} : vector<16x32xf32> to vector<8x8xf32>
    %48 = arith.truncf %47 : vector<8x8xf32> to vector<8x8xbf16>
    %cst_13 = arith.constant dense<0.000000e+00> : vector<8x8xf32>
    %49 = tpu.matmul %46, %48, %cst_13 {dimension_numbers = #tpu.dot_dimension_numbers<[1], [0], [0], [1], [0, 0, 1, 1], [], []>} : vector<8x8xbf16>, vector<8x8xbf16>, vector<8x8xf32> -> vector<8x8xf32>
    %50 = vector.extract_strided_slice %9 {offsets = [0, 16], sizes = [8, 8], strides = [1, 1]} : vector<16x32xf32> to vector<8x8xf32>
    %51 = arith.truncf %50 : vector<8x8xf32> to vector<8x8xbf16>
    %52 = vector.extract_strided_slice %10 {offsets = [0, 16], sizes = [8, 8], strides = [1, 1]} : vector<16x32xf32> to vector<8x8xf32>
    %53 = arith.truncf %52 : vector<8x8xf32> to vector<8x8xbf16>
    %cst_14 = arith.constant dense<0.000000e+00> : vector<8x8xf32>
    %54 = tpu.matmul %51, %53, %cst_14 {dimension_numbers = #tpu.dot_dimension_numbers<[1], [1], [0], [0], [0, 0, 1, 0], [], []>} : vector<8x8xbf16>, vector<8x8xbf16>, vector<8x8xf32> -> vector<8x8xf32>
    %cst_15 = arith.constant dense<0xFF800000> : vector<8xf32>
    %55 = vector.multi_reduction <maximumf>, %54, %cst_15 [1] : vector<8x8xf32> to vector<8xf32>
    %56 = vector.shape_cast %55 : vector<8xf32> to vector<8x1xf32>
    %57 = vector.broadcast %56 : vector<8x1xf32> to vector<8x8xf32>
    %58 = arith.subf %54, %57 : vector<8x8xf32>
    %59 = math.exp %58 : vector<8x8xf32>
    %cst_16 = arith.constant dense<0.000000e+00> : vector<8xf32>
    %60 = vector.multi_reduction <add>, %59, %cst_16 [1] : vector<8x8xf32> to vector<8xf32>
    %61 = vector.shape_cast %60 : vector<8xf32> to vector<8x1xf32>
    %62 = tpu.reciprocal %61 {approx = true} : vector<8x1xf32> -> vector<8x1xf32>
    %63 = vector.broadcast %62 : vector<8x1xf32> to vector<8x8xf32>
    %64 = arith.mulf %59, %63 : vector<8x8xf32>
    %65 = arith.truncf %64 : vector<8x8xf32> to vector<8x8xbf16>
    %66 = vector.extract_strided_slice %11 {offsets = [0, 16], sizes = [8, 8], strides = [1, 1]} : vector<16x32xf32> to vector<8x8xf32>
    %67 = arith.truncf %66 : vector<8x8xf32> to vector<8x8xbf16>
    %cst_17 = arith.constant dense<0.000000e+00> : vector<8x8xf32>
    %68 = tpu.matmul %65, %67, %cst_17 {dimension_numbers = #tpu.dot_dimension_numbers<[1], [0], [0], [1], [0, 0, 1, 1], [], []>} : vector<8x8xbf16>, vector<8x8xbf16>, vector<8x8xf32> -> vector<8x8xf32>
    %69 = vector.extract_strided_slice %9 {offsets = [0, 24], sizes = [8, 8], strides = [1, 1]} : vector<16x32xf32> to vector<8x8xf32>
    %70 = arith.truncf %69 : vector<8x8xf32> to vector<8x8xbf16>
    %71 = vector.extract_strided_slice %10 {offsets = [0, 24], sizes = [8, 8], strides = [1, 1]} : vector<16x32xf32> to vector<8x8xf32>
    %72 = arith.truncf %71 : vector<8x8xf32> to vector<8x8xbf16>
    %cst_18 = arith.constant dense<0.000000e+00> : vector<8x8xf32>
    %73 = tpu.matmul %70, %72, %cst_18 {dimension_numbers = #tpu.dot_dimension_numbers<[1], [1], [0], [0], [0, 0, 1, 0], [], []>} : vector<8x8xbf16>, vector<8x8xbf16>, vector<8x8xf32> -> vector<8x8xf32>
    %cst_19 = arith.constant dense<0xFF800000> : vector<8xf32>
    %74 = vector.multi_reduction <maximumf>, %73, %cst_19 [1] : vector<8x8xf32> to vector<8xf32>
    %75 = vector.shape_cast %74 : vector<8xf32> to vector<8x1xf32>
    %76 = vector.broadcast %75 : vector<8x1xf32> to vector<8x8xf32>
    %77 = arith.subf %73, %76 : vector<8x8xf32>
    %78 = math.exp %77 : vector<8x8xf32>
    %cst_20 = arith.constant dense<0.000000e+00> : vector<8xf32>
    %79 = vector.multi_reduction <add>, %78, %cst_20 [1] : vector<8x8xf32> to vector<8xf32>
    %80 = vector.shape_cast %79 : vector<8xf32> to vector<8x1xf32>
    %81 = tpu.reciprocal %80 {approx = true} : vector<8x1xf32> -> vector<8x1xf32>
    %82 = vector.broadcast %81 : vector<8x1xf32> to vector<8x8xf32>
    %83 = arith.mulf %78, %82 : vector<8x8xf32>
    %84 = arith.truncf %83 : vector<8x8xf32> to vector<8x8xbf16>
    %85 = vector.extract_strided_slice %11 {offsets = [0, 24], sizes = [8, 8], strides = [1, 1]} : vector<16x32xf32> to vector<8x8xf32>
    %86 = arith.truncf %85 : vector<8x8xf32> to vector<8x8xbf16>
    %cst_21 = arith.constant dense<0.000000e+00> : vector<8x8xf32>
    %87 = tpu.matmul %84, %86, %cst_21 {dimension_numbers = #tpu.dot_dimension_numbers<[1], [0], [0], [1], [0, 0, 1, 1], [], []>} : vector<8x8xbf16>, vector<8x8xbf16>, vector<8x8xf32> -> vector<8x8xf32>
    %88 = tpu.concatenate %30, %49, %68, %87 in 1 : vector<8x8xf32>, vector<8x8xf32>, vector<8x8xf32>, vector<8x8xf32> -> vector<8x32xf32>
    %89 = vector.extract_strided_slice %9 {offsets = [8, 0], sizes = [8, 8], strides = [1, 1]} : vector<16x32xf32> to vector<8x8xf32>
    %90 = arith.truncf %89 : vector<8x8xf32> to vector<8x8xbf16>
    %91 = vector.extract_strided_slice %10 {offsets = [8, 0], sizes = [8, 8], strides = [1, 1]} : vector<16x32xf32> to vector<8x8xf32>
    %92 = arith.truncf %91 : vector<8x8xf32> to vector<8x8xbf16>
    %cst_22 = arith.constant dense<0.000000e+00> : vector<8x8xf32>
    %93 = tpu.matmul %90, %92, %cst_22 {dimension_numbers = #tpu.dot_dimension_numbers<[1], [1], [0], [0], [0, 0, 1, 0], [], []>} : vector<8x8xbf16>, vector<8x8xbf16>, vector<8x8xf32> -> vector<8x8xf32>
    %cst_23 = arith.constant dense<0xFF800000> : vector<8xf32>
    %94 = vector.multi_reduction <maximumf>, %93, %cst_23 [1] : vector<8x8xf32> to vector<8xf32>
    %95 = vector.shape_cast %94 : vector<8xf32> to vector<8x1xf32>
    %96 = vector.broadcast %95 : vector<8x1xf32> to vector<8x8xf32>
    %97 = arith.subf %93, %96 : vector<8x8xf32>
    %98 = math.exp %97 : vector<8x8xf32>
    %cst_24 = arith.constant dense<0.000000e+00> : vector<8xf32>
    %99 = vector.multi_reduction <add>, %98, %cst_24 [1] : vector<8x8xf32> to vector<8xf32>
    %100 = vector.shape_cast %99 : vector<8xf32> to vector<8x1xf32>
    %101 = tpu.reciprocal %100 {approx = true} : vector<8x1xf32> -> vector<8x1xf32>
    %102 = vector.broadcast %101 : vector<8x1xf32> to vector<8x8xf32>
    %103 = arith.mulf %98, %102 : vector<8x8xf32>
    %104 = arith.truncf %103 : vector<8x8xf32> to vector<8x8xbf16>
    %105 = vector.extract_strided_slice %11 {offsets = [8, 0], sizes = [8, 8], strides = [1, 1]} : vector<16x32xf32> to vector<8x8xf32>
    %106 = arith.truncf %105 : vector<8x8xf32> to vector<8x8xbf16>
    %cst_25 = arith.constant dense<0.000000e+00> : vector<8x8xf32>
    %107 = tpu.matmul %104, %106, %cst_25 {dimension_numbers = #tpu.dot_dimension_numbers<[1], [0], [0], [1], [0, 0, 1, 1], [], []>} : vector<8x8xbf16>, vector<8x8xbf16>, vector<8x8xf32> -> vector<8x8xf32>
    %108 = vector.extract_strided_slice %9 {offsets = [8, 8], sizes = [8, 8], strides = [1, 1]} : vector<16x32xf32> to vector<8x8xf32>
    %109 = arith.truncf %108 : vector<8x8xf32> to vector<8x8xbf16>
    %110 = vector.extract_strided_slice %10 {offsets = [8, 8], sizes = [8, 8], strides = [1, 1]} : vector<16x32xf32> to vector<8x8xf32>
    %111 = arith.truncf %110 : vector<8x8xf32> to vector<8x8xbf16>
    %cst_26 = arith.constant dense<0.000000e+00> : vector<8x8xf32>
    %112 = tpu.matmul %109, %111, %cst_26 {dimension_numbers = #tpu.dot_dimension_numbers<[1], [1], [0], [0], [0, 0, 1, 0], [], []>} : vector<8x8xbf16>, vector<8x8xbf16>, vector<8x8xf32> -> vector<8x8xf32>
    %cst_27 = arith.constant dense<0xFF800000> : vector<8xf32>
    %113 = vector.multi_reduction <maximumf>, %112, %cst_27 [1] : vector<8x8xf32> to vector<8xf32>
    %114 = vector.shape_cast %113 : vector<8xf32> to vector<8x1xf32>
    %115 = vector.broadcast %114 : vector<8x1xf32> to vector<8x8xf32>
    %116 = arith.subf %112, %115 : vector<8x8xf32>
    %117 = math.exp %116 : vector<8x8xf32>
    %cst_28 = arith.constant dense<0.000000e+00> : vector<8xf32>
    %118 = vector.multi_reduction <add>, %117, %cst_28 [1] : vector<8x8xf32> to vector<8xf32>
    %119 = vector.shape_cast %118 : vector<8xf32> to vector<8x1xf32>
    %120 = tpu.reciprocal %119 {approx = true} : vector<8x1xf32> -> vector<8x1xf32>
    %121 = vector.broadcast %120 : vector<8x1xf32> to vector<8x8xf32>
    %122 = arith.mulf %117, %121 : vector<8x8xf32>
    %123 = arith.truncf %122 : vector<8x8xf32> to vector<8x8xbf16>
    %124 = vector.extract_strided_slice %11 {offsets = [8, 8], sizes = [8, 8], strides = [1, 1]} : vector<16x32xf32> to vector<8x8xf32>
    %125 = arith.truncf %124 : vector<8x8xf32> to vector<8x8xbf16>
    %cst_29 = arith.constant dense<0.000000e+00> : vector<8x8xf32>
    %126 = tpu.matmul %123, %125, %cst_29 {dimension_numbers = #tpu.dot_dimension_numbers<[1], [0], [0], [1], [0, 0, 1, 1], [], []>} : vector<8x8xbf16>, vector<8x8xbf16>, vector<8x8xf32> -> vector<8x8xf32>
    %127 = vector.extract_strided_slice %9 {offsets = [8, 16], sizes = [8, 8], strides = [1, 1]} : vector<16x32xf32> to vector<8x8xf32>
    %128 = arith.truncf %127 : vector<8x8xf32> to vector<8x8xbf16>
    %129 = vector.extract_strided_slice %10 {offsets = [8, 16], sizes = [8, 8], strides = [1, 1]} : vector<16x32xf32> to vector<8x8xf32>
    %130 = arith.truncf %129 : vector<8x8xf32> to vector<8x8xbf16>
    %cst_30 = arith.constant dense<0.000000e+00> : vector<8x8xf32>
    %131 = tpu.matmul %128, %130, %cst_30 {dimension_numbers = #tpu.dot_dimension_numbers<[1], [1], [0], [0], [0, 0, 1, 0], [], []>} : vector<8x8xbf16>, vector<8x8xbf16>, vector<8x8xf32> -> vector<8x8xf32>
    %cst_31 = arith.constant dense<0xFF800000> : vector<8xf32>
    %132 = vector.multi_reduction <maximumf>, %131, %cst_31 [1] : vector<8x8xf32> to vector<8xf32>
    %133 = vector.shape_cast %132 : vector<8xf32> to vector<8x1xf32>
    %134 = vector.broadcast %133 : vector<8x1xf32> to vector<8x8xf32>
    %135 = arith.subf %131, %134 : vector<8x8xf32>
    %136 = math.exp %135 : vector<8x8xf32>
    %cst_32 = arith.constant dense<0.000000e+00> : vector<8xf32>
    %137 = vector.multi_reduction <add>, %136, %cst_32 [1] : vector<8x8xf32> to vector<8xf32>
    %138 = vector.shape_cast %137 : vector<8xf32> to vector<8x1xf32>
    %139 = tpu.reciprocal %138 {approx = true} : vector<8x1xf32> -> vector<8x1xf32>
    %140 = vector.broadcast %139 : vector<8x1xf32> to vector<8x8xf32>
    %141 = arith.mulf %136, %140 : vector<8x8xf32>
    %142 = arith.truncf %141 : vector<8x8xf32> to vector<8x8xbf16>
    %143 = vector.extract_strided_slice %11 {offsets = [8, 16], sizes = [8, 8], strides = [1, 1]} : vector<16x32xf32> to vector<8x8xf32>
    %144 = arith.truncf %143 : vector<8x8xf32> to vector<8x8xbf16>
    %cst_33 = arith.constant dense<0.000000e+00> : vector<8x8xf32>
    %145 = tpu.matmul %142, %144, %cst_33 {dimension_numbers = #tpu.dot_dimension_numbers<[1], [0], [0], [1], [0, 0, 1, 1], [], []>} : vector<8x8xbf16>, vector<8x8xbf16>, vector<8x8xf32> -> vector<8x8xf32>
    %146 = vector.extract_strided_slice %9 {offsets = [8, 24], sizes = [8, 8], strides = [1, 1]} : vector<16x32xf32> to vector<8x8xf32>
    %147 = arith.truncf %146 : vector<8x8xf32> to vector<8x8xbf16>
    %148 = vector.extract_strided_slice %10 {offsets = [8, 24], sizes = [8, 8], strides = [1, 1]} : vector<16x32xf32> to vector<8x8xf32>
    %149 = arith.truncf %148 : vector<8x8xf32> to vector<8x8xbf16>
    %cst_34 = arith.constant dense<0.000000e+00> : vector<8x8xf32>
    %150 = tpu.matmul %147, %149, %cst_34 {dimension_numbers = #tpu.dot_dimension_numbers<[1], [1], [0], [0], [0, 0, 1, 0], [], []>} : vector<8x8xbf16>, vector<8x8xbf16>, vector<8x8xf32> -> vector<8x8xf32>
    %cst_35 = arith.constant dense<0xFF800000> : vector<8xf32>
    %151 = vector.multi_reduction <maximumf>, %150, %cst_35 [1] : vector<8x8xf32> to vector<8xf32>
    %152 = vector.shape_cast %151 : vector<8xf32> to vector<8x1xf32>
    %153 = vector.broadcast %152 : vector<8x1xf32> to vector<8x8xf32>
    %154 = arith.subf %150, %153 : vector<8x8xf32>
    %155 = math.exp %154 : vector<8x8xf32>
    %cst_36 = arith.constant dense<0.000000e+00> : vector<8xf32>
    %156 = vector.multi_reduction <add>, %155, %cst_36 [1] : vector<8x8xf32> to vector<8xf32>
    %157 = vector.shape_cast %156 : vector<8xf32> to vector<8x1xf32>
    %158 = tpu.reciprocal %157 {approx = true} : vector<8x1xf32> -> vector<8x1xf32>
    %159 = vector.broadcast %158 : vector<8x1xf32> to vector<8x8xf32>
    %160 = arith.mulf %155, %159 : vector<8x8xf32>
    %161 = arith.truncf %160 : vector<8x8xf32> to vector<8x8xbf16>
    %162 = vector.extract_strided_slice %11 {offsets = [8, 24], sizes = [8, 8], strides = [1, 1]} : vector<16x32xf32> to vector<8x8xf32>
    %163 = arith.truncf %162 : vector<8x8xf32> to vector<8x8xbf16>
    %cst_37 = arith.constant dense<0.000000e+00> : vector<8x8xf32>
    %164 = tpu.matmul %161, %163, %cst_37 {dimension_numbers = #tpu.dot_dimension_numbers<[1], [0], [0], [1], [0, 0, 1, 1], [], []>} : vector<8x8xbf16>, vector<8x8xbf16>, vector<8x8xf32> -> vector<8x8xf32>
    %165 = tpu.concatenate %107, %126, %145, %164 in 1 : vector<8x8xf32>, vector<8x8xf32>, vector<8x8xf32>, vector<8x8xf32> -> vector<8x32xf32>
    %166 = tpu.concatenate %88, %165 in 0 : vector<8x32xf32>, vector<8x32xf32> -> vector<16x32xf32>
    %167 = arith.truncf %166 : vector<16x32xf32> to vector<16x32xbf16>
    %c0_38 = arith.constant 0 : index
    %c0_39 = arith.constant 0 : index
    %168 = vector.load %arg6[%c0_38, %c0_39] : memref<32x32xbf16, #tpu.memory_space<vmem>>, vector<32x32xbf16>
    %cst_40 = arith.constant dense<0.000000e+00> : vector<16x32xf32>
    %169 = tpu.matmul %167, %168, %cst_40 {dimension_numbers = #tpu.dot_dimension_numbers<[1], [0], [0], [1], [0, 0, 1, 1], [], []>} : vector<16x32xbf16>, vector<32x32xbf16>, vector<16x32xf32> -> vector<16x32xf32>
    %c0_41 = arith.constant 0 : index
    %c0_42 = arith.constant 0 : index
    %170 = vector.load %arg7[%c0_41, %c0_42] : memref<1x32xf32, #tpu.memory_space<vmem>>, vector<1x32xf32>
    %171 = vector.broadcast %170 : vector<1x32xf32> to vector<16x32xf32>
    %172 = arith.addf %169, %171 : vector<16x32xf32>
    %173 = arith.addf %172, %0 : vector<16x32xf32>
    %c0_43 = arith.constant 0 : index
    %c0_44 = arith.constant 0 : index
    %174 = vector.load %arg8[%c0_43, %c0_44] : memref<1x32xf32, #tpu.memory_space<vmem>>, vector<1x32xf32>
    %c0_45 = arith.constant 0 : index
    %c0_46 = arith.constant 0 : index
    %175 = vector.load %arg9[%c0_45, %c0_46] : memref<1x32xf32, #tpu.memory_space<vmem>>, vector<1x32xf32>
    %cst_47 = arith.constant dense<0.000000e+00> : vector<16xf32>
    %176 = vector.multi_reduction <add>, %173, %cst_47 [1] : vector<16x32xf32> to vector<16xf32>
    %177 = vector.shape_cast %176 : vector<16xf32> to vector<16x1xf32>
    %cst_48 = arith.constant 3.200000e+01 : f32
    %178 = vector.broadcast %cst_48 : f32 to vector<16x1xf32>
    %179 = arith.divf %177, %178 : vector<16x1xf32>
    %180 = vector.broadcast %179 : vector<16x1xf32> to vector<16x32xf32>
    %181 = arith.subf %173, %180 : vector<16x32xf32>
    %182 = arith.mulf %181, %181 : vector<16x32xf32>
    %cst_49 = arith.constant dense<0.000000e+00> : vector<16xf32>
    %183 = vector.multi_reduction <add>, %182, %cst_49 [1] : vector<16x32xf32> to vector<16xf32>
    %184 = vector.shape_cast %183 : vector<16xf32> to vector<16x1xf32>
    %cst_50 = arith.constant 3.200000e+01 : f32
    %185 = vector.broadcast %cst_50 : f32 to vector<16x1xf32>
    %186 = arith.divf %184, %185 : vector<16x1xf32>
    %187 = vector.broadcast %179 : vector<16x1xf32> to vector<16x32xf32>
    %188 = arith.subf %173, %187 : vector<16x32xf32>
    %cst_51 = arith.constant 9.99999996E-13 : f32
    %189 = vector.broadcast %cst_51 : f32 to vector<16x1xf32>
    %190 = arith.addf %186, %189 : vector<16x1xf32>
    %191 = math.rsqrt %190 : vector<16x1xf32>
    %192 = vector.broadcast %191 : vector<16x1xf32> to vector<16x32xf32>
    %193 = arith.mulf %188, %192 : vector<16x32xf32>
    %194 = vector.broadcast %174 : vector<1x32xf32> to vector<16x32xf32>
    %195 = arith.mulf %193, %194 : vector<16x32xf32>
    %196 = vector.broadcast %175 : vector<1x32xf32> to vector<16x32xf32>
    %197 = arith.addf %195, %196 : vector<16x32xf32>
    %198 = arith.truncf %197 : vector<16x32xf32> to vector<16x32xbf16>
    %c0_52 = arith.constant 0 : index
    %c0_53 = arith.constant 0 : index
    %199 = vector.load %arg10[%c0_52, %c0_53] : memref<32x32xbf16, #tpu.memory_space<vmem>>, vector<32x32xbf16>
    %cst_54 = arith.constant dense<0.000000e+00> : vector<16x32xf32>
    %200 = tpu.matmul %198, %199, %cst_54 {dimension_numbers = #tpu.dot_dimension_numbers<[1], [0], [0], [1], [0, 0, 1, 1], [], []>} : vector<16x32xbf16>, vector<32x32xbf16>, vector<16x32xf32> -> vector<16x32xf32>
    %c0_55 = arith.constant 0 : index
    %c0_56 = arith.constant 0 : index
    %201 = vector.load %arg11[%c0_55, %c0_56] : memref<1x32xf32, #tpu.memory_space<vmem>>, vector<1x32xf32>
    %202 = vector.broadcast %201 : vector<1x32xf32> to vector<16x32xf32>
    %203 = arith.addf %200, %202 : vector<16x32xf32>
    %cst_57 = arith.constant 0.353553385 : f32
    %204 = vector.broadcast %cst_57 : f32 to vector<16x32xf32>
    %205 = arith.mulf %203, %204 : vector<16x32xf32>
    %c0_58 = arith.constant 0 : index
    %c0_59 = arith.constant 0 : index
    %c0_60 = arith.constant 0 : index
    %206 = vector.load %arg3[%c0_58, %c0_59, %c0_60] : memref<2x1x16xf32, #tpu.memory_space<vmem>>, vector<1x1x16xf32>
    %207 = vector.shape_cast %206 : vector<1x1x16xf32> to vector<1x16xf32>
    %c0_61 = arith.constant 0 : index
    %c0_62 = arith.constant 0 : index
    %c0_63 = arith.constant 0 : index
    %208 = vector.load %arg2[%c0_61, %c0_62, %c0_63] : memref<2x16x64xbf16, #tpu.memory_space<vmem>>, vector<1x16x8xbf16>
    %209 = vector.shape_cast %208 : vector<1x16x8xbf16> to vector<16x8xbf16>
    %c0_64 = arith.constant 0 : index
    %c0_65 = arith.constant 0 : index
    %c32 = arith.constant 32 : index
    %210 = vector.load %arg2[%c0_64, %c0_65, %c32] : memref<2x16x64xbf16, #tpu.memory_space<vmem>>, vector<1x16x8xbf16>
    %211 = vector.shape_cast %210 : vector<1x16x8xbf16> to vector<16x8xbf16>
    %212 = vector.extract_strided_slice %205 {offsets = [0, 0], sizes = [8, 8], strides = [1, 1]} : vector<16x32xf32> to vector<8x8xf32>
    %213 = arith.truncf %212 : vector<8x8xf32> to vector<8x8xbf16>
    %cst_66 = arith.constant dense<0.000000e+00> : vector<8x16xf32>
    %214 = tpu.matmul %213, %209, %cst_66 {dimension_numbers = #tpu.dot_dimension_numbers<[1], [1], [0], [0], [0, 0, 1, 0], [], []>} : vector<8x8xbf16>, vector<16x8xbf16>, vector<8x16xf32> -> vector<8x16xf32>
    %215 = vector.broadcast %207 : vector<1x16xf32> to vector<8x16xf32>
    %216 = arith.addf %214, %215 : vector<8x16xf32>
    %cst_67 = arith.constant dense<0xFF800000> : vector<8xf32>
    %217 = vector.multi_reduction <maximumf>, %216, %cst_67 [1] : vector<8x16xf32> to vector<8xf32>
    %218 = vector.shape_cast %217 : vector<8xf32> to vector<8x1xf32>
    %219 = vector.broadcast %218 : vector<8x1xf32> to vector<8x16xf32>
    %220 = arith.subf %216, %219 : vector<8x16xf32>
    %221 = math.exp %220 : vector<8x16xf32>
    %cst_68 = arith.constant dense<0.000000e+00> : vector<8xf32>
    %222 = vector.multi_reduction <add>, %221, %cst_68 [1] : vector<8x16xf32> to vector<8xf32>
    %223 = vector.shape_cast %222 : vector<8xf32> to vector<8x1xf32>
    %224 = tpu.reciprocal %223 {approx = true} : vector<8x1xf32> -> vector<8x1xf32>
    %225 = vector.broadcast %224 : vector<8x1xf32> to vector<8x16xf32>
    %226 = arith.mulf %221, %225 : vector<8x16xf32>
    %227 = arith.truncf %226 : vector<8x16xf32> to vector<8x16xbf16>
    %cst_69 = arith.constant dense<0.000000e+00> : vector<8x8xf32>
    %228 = tpu.matmul %227, %211, %cst_69 {dimension_numbers = #tpu.dot_dimension_numbers<[1], [0], [0], [1], [0, 0, 1, 1], [], []>} : vector<8x16xbf16>, vector<16x8xbf16>, vector<8x8xf32> -> vector<8x8xf32>
    %c0_70 = arith.constant 0 : index
    %c0_71 = arith.constant 0 : index
    %c8 = arith.constant 8 : index
    %229 = vector.load %arg2[%c0_70, %c0_71, %c8] : memref<2x16x64xbf16, #tpu.memory_space<vmem>>, vector<1x16x8xbf16>
    %230 = vector.shape_cast %229 : vector<1x16x8xbf16> to vector<16x8xbf16>
    %c0_72 = arith.constant 0 : index
    %c0_73 = arith.constant 0 : index
    %c40 = arith.constant 40 : index
    %231 = vector.load %arg2[%c0_72, %c0_73, %c40] : memref<2x16x64xbf16, #tpu.memory_space<vmem>>, vector<1x16x8xbf16>
    %232 = vector.shape_cast %231 : vector<1x16x8xbf16> to vector<16x8xbf16>
    %233 = vector.extract_strided_slice %205 {offsets = [0, 8], sizes = [8, 8], strides = [1, 1]} : vector<16x32xf32> to vector<8x8xf32>
    %234 = arith.truncf %233 : vector<8x8xf32> to vector<8x8xbf16>
    %cst_74 = arith.constant dense<0.000000e+00> : vector<8x16xf32>
    %235 = tpu.matmul %234, %230, %cst_74 {dimension_numbers = #tpu.dot_dimension_numbers<[1], [1], [0], [0], [0, 0, 1, 0], [], []>} : vector<8x8xbf16>, vector<16x8xbf16>, vector<8x16xf32> -> vector<8x16xf32>
    %236 = vector.broadcast %207 : vector<1x16xf32> to vector<8x16xf32>
    %237 = arith.addf %235, %236 : vector<8x16xf32>
    %cst_75 = arith.constant dense<0xFF800000> : vector<8xf32>
    %238 = vector.multi_reduction <maximumf>, %237, %cst_75 [1] : vector<8x16xf32> to vector<8xf32>
    %239 = vector.shape_cast %238 : vector<8xf32> to vector<8x1xf32>
    %240 = vector.broadcast %239 : vector<8x1xf32> to vector<8x16xf32>
    %241 = arith.subf %237, %240 : vector<8x16xf32>
    %242 = math.exp %241 : vector<8x16xf32>
    %cst_76 = arith.constant dense<0.000000e+00> : vector<8xf32>
    %243 = vector.multi_reduction <add>, %242, %cst_76 [1] : vector<8x16xf32> to vector<8xf32>
    %244 = vector.shape_cast %243 : vector<8xf32> to vector<8x1xf32>
    %245 = tpu.reciprocal %244 {approx = true} : vector<8x1xf32> -> vector<8x1xf32>
    %246 = vector.broadcast %245 : vector<8x1xf32> to vector<8x16xf32>
    %247 = arith.mulf %242, %246 : vector<8x16xf32>
    %248 = arith.truncf %247 : vector<8x16xf32> to vector<8x16xbf16>
    %cst_77 = arith.constant dense<0.000000e+00> : vector<8x8xf32>
    %249 = tpu.matmul %248, %232, %cst_77 {dimension_numbers = #tpu.dot_dimension_numbers<[1], [0], [0], [1], [0, 0, 1, 1], [], []>} : vector<8x16xbf16>, vector<16x8xbf16>, vector<8x8xf32> -> vector<8x8xf32>
    %c0_78 = arith.constant 0 : index
    %c0_79 = arith.constant 0 : index
    %c16 = arith.constant 16 : index
    %250 = vector.load %arg2[%c0_78, %c0_79, %c16] : memref<2x16x64xbf16, #tpu.memory_space<vmem>>, vector<1x16x8xbf16>
    %251 = vector.shape_cast %250 : vector<1x16x8xbf16> to vector<16x8xbf16>
    %c0_80 = arith.constant 0 : index
    %c0_81 = arith.constant 0 : index
    %c48 = arith.constant 48 : index
    %252 = vector.load %arg2[%c0_80, %c0_81, %c48] : memref<2x16x64xbf16, #tpu.memory_space<vmem>>, vector<1x16x8xbf16>
    %253 = vector.shape_cast %252 : vector<1x16x8xbf16> to vector<16x8xbf16>
    %254 = vector.extract_strided_slice %205 {offsets = [0, 16], sizes = [8, 8], strides = [1, 1]} : vector<16x32xf32> to vector<8x8xf32>
    %255 = arith.truncf %254 : vector<8x8xf32> to vector<8x8xbf16>
    %cst_82 = arith.constant dense<0.000000e+00> : vector<8x16xf32>
    %256 = tpu.matmul %255, %251, %cst_82 {dimension_numbers = #tpu.dot_dimension_numbers<[1], [1], [0], [0], [0, 0, 1, 0], [], []>} : vector<8x8xbf16>, vector<16x8xbf16>, vector<8x16xf32> -> vector<8x16xf32>
    %257 = vector.broadcast %207 : vector<1x16xf32> to vector<8x16xf32>
    %258 = arith.addf %256, %257 : vector<8x16xf32>
    %cst_83 = arith.constant dense<0xFF800000> : vector<8xf32>
    %259 = vector.multi_reduction <maximumf>, %258, %cst_83 [1] : vector<8x16xf32> to vector<8xf32>
    %260 = vector.shape_cast %259 : vector<8xf32> to vector<8x1xf32>
    %261 = vector.broadcast %260 : vector<8x1xf32> to vector<8x16xf32>
    %262 = arith.subf %258, %261 : vector<8x16xf32>
    %263 = math.exp %262 : vector<8x16xf32>
    %cst_84 = arith.constant dense<0.000000e+00> : vector<8xf32>
    %264 = vector.multi_reduction <add>, %263, %cst_84 [1] : vector<8x16xf32> to vector<8xf32>
    %265 = vector.shape_cast %264 : vector<8xf32> to vector<8x1xf32>
    %266 = tpu.reciprocal %265 {approx = true} : vector<8x1xf32> -> vector<8x1xf32>
    %267 = vector.broadcast %266 : vector<8x1xf32> to vector<8x16xf32>
    %268 = arith.mulf %263, %267 : vector<8x16xf32>
    %269 = arith.truncf %268 : vector<8x16xf32> to vector<8x16xbf16>
    %cst_85 = arith.constant dense<0.000000e+00> : vector<8x8xf32>
    %270 = tpu.matmul %269, %253, %cst_85 {dimension_numbers = #tpu.dot_dimension_numbers<[1], [0], [0], [1], [0, 0, 1, 1], [], []>} : vector<8x16xbf16>, vector<16x8xbf16>, vector<8x8xf32> -> vector<8x8xf32>
    %c0_86 = arith.constant 0 : index
    %c0_87 = arith.constant 0 : index
    %c24 = arith.constant 24 : index
    %271 = vector.load %arg2[%c0_86, %c0_87, %c24] : memref<2x16x64xbf16, #tpu.memory_space<vmem>>, vector<1x16x8xbf16>
    %272 = vector.shape_cast %271 : vector<1x16x8xbf16> to vector<16x8xbf16>
    %c0_88 = arith.constant 0 : index
    %c0_89 = arith.constant 0 : index
    %c56 = arith.constant 56 : index
    %273 = vector.load %arg2[%c0_88, %c0_89, %c56] : memref<2x16x64xbf16, #tpu.memory_space<vmem>>, vector<1x16x8xbf16>
    %274 = vector.shape_cast %273 : vector<1x16x8xbf16> to vector<16x8xbf16>
    %275 = vector.extract_strided_slice %205 {offsets = [0, 24], sizes = [8, 8], strides = [1, 1]} : vector<16x32xf32> to vector<8x8xf32>
    %276 = arith.truncf %275 : vector<8x8xf32> to vector<8x8xbf16>
    %cst_90 = arith.constant dense<0.000000e+00> : vector<8x16xf32>
    %277 = tpu.matmul %276, %272, %cst_90 {dimension_numbers = #tpu.dot_dimension_numbers<[1], [1], [0], [0], [0, 0, 1, 0], [], []>} : vector<8x8xbf16>, vector<16x8xbf16>, vector<8x16xf32> -> vector<8x16xf32>
    %278 = vector.broadcast %207 : vector<1x16xf32> to vector<8x16xf32>
    %279 = arith.addf %277, %278 : vector<8x16xf32>
    %cst_91 = arith.constant dense<0xFF800000> : vector<8xf32>
    %280 = vector.multi_reduction <maximumf>, %279, %cst_91 [1] : vector<8x16xf32> to vector<8xf32>
    %281 = vector.shape_cast %280 : vector<8xf32> to vector<8x1xf32>
    %282 = vector.broadcast %281 : vector<8x1xf32> to vector<8x16xf32>
    %283 = arith.subf %279, %282 : vector<8x16xf32>
    %284 = math.exp %283 : vector<8x16xf32>
    %cst_92 = arith.constant dense<0.000000e+00> : vector<8xf32>
    %285 = vector.multi_reduction <add>, %284, %cst_92 [1] : vector<8x16xf32> to vector<8xf32>
    %286 = vector.shape_cast %285 : vector<8xf32> to vector<8x1xf32>
    %287 = tpu.reciprocal %286 {approx = true} : vector<8x1xf32> -> vector<8x1xf32>
    %288 = vector.broadcast %287 : vector<8x1xf32> to vector<8x16xf32>
    %289 = arith.mulf %284, %288 : vector<8x16xf32>
    %290 = arith.truncf %289 : vector<8x16xf32> to vector<8x16xbf16>
    %cst_93 = arith.constant dense<0.000000e+00> : vector<8x8xf32>
    %291 = tpu.matmul %290, %274, %cst_93 {dimension_numbers = #tpu.dot_dimension_numbers<[1], [0], [0], [1], [0, 0, 1, 1], [], []>} : vector<8x16xbf16>, vector<16x8xbf16>, vector<8x8xf32> -> vector<8x8xf32>
    %292 = tpu.concatenate %228, %249, %270, %291 in 1 : vector<8x8xf32>, vector<8x8xf32>, vector<8x8xf32>, vector<8x8xf32> -> vector<8x32xf32>
    %c1 = arith.constant 1 : index
    %c0_94 = arith.constant 0 : index
    %c0_95 = arith.constant 0 : index
    %293 = vector.load %arg3[%c1, %c0_94, %c0_95] : memref<2x1x16xf32, #tpu.memory_space<vmem>>, vector<1x1x16xf32>
    %294 = vector.shape_cast %293 : vector<1x1x16xf32> to vector<1x16xf32>
    %c1_96 = arith.constant 1 : index
    %c0_97 = arith.constant 0 : index
    %c0_98 = arith.constant 0 : index
    %295 = vector.load %arg2[%c1_96, %c0_97, %c0_98] : memref<2x16x64xbf16, #tpu.memory_space<vmem>>, vector<1x16x8xbf16>
    %296 = vector.shape_cast %295 : vector<1x16x8xbf16> to vector<16x8xbf16>
    %c1_99 = arith.constant 1 : index
    %c0_100 = arith.constant 0 : index
    %c32_101 = arith.constant 32 : index
    %297 = vector.load %arg2[%c1_99, %c0_100, %c32_101] : memref<2x16x64xbf16, #tpu.memory_space<vmem>>, vector<1x16x8xbf16>
    %298 = vector.shape_cast %297 : vector<1x16x8xbf16> to vector<16x8xbf16>
    %299 = vector.extract_strided_slice %205 {offsets = [8, 0], sizes = [8, 8], strides = [1, 1]} : vector<16x32xf32> to vector<8x8xf32>
    %300 = arith.truncf %299 : vector<8x8xf32> to vector<8x8xbf16>
    %cst_102 = arith.constant dense<0.000000e+00> : vector<8x16xf32>
    %301 = tpu.matmul %300, %296, %cst_102 {dimension_numbers = #tpu.dot_dimension_numbers<[1], [1], [0], [0], [0, 0, 1, 0], [], []>} : vector<8x8xbf16>, vector<16x8xbf16>, vector<8x16xf32> -> vector<8x16xf32>
    %302 = vector.broadcast %294 : vector<1x16xf32> to vector<8x16xf32>
    %303 = arith.addf %301, %302 : vector<8x16xf32>
    %cst_103 = arith.constant dense<0xFF800000> : vector<8xf32>
    %304 = vector.multi_reduction <maximumf>, %303, %cst_103 [1] : vector<8x16xf32> to vector<8xf32>
    %305 = vector.shape_cast %304 : vector<8xf32> to vector<8x1xf32>
    %306 = vector.broadcast %305 : vector<8x1xf32> to vector<8x16xf32>
    %307 = arith.subf %303, %306 : vector<8x16xf32>
    %308 = math.exp %307 : vector<8x16xf32>
    %cst_104 = arith.constant dense<0.000000e+00> : vector<8xf32>
    %309 = vector.multi_reduction <add>, %308, %cst_104 [1] : vector<8x16xf32> to vector<8xf32>
    %310 = vector.shape_cast %309 : vector<8xf32> to vector<8x1xf32>
    %311 = tpu.reciprocal %310 {approx = true} : vector<8x1xf32> -> vector<8x1xf32>
    %312 = vector.broadcast %311 : vector<8x1xf32> to vector<8x16xf32>
    %313 = arith.mulf %308, %312 : vector<8x16xf32>
    %314 = arith.truncf %313 : vector<8x16xf32> to vector<8x16xbf16>
    %cst_105 = arith.constant dense<0.000000e+00> : vector<8x8xf32>
    %315 = tpu.matmul %314, %298, %cst_105 {dimension_numbers = #tpu.dot_dimension_numbers<[1], [0], [0], [1], [0, 0, 1, 1], [], []>} : vector<8x16xbf16>, vector<16x8xbf16>, vector<8x8xf32> -> vector<8x8xf32>
    %c1_106 = arith.constant 1 : index
    %c0_107 = arith.constant 0 : index
    %c8_108 = arith.constant 8 : index
    %316 = vector.load %arg2[%c1_106, %c0_107, %c8_108] : memref<2x16x64xbf16, #tpu.memory_space<vmem>>, vector<1x16x8xbf16>
    %317 = vector.shape_cast %316 : vector<1x16x8xbf16> to vector<16x8xbf16>
    %c1_109 = arith.constant 1 : index
    %c0_110 = arith.constant 0 : index
    %c40_111 = arith.constant 40 : index
    %318 = vector.load %arg2[%c1_109, %c0_110, %c40_111] : memref<2x16x64xbf16, #tpu.memory_space<vmem>>, vector<1x16x8xbf16>
    %319 = vector.shape_cast %318 : vector<1x16x8xbf16> to vector<16x8xbf16>
    %320 = vector.extract_strided_slice %205 {offsets = [8, 8], sizes = [8, 8], strides = [1, 1]} : vector<16x32xf32> to vector<8x8xf32>
    %321 = arith.truncf %320 : vector<8x8xf32> to vector<8x8xbf16>
    %cst_112 = arith.constant dense<0.000000e+00> : vector<8x16xf32>
    %322 = tpu.matmul %321, %317, %cst_112 {dimension_numbers = #tpu.dot_dimension_numbers<[1], [1], [0], [0], [0, 0, 1, 0], [], []>} : vector<8x8xbf16>, vector<16x8xbf16>, vector<8x16xf32> -> vector<8x16xf32>
    %323 = vector.broadcast %294 : vector<1x16xf32> to vector<8x16xf32>
    %324 = arith.addf %322, %323 : vector<8x16xf32>
    %cst_113 = arith.constant dense<0xFF800000> : vector<8xf32>
    %325 = vector.multi_reduction <maximumf>, %324, %cst_113 [1] : vector<8x16xf32> to vector<8xf32>
    %326 = vector.shape_cast %325 : vector<8xf32> to vector<8x1xf32>
    %327 = vector.broadcast %326 : vector<8x1xf32> to vector<8x16xf32>
    %328 = arith.subf %324, %327 : vector<8x16xf32>
    %329 = math.exp %328 : vector<8x16xf32>
    %cst_114 = arith.constant dense<0.000000e+00> : vector<8xf32>
    %330 = vector.multi_reduction <add>, %329, %cst_114 [1] : vector<8x16xf32> to vector<8xf32>
    %331 = vector.shape_cast %330 : vector<8xf32> to vector<8x1xf32>
    %332 = tpu.reciprocal %331 {approx = true} : vector<8x1xf32> -> vector<8x1xf32>
    %333 = vector.broadcast %332 : vector<8x1xf32> to vector<8x16xf32>
    %334 = arith.mulf %329, %333 : vector<8x16xf32>
    %335 = arith.truncf %334 : vector<8x16xf32> to vector<8x16xbf16>
    %cst_115 = arith.constant dense<0.000000e+00> : vector<8x8xf32>
    %336 = tpu.matmul %335, %319, %cst_115 {dimension_numbers = #tpu.dot_dimension_numbers<[1], [0], [0], [1], [0, 0, 1, 1], [], []>} : vector<8x16xbf16>, vector<16x8xbf16>, vector<8x8xf32> -> vector<8x8xf32>
    %c1_116 = arith.constant 1 : index
    %c0_117 = arith.constant 0 : index
    %c16_118 = arith.constant 16 : index
    %337 = vector.load %arg2[%c1_116, %c0_117, %c16_118] : memref<2x16x64xbf16, #tpu.memory_space<vmem>>, vector<1x16x8xbf16>
    %338 = vector.shape_cast %337 : vector<1x16x8xbf16> to vector<16x8xbf16>
    %c1_119 = arith.constant 1 : index
    %c0_120 = arith.constant 0 : index
    %c48_121 = arith.constant 48 : index
    %339 = vector.load %arg2[%c1_119, %c0_120, %c48_121] : memref<2x16x64xbf16, #tpu.memory_space<vmem>>, vector<1x16x8xbf16>
    %340 = vector.shape_cast %339 : vector<1x16x8xbf16> to vector<16x8xbf16>
    %341 = vector.extract_strided_slice %205 {offsets = [8, 16], sizes = [8, 8], strides = [1, 1]} : vector<16x32xf32> to vector<8x8xf32>
    %342 = arith.truncf %341 : vector<8x8xf32> to vector<8x8xbf16>
    %cst_122 = arith.constant dense<0.000000e+00> : vector<8x16xf32>
    %343 = tpu.matmul %342, %338, %cst_122 {dimension_numbers = #tpu.dot_dimension_numbers<[1], [1], [0], [0], [0, 0, 1, 0], [], []>} : vector<8x8xbf16>, vector<16x8xbf16>, vector<8x16xf32> -> vector<8x16xf32>
    %344 = vector.broadcast %294 : vector<1x16xf32> to vector<8x16xf32>
    %345 = arith.addf %343, %344 : vector<8x16xf32>
    %cst_123 = arith.constant dense<0xFF800000> : vector<8xf32>
    %346 = vector.multi_reduction <maximumf>, %345, %cst_123 [1] : vector<8x16xf32> to vector<8xf32>
    %347 = vector.shape_cast %346 : vector<8xf32> to vector<8x1xf32>
    %348 = vector.broadcast %347 : vector<8x1xf32> to vector<8x16xf32>
    %349 = arith.subf %345, %348 : vector<8x16xf32>
    %350 = math.exp %349 : vector<8x16xf32>
    %cst_124 = arith.constant dense<0.000000e+00> : vector<8xf32>
    %351 = vector.multi_reduction <add>, %350, %cst_124 [1] : vector<8x16xf32> to vector<8xf32>
    %352 = vector.shape_cast %351 : vector<8xf32> to vector<8x1xf32>
    %353 = tpu.reciprocal %352 {approx = true} : vector<8x1xf32> -> vector<8x1xf32>
    %354 = vector.broadcast %353 : vector<8x1xf32> to vector<8x16xf32>
    %355 = arith.mulf %350, %354 : vector<8x16xf32>
    %356 = arith.truncf %355 : vector<8x16xf32> to vector<8x16xbf16>
    %cst_125 = arith.constant dense<0.000000e+00> : vector<8x8xf32>
    %357 = tpu.matmul %356, %340, %cst_125 {dimension_numbers = #tpu.dot_dimension_numbers<[1], [0], [0], [1], [0, 0, 1, 1], [], []>} : vector<8x16xbf16>, vector<16x8xbf16>, vector<8x8xf32> -> vector<8x8xf32>
    %c1_126 = arith.constant 1 : index
    %c0_127 = arith.constant 0 : index
    %c24_128 = arith.constant 24 : index
    %358 = vector.load %arg2[%c1_126, %c0_127, %c24_128] : memref<2x16x64xbf16, #tpu.memory_space<vmem>>, vector<1x16x8xbf16>
    %359 = vector.shape_cast %358 : vector<1x16x8xbf16> to vector<16x8xbf16>
    %c1_129 = arith.constant 1 : index
    %c0_130 = arith.constant 0 : index
    %c56_131 = arith.constant 56 : index
    %360 = vector.load %arg2[%c1_129, %c0_130, %c56_131] : memref<2x16x64xbf16, #tpu.memory_space<vmem>>, vector<1x16x8xbf16>
    %361 = vector.shape_cast %360 : vector<1x16x8xbf16> to vector<16x8xbf16>
    %362 = vector.extract_strided_slice %205 {offsets = [8, 24], sizes = [8, 8], strides = [1, 1]} : vector<16x32xf32> to vector<8x8xf32>
    %363 = arith.truncf %362 : vector<8x8xf32> to vector<8x8xbf16>
    %cst_132 = arith.constant dense<0.000000e+00> : vector<8x16xf32>
    %364 = tpu.matmul %363, %359, %cst_132 {dimension_numbers = #tpu.dot_dimension_numbers<[1], [1], [0], [0], [0, 0, 1, 0], [], []>} : vector<8x8xbf16>, vector<16x8xbf16>, vector<8x16xf32> -> vector<8x16xf32>
    %365 = vector.broadcast %294 : vector<1x16xf32> to vector<8x16xf32>
    %366 = arith.addf %364, %365 : vector<8x16xf32>
    %cst_133 = arith.constant dense<0xFF800000> : vector<8xf32>
    %367 = vector.multi_reduction <maximumf>, %366, %cst_133 [1] : vector<8x16xf32> to vector<8xf32>
    %368 = vector.shape_cast %367 : vector<8xf32> to vector<8x1xf32>
    %369 = vector.broadcast %368 : vector<8x1xf32> to vector<8x16xf32>
    %370 = arith.subf %366, %369 : vector<8x16xf32>
    %371 = math.exp %370 : vector<8x16xf32>
    %cst_134 = arith.constant dense<0.000000e+00> : vector<8xf32>
    %372 = vector.multi_reduction <add>, %371, %cst_134 [1] : vector<8x16xf32> to vector<8xf32>
    %373 = vector.shape_cast %372 : vector<8xf32> to vector<8x1xf32>
    %374 = tpu.reciprocal %373 {approx = true} : vector<8x1xf32> -> vector<8x1xf32>
    %375 = vector.broadcast %374 : vector<8x1xf32> to vector<8x16xf32>
    %376 = arith.mulf %371, %375 : vector<8x16xf32>
    %377 = arith.truncf %376 : vector<8x16xf32> to vector<8x16xbf16>
    %cst_135 = arith.constant dense<0.000000e+00> : vector<8x8xf32>
    %378 = tpu.matmul %377, %361, %cst_135 {dimension_numbers = #tpu.dot_dimension_numbers<[1], [0], [0], [1], [0, 0, 1, 1], [], []>} : vector<8x16xbf16>, vector<16x8xbf16>, vector<8x8xf32> -> vector<8x8xf32>
    %379 = tpu.concatenate %315, %336, %357, %378 in 1 : vector<8x8xf32>, vector<8x8xf32>, vector<8x8xf32>, vector<8x8xf32> -> vector<8x32xf32>
    %380 = tpu.concatenate %292, %379 in 0 : vector<8x32xf32>, vector<8x32xf32> -> vector<16x32xf32>
    %381 = arith.truncf %380 : vector<16x32xf32> to vector<16x32xbf16>
    %c0_136 = arith.constant 0 : index
    %c0_137 = arith.constant 0 : index
    %382 = vector.load %arg12[%c0_136, %c0_137] : memref<32x32xbf16, #tpu.memory_space<vmem>>, vector<32x32xbf16>
    %cst_138 = arith.constant dense<0.000000e+00> : vector<16x32xf32>
    %383 = tpu.matmul %381, %382, %cst_138 {dimension_numbers = #tpu.dot_dimension_numbers<[1], [0], [0], [1], [0, 0, 1, 1], [], []>} : vector<16x32xbf16>, vector<32x32xbf16>, vector<16x32xf32> -> vector<16x32xf32>
    %c0_139 = arith.constant 0 : index
    %c0_140 = arith.constant 0 : index
    %384 = vector.load %arg13[%c0_139, %c0_140] : memref<1x32xf32, #tpu.memory_space<vmem>>, vector<1x32xf32>
    %385 = vector.broadcast %384 : vector<1x32xf32> to vector<16x32xf32>
    %386 = arith.addf %383, %385 : vector<16x32xf32>
    %387 = arith.addf %386, %197 : vector<16x32xf32>
    %c0_141 = arith.constant 0 : index
    %c0_142 = arith.constant 0 : index
    %388 = vector.load %arg14[%c0_141, %c0_142] : memref<1x32xf32, #tpu.memory_space<vmem>>, vector<1x32xf32>
    %c0_143 = arith.constant 0 : index
    %c0_144 = arith.constant 0 : index
    %389 = vector.load %arg15[%c0_143, %c0_144] : memref<1x32xf32, #tpu.memory_space<vmem>>, vector<1x32xf32>
    %cst_145 = arith.constant dense<0.000000e+00> : vector<16xf32>
    %390 = vector.multi_reduction <add>, %387, %cst_145 [1] : vector<16x32xf32> to vector<16xf32>
    %391 = vector.shape_cast %390 : vector<16xf32> to vector<16x1xf32>
    %cst_146 = arith.constant 3.200000e+01 : f32
    %392 = vector.broadcast %cst_146 : f32 to vector<16x1xf32>
    %393 = arith.divf %391, %392 : vector<16x1xf32>
    %394 = vector.broadcast %393 : vector<16x1xf32> to vector<16x32xf32>
    %395 = arith.subf %387, %394 : vector<16x32xf32>
    %396 = arith.mulf %395, %395 : vector<16x32xf32>
    %cst_147 = arith.constant dense<0.000000e+00> : vector<16xf32>
    %397 = vector.multi_reduction <add>, %396, %cst_147 [1] : vector<16x32xf32> to vector<16xf32>
    %398 = vector.shape_cast %397 : vector<16xf32> to vector<16x1xf32>
    %cst_148 = arith.constant 3.200000e+01 : f32
    %399 = vector.broadcast %cst_148 : f32 to vector<16x1xf32>
    %400 = arith.divf %398, %399 : vector<16x1xf32>
    %401 = vector.broadcast %393 : vector<16x1xf32> to vector<16x32xf32>
    %402 = arith.subf %387, %401 : vector<16x32xf32>
    %cst_149 = arith.constant 9.99999996E-13 : f32
    %403 = vector.broadcast %cst_149 : f32 to vector<16x1xf32>
    %404 = arith.addf %400, %403 : vector<16x1xf32>
    %405 = math.rsqrt %404 : vector<16x1xf32>
    %406 = vector.broadcast %405 : vector<16x1xf32> to vector<16x32xf32>
    %407 = arith.mulf %402, %406 : vector<16x32xf32>
    %408 = vector.broadcast %388 : vector<1x32xf32> to vector<16x32xf32>
    %409 = arith.mulf %407, %408 : vector<16x32xf32>
    %410 = vector.broadcast %389 : vector<1x32xf32> to vector<16x32xf32>
    %411 = arith.addf %409, %410 : vector<16x32xf32>
    %412 = arith.truncf %411 : vector<16x32xf32> to vector<16x32xbf16>
    %c0_150 = arith.constant 0 : index
    %c0_151 = arith.constant 0 : index
    %413 = vector.load %arg16[%c0_150, %c0_151] : memref<32x64xbf16, #tpu.memory_space<vmem>>, vector<32x64xbf16>
    %cst_152 = arith.constant dense<0.000000e+00> : vector<16x64xf32>
    %414 = tpu.matmul %412, %413, %cst_152 {dimension_numbers = #tpu.dot_dimension_numbers<[1], [0], [0], [1], [0, 0, 1, 1], [], []>} : vector<16x32xbf16>, vector<32x64xbf16>, vector<16x64xf32> -> vector<16x64xf32>
    %c0_153 = arith.constant 0 : index
    %c0_154 = arith.constant 0 : index
    %415 = vector.load %arg17[%c0_153, %c0_154] : memref<1x64xf32, #tpu.memory_space<vmem>>, vector<1x64xf32>
    %416 = vector.broadcast %415 : vector<1x64xf32> to vector<16x64xf32>
    %417 = arith.addf %414, %416 : vector<16x64xf32>
    %418 = arith.mulf %417, %417 : vector<16x64xf32>
    %419 = arith.mulf %417, %418 : vector<16x64xf32>
    %cst_155 = arith.constant 4.471500e-02 : f32
    %420 = vector.broadcast %cst_155 : f32 to vector<16x64xf32>
    %421 = arith.mulf %420, %419 : vector<16x64xf32>
    %422 = arith.addf %417, %421 : vector<16x64xf32>
    %cst_156 = arith.constant 0.797884583 : f32
    %423 = vector.broadcast %cst_156 : f32 to vector<16x64xf32>
    %424 = arith.mulf %423, %422 : vector<16x64xf32>
    %425 = math.tanh %424 : vector<16x64xf32>
    %cst_157 = arith.constant 1.000000e+00 : f32
    %426 = vector.broadcast %cst_157 : f32 to vector<16x64xf32>
    %427 = arith.addf %426, %425 : vector<16x64xf32>
    %cst_158 = arith.constant 5.000000e-01 : f32
    %428 = vector.broadcast %cst_158 : f32 to vector<16x64xf32>
    %429 = arith.mulf %428, %427 : vector<16x64xf32>
    %430 = arith.mulf %417, %429 : vector<16x64xf32>
    %431 = arith.truncf %430 : vector<16x64xf32> to vector<16x64xbf16>
    %c0_159 = arith.constant 0 : index
    %c0_160 = arith.constant 0 : index
    %432 = vector.load %arg18[%c0_159, %c0_160] : memref<64x32xbf16, #tpu.memory_space<vmem>>, vector<64x32xbf16>
    %cst_161 = arith.constant dense<0.000000e+00> : vector<16x32xf32>
    %433 = tpu.matmul %431, %432, %cst_161 {dimension_numbers = #tpu.dot_dimension_numbers<[1], [0], [0], [1], [0, 0, 1, 1], [], []>} : vector<16x64xbf16>, vector<64x32xbf16>, vector<16x32xf32> -> vector<16x32xf32>
    %c0_162 = arith.constant 0 : index
    %c0_163 = arith.constant 0 : index
    %434 = vector.load %arg19[%c0_162, %c0_163] : memref<1x32xf32, #tpu.memory_space<vmem>>, vector<1x32xf32>
    %435 = vector.broadcast %434 : vector<1x32xf32> to vector<16x32xf32>
    %436 = arith.addf %433, %435 : vector<16x32xf32>
    %437 = arith.addf %436, %411 : vector<16x32xf32>
    %c0_164 = arith.constant 0 : index
    %c0_165 = arith.constant 0 : index
    %438 = vector.load %arg20[%c0_164, %c0_165] : memref<1x32xf32, #tpu.memory_space<vmem>>, vector<1x32xf32>
    %c0_166 = arith.constant 0 : index
    %c0_167 = arith.constant 0 : index
    %439 = vector.load %arg21[%c0_166, %c0_167] : memref<1x32xf32, #tpu.memory_space<vmem>>, vector<1x32xf32>
    %cst_168 = arith.constant dense<0.000000e+00> : vector<16xf32>
    %440 = vector.multi_reduction <add>, %437, %cst_168 [1] : vector<16x32xf32> to vector<16xf32>
    %441 = vector.shape_cast %440 : vector<16xf32> to vector<16x1xf32>
    %cst_169 = arith.constant 3.200000e+01 : f32
    %442 = vector.broadcast %cst_169 : f32 to vector<16x1xf32>
    %443 = arith.divf %441, %442 : vector<16x1xf32>
    %444 = vector.broadcast %443 : vector<16x1xf32> to vector<16x32xf32>
    %445 = arith.subf %437, %444 : vector<16x32xf32>
    %446 = arith.mulf %445, %445 : vector<16x32xf32>
    %cst_170 = arith.constant dense<0.000000e+00> : vector<16xf32>
    %447 = vector.multi_reduction <add>, %446, %cst_170 [1] : vector<16x32xf32> to vector<16xf32>
    %448 = vector.shape_cast %447 : vector<16xf32> to vector<16x1xf32>
    %cst_171 = arith.constant 3.200000e+01 : f32
    %449 = vector.broadcast %cst_171 : f32 to vector<16x1xf32>
    %450 = arith.divf %448, %449 : vector<16x1xf32>
    %451 = vector.broadcast %443 : vector<16x1xf32> to vector<16x32xf32>
    %452 = arith.subf %437, %451 : vector<16x32xf32>
    %cst_172 = arith.constant 9.99999996E-13 : f32
    %453 = vector.broadcast %cst_172 : f32 to vector<16x1xf32>
    %454 = arith.addf %450, %453 : vector<16x1xf32>
    %455 = math.rsqrt %454 : vector<16x1xf32>
    %456 = vector.broadcast %455 : vector<16x1xf32> to vector<16x32xf32>
    %457 = arith.mulf %452, %456 : vector<16x32xf32>
    %458 = vector.broadcast %438 : vector<1x32xf32> to vector<16x32xf32>
    %459 = arith.mulf %457, %458 : vector<16x32xf32>
    %460 = vector.broadcast %439 : vector<1x32xf32> to vector<16x32xf32>
    %461 = arith.addf %459, %460 : vector<16x32xf32>
    %c0_173 = arith.constant 0 : index
    %c0_174 = arith.constant 0 : index
    %462 = vector.load %arg22[%c0_173, %c0_174] : memref<16x32xf32, #tpu.memory_space<vmem>>, vector<16x32xf32>
    tpu.vector_store %arg22[%c0_173, %c0_174], %461 {strides = array<i32>} : memref<16x32xf32, #tpu.memory_space<vmem>>, vector<16x32xf32>,
    return
  }
  func.func @transform_0(%arg0: i32) -> (i32, i32) {
    %c0_i32 = arith.constant 0 : i32
    %c0_i32_0 = arith.constant 0 : i32
    return %arg0, %c0_i32 : i32, i32
  }
  func.func @transform_1(%arg0: i32) -> (i32, i32, i32) {
    %c0_i32 = arith.constant 0 : i32
    %c0_i32_0 = arith.constant 0 : i32
    %c0_i32_1 = arith.constant 0 : i32
    return %arg0, %c0_i32, %c0_i32_0 : i32, i32, i32
  }
  func.func @transform_2(%arg0: i32) -> (i32, i32, i32) {
    %c0_i32 = arith.constant 0 : i32
    %c0_i32_0 = arith.constant 0 : i32
    %c0_i32_1 = arith.constant 0 : i32
    return %arg0, %c0_i32, %c0_i32_0 : i32, i32, i32
  }
  func.func @transform_3(%arg0: i32) -> (i32, i32) {
    %c0_i32 = arith.constant 0 : i32
    %c0_i32_0 = arith.constant 0 : i32
    %c0_i32_1 = arith.constant 0 : i32
    return %c0_i32, %c0_i32_0 : i32, i32
  }
  func.func @transform_4(%arg0: i32) -> (i32, i32) {
    %c0_i32 = arith.constant 0 : i32
    %c0_i32_0 = arith.constant 0 : i32
    %c0_i32_1 = arith.constant 0 : i32
    return %c0_i32, %c0_i32_0 : i32, i32
  }
  func.func @transform_5(%arg0: i32) -> (i32, i32) {
    %c0_i32 = arith.constant 0 : i32
    %c0_i32_0 = arith.constant 0 : i32
    %c0_i32_1 = arith.constant 0 : i32
    return %c0_i32, %c0_i32_0 : i32, i32
  }
  func.func @transform_6(%arg0: i32) -> (i32, i32) {
    %c0_i32 = arith.constant 0 : i32
    %c0_i32_0 = arith.constant 0 : i32
    %c0_i32_1 = arith.constant 0 : i32
    return %c0_i32, %c0_i32_0 : i32, i32
  }
  func.func @transform_7(%arg0: i32) -> (i32, i32) {
    %c0_i32 = arith.constant 0 : i32
    %c0_i32_0 = arith.constant 0 : i32
    %c0_i32_1 = arith.constant 0 : i32
    return %c0_i32, %c0_i32_0 : i32, i32
  }
  func.func @transform_8(%arg0: i32) -> (i32, i32) {
    %c0_i32 = arith.constant 0 : i32
    %c0_i32_0 = arith.constant 0 : i32
    %c0_i32_1 = arith.constant 0 : i32
    return %c0_i32, %c0_i32_0 : i32, i32
  }
  func.func @transform_9(%arg0: i32) -> (i32, i32) {
    %c0_i32 = arith.constant 0 : i32
    %c0_i32_0 = arith.constant 0 : i32
    %c0_i32_1 = arith.constant 0 : i32
    return %c0_i32, %c0_i32_0 : i32, i32
  }
  func.func @transform_10(%arg0: i32) -> (i32, i32) {
    %c0_i32 = arith.constant 0 : i32
    %c0_i32_0 = arith.constant 0 : i32
    %c0_i32_1 = arith.constant 0 : i32
    return %c0_i32, %c0_i32_0 : i32, i32
  }
  func.func @transform_11(%arg0: i32) -> (i32, i32) {
    %c0_i32 = arith.constant 0 : i32
    %c0_i32_0 = arith.constant 0 : i32
    %c0_i32_1 = arith.constant 0 : i32
    return %c0_i32, %c0_i32_0 : i32, i32
  }
  func.func @transform_12(%arg0: i32) -> (i32, i32) {
    %c0_i32 = arith.constant 0 : i32
    %c0_i32_0 = arith.constant 0 : i32
    %c0_i32_1 = arith.constant 0 : i32
    return %c0_i32, %c0_i32_0 : i32, i32
  }
  func.func @transform_13(%arg0: i32) -> (i32, i32) {
    %c0_i32 = arith.constant 0 : i32
    %c0_i32_0 = arith.constant 0 : i32
    %c0_i32_1 = arith.constant 0 : i32
    return %c0_i32, %c0_i32_0 : i32, i32
  }
  func.func @transform_14(%arg0: i32) -> (i32, i32) {
    %c0_i32 = arith.constant 0 : i32
    %c0_i32_0 = arith.constant 0 : i32
    %c0_i32_1 = arith.constant 0 : i32
    return %c0_i32, %c0_i32_0 : i32, i32
  }
  func.func @transform_15(%arg0: i32) -> (i32, i32) {
    %c0_i32 = arith.constant 0 : i32
    %c0_i32_0 = arith.constant 0 : i32
    %c0_i32_1 = arith.constant 0 : i32
    return %c0_i32, %c0_i32_0 : i32, i32
  }
  func.func @transform_16(%arg0: i32) -> (i32, i32) {
    %c0_i32 = arith.constant 0 : i32
    %c0_i32_0 = arith.constant 0 : i32
    %c0_i32_1 = arith.constant 0 : i32
    return %c0_i32, %c0_i32_0 : i32, i32
  }
  func.func @transform_17(%arg0: i32) -> (i32, i32) {
    %c0_i32 = arith.constant 0 : i32
    %c0_i32_0 = arith.constant 0 : i32
    %c0_i32_1 = arith.constant 0 : i32
    return %c0_i32, %c0_i32_0 : i32, i32
  }
  func.func @transform_18(%arg0: i32) -> (i32, i32) {
    %c0_i32 = arith.constant 0 : i32
    %c0_i32_0 = arith.constant 0 : i32
    %c0_i32_1 = arith.constant 0 : i32
    return %c0_i32, %c0_i32_0 : i32, i32
  }
  func.func @transform_19(%arg0: i32) -> (i32, i32) {
    %c0_i32 = arith.constant 0 : i32
    %c0_i32_0 = arith.constant 0 : i32
    %c0_i32_1 = arith.constant 0 : i32
    return %c0_i32, %c0_i32_0 : i32, i32
  }
  func.func @transform_20(%arg0: i32) -> (i32, i32) {
    %c0_i32 = arith.constant 0 : i32
    %c0_i32_0 = arith.constant 0 : i32
    %c0_i32_1 = arith.constant 0 : i32
    return %c0_i32, %c0_i32_0 : i32, i32
  }
  func.func @transform_21(%arg0: i32) -> (i32, i32) {
    %c0_i32 = arith.constant 0 : i32
    %c0_i32_0 = arith.constant 0 : i32
    return %arg0, %c0_i32 : i32, i32
  }
}

module attributes {stable_mosaic.version = 11 : i64} {
  func.func @_qformer_layer_kernel(%arg0: i32, %arg1: memref<16x32xf32, #tpu.memory_space<vmem>>, %arg2: memref<32x96xbf16, #tpu.memory_space<vmem>>, %arg3: memref<1x96xf32, #tpu.memory_space<vmem>>, %arg4: memref<32x32xbf16, #tpu.memory_space<vmem>>, %arg5: memref<1x32xf32, #tpu.memory_space<vmem>>, %arg6: memref<1x32xf32, #tpu.memory_space<vmem>>, %arg7: memref<1x32xf32, #tpu.memory_space<vmem>>, %arg8: memref<32x64xbf16, #tpu.memory_space<vmem>>, %arg9: memref<1x64xf32, #tpu.memory_space<vmem>>, %arg10: memref<64x32xbf16, #tpu.memory_space<vmem>>, %arg11: memref<1x32xf32, #tpu.memory_space<vmem>>, %arg12: memref<1x32xf32, #tpu.memory_space<vmem>>, %arg13: memref<1x32xf32, #tpu.memory_space<vmem>>, %arg14: memref<16x32xf32, #tpu.memory_space<vmem>>) attributes {dimension_semantics = [#tpu.dimension_semantics<parallel>], iteration_bounds = array<i64: 1>, scalar_prefetch = 0 : i64, scratch_operands = 0 : i64, tpu.core_type = #tpu.core_type<tc>, window_params = [{transform_indices = @transform_0, window_bounds = array<i64: 16, 32>}, {pipeline_mode = #tpu.pipeline_mode<synchronous>, transform_indices = @transform_1, window_bounds = array<i64: 32, 96>}, {pipeline_mode = #tpu.pipeline_mode<synchronous>, transform_indices = @transform_2, window_bounds = array<i64: 1, 96>}, {pipeline_mode = #tpu.pipeline_mode<synchronous>, transform_indices = @transform_3, window_bounds = array<i64: 32, 32>}, {pipeline_mode = #tpu.pipeline_mode<synchronous>, transform_indices = @transform_4, window_bounds = array<i64: 1, 32>}, {pipeline_mode = #tpu.pipeline_mode<synchronous>, transform_indices = @transform_5, window_bounds = array<i64: 1, 32>}, {pipeline_mode = #tpu.pipeline_mode<synchronous>, transform_indices = @transform_6, window_bounds = array<i64: 1, 32>}, {pipeline_mode = #tpu.pipeline_mode<synchronous>, transform_indices = @transform_7, window_bounds = array<i64: 32, 64>}, {pipeline_mode = #tpu.pipeline_mode<synchronous>, transform_indices = @transform_8, window_bounds = array<i64: 1, 64>}, {pipeline_mode = #tpu.pipeline_mode<synchronous>, transform_indices = @transform_9, window_bounds = array<i64: 64, 32>}, {pipeline_mode = #tpu.pipeline_mode<synchronous>, transform_indices = @transform_10, window_bounds = array<i64: 1, 32>}, {pipeline_mode = #tpu.pipeline_mode<synchronous>, transform_indices = @transform_11, window_bounds = array<i64: 1, 32>}, {pipeline_mode = #tpu.pipeline_mode<synchronous>, transform_indices = @transform_12, window_bounds = array<i64: 1, 32>}, {transform_indices = @transform_13, window_bounds = array<i64: 16, 32>}]} {
    %c0 = arith.constant 0 : index
    %c0_0 = arith.constant 0 : index
    %0 = vector.load %arg1[%c0, %c0_0] : memref<16x32xf32, #tpu.memory_space<vmem>>, vector<16x32xf32>
    %1 = arith.truncf %0 : vector<16x32xf32> to vector<16x32xbf16>
    %c0_1 = arith.constant 0 : index
    %c0_2 = arith.constant 0 : index
    %2 = vector.load %arg2[%c0_1, %c0_2] : memref<32x96xbf16, #tpu.memory_space<vmem>>, vector<32x96xbf16>
    %cst = arith.constant dense<0.000000e+00> : vector<16x96xf32>
    %3 = tpu.matmul %1, %2, %cst {dimension_numbers = #tpu.dot_dimension_numbers<[1], [0], [0], [1], [0, 0, 1, 1], [], []>} : vector<16x32xbf16>, vector<32x96xbf16>, vector<16x96xf32> -> vector<16x96xf32>
    %c0_3 = arith.constant 0 : index
    %c0_4 = arith.constant 0 : index
    %4 = vector.load %arg3[%c0_3, %c0_4] : memref<1x96xf32, #tpu.memory_space<vmem>>, vector<1x96xf32>
    %5 = vector.broadcast %4 : vector<1x96xf32> to vector<16x96xf32>
    %6 = arith.addf %3, %5 : vector<16x96xf32>
    %7 = vector.extract_strided_slice %6 {offsets = [0, 0], sizes = [16, 32], strides = [1, 1]} : vector<16x96xf32> to vector<16x32xf32>
    %cst_5 = arith.constant 0.353553385 : f32
    %8 = vector.broadcast %cst_5 : f32 to vector<16x32xf32>
    %9 = arith.mulf %7, %8 : vector<16x32xf32>
    %10 = vector.extract_strided_slice %6 {offsets = [0, 32], sizes = [16, 32], strides = [1, 1]} : vector<16x96xf32> to vector<16x32xf32>
    %11 = vector.extract_strided_slice %6 {offsets = [0, 64], sizes = [16, 32], strides = [1, 1]} : vector<16x96xf32> to vector<16x32xf32>
    %12 = vector.extract_strided_slice %9 {offsets = [0, 0], sizes = [8, 8], strides = [1, 1]} : vector<16x32xf32> to vector<8x8xf32>
    %13 = arith.truncf %12 : vector<8x8xf32> to vector<8x8xbf16>
    %14 = vector.extract_strided_slice %10 {offsets = [0, 0], sizes = [8, 8], strides = [1, 1]} : vector<16x32xf32> to vector<8x8xf32>
    %15 = arith.truncf %14 : vector<8x8xf32> to vector<8x8xbf16>
    %cst_6 = arith.constant dense<0.000000e+00> : vector<8x8xf32>
    %16 = tpu.matmul %13, %15, %cst_6 {dimension_numbers = #tpu.dot_dimension_numbers<[1], [1], [0], [0], [0, 0, 1, 0], [], []>} : vector<8x8xbf16>, vector<8x8xbf16>, vector<8x8xf32> -> vector<8x8xf32>
    %cst_7 = arith.constant dense<0xFF800000> : vector<8xf32>
    %17 = vector.multi_reduction <maximumf>, %16, %cst_7 [1] : vector<8x8xf32> to vector<8xf32>
    %18 = vector.shape_cast %17 : vector<8xf32> to vector<8x1xf32>
    %19 = vector.broadcast %18 : vector<8x1xf32> to vector<8x8xf32>
    %20 = arith.subf %16, %19 : vector<8x8xf32>
    %21 = math.exp %20 : vector<8x8xf32>
    %cst_8 = arith.constant dense<0.000000e+00> : vector<8xf32>
    %22 = vector.multi_reduction <add>, %21, %cst_8 [1] : vector<8x8xf32> to vector<8xf32>
    %23 = vector.shape_cast %22 : vector<8xf32> to vector<8x1xf32>
    %24 = tpu.reciprocal %23 {approx = true} : vector<8x1xf32> -> vector<8x1xf32>
    %25 = vector.broadcast %24 : vector<8x1xf32> to vector<8x8xf32>
    %26 = arith.mulf %21, %25 : vector<8x8xf32>
    %27 = arith.truncf %26 : vector<8x8xf32> to vector<8x8xbf16>
    %28 = vector.extract_strided_slice %11 {offsets = [0, 0], sizes = [8, 8], strides = [1, 1]} : vector<16x32xf32> to vector<8x8xf32>
    %29 = arith.truncf %28 : vector<8x8xf32> to vector<8x8xbf16>
    %cst_9 = arith.constant dense<0.000000e+00> : vector<8x8xf32>
    %30 = tpu.matmul %27, %29, %cst_9 {dimension_numbers = #tpu.dot_dimension_numbers<[1], [0], [0], [1], [0, 0, 1, 1], [], []>} : vector<8x8xbf16>, vector<8x8xbf16>, vector<8x8xf32> -> vector<8x8xf32>
    %31 = vector.extract_strided_slice %9 {offsets = [0, 8], sizes = [8, 8], strides = [1, 1]} : vector<16x32xf32> to vector<8x8xf32>
    %32 = arith.truncf %31 : vector<8x8xf32> to vector<8x8xbf16>
    %33 = vector.extract_strided_slice %10 {offsets = [0, 8], sizes = [8, 8], strides = [1, 1]} : vector<16x32xf32> to vector<8x8xf32>
    %34 = arith.truncf %33 : vector<8x8xf32> to vector<8x8xbf16>
    %cst_10 = arith.constant dense<0.000000e+00> : vector<8x8xf32>
    %35 = tpu.matmul %32, %34, %cst_10 {dimension_numbers = #tpu.dot_dimension_numbers<[1], [1], [0], [0], [0, 0, 1, 0], [], []>} : vector<8x8xbf16>, vector<8x8xbf16>, vector<8x8xf32> -> vector<8x8xf32>
    %cst_11 = arith.constant dense<0xFF800000> : vector<8xf32>
    %36 = vector.multi_reduction <maximumf>, %35, %cst_11 [1] : vector<8x8xf32> to vector<8xf32>
    %37 = vector.shape_cast %36 : vector<8xf32> to vector<8x1xf32>
    %38 = vector.broadcast %37 : vector<8x1xf32> to vector<8x8xf32>
    %39 = arith.subf %35, %38 : vector<8x8xf32>
    %40 = math.exp %39 : vector<8x8xf32>
    %cst_12 = arith.constant dense<0.000000e+00> : vector<8xf32>
    %41 = vector.multi_reduction <add>, %40, %cst_12 [1] : vector<8x8xf32> to vector<8xf32>
    %42 = vector.shape_cast %41 : vector<8xf32> to vector<8x1xf32>
    %43 = tpu.reciprocal %42 {approx = true} : vector<8x1xf32> -> vector<8x1xf32>
    %44 = vector.broadcast %43 : vector<8x1xf32> to vector<8x8xf32>
    %45 = arith.mulf %40, %44 : vector<8x8xf32>
    %46 = arith.truncf %45 : vector<8x8xf32> to vector<8x8xbf16>
    %47 = vector.extract_strided_slice %11 {offsets = [0, 8], sizes = [8, 8], strides = [1, 1]} : vector<16x32xf32> to vector<8x8xf32>
    %48 = arith.truncf %47 : vector<8x8xf32> to vector<8x8xbf16>
    %cst_13 = arith.constant dense<0.000000e+00> : vector<8x8xf32>
    %49 = tpu.matmul %46, %48, %cst_13 {dimension_numbers = #tpu.dot_dimension_numbers<[1], [0], [0], [1], [0, 0, 1, 1], [], []>} : vector<8x8xbf16>, vector<8x8xbf16>, vector<8x8xf32> -> vector<8x8xf32>
    %50 = vector.extract_strided_slice %9 {offsets = [0, 16], sizes = [8, 8], strides = [1, 1]} : vector<16x32xf32> to vector<8x8xf32>
    %51 = arith.truncf %50 : vector<8x8xf32> to vector<8x8xbf16>
    %52 = vector.extract_strided_slice %10 {offsets = [0, 16], sizes = [8, 8], strides = [1, 1]} : vector<16x32xf32> to vector<8x8xf32>
    %53 = arith.truncf %52 : vector<8x8xf32> to vector<8x8xbf16>
    %cst_14 = arith.constant dense<0.000000e+00> : vector<8x8xf32>
    %54 = tpu.matmul %51, %53, %cst_14 {dimension_numbers = #tpu.dot_dimension_numbers<[1], [1], [0], [0], [0, 0, 1, 0], [], []>} : vector<8x8xbf16>, vector<8x8xbf16>, vector<8x8xf32> -> vector<8x8xf32>
    %cst_15 = arith.constant dense<0xFF800000> : vector<8xf32>
    %55 = vector.multi_reduction <maximumf>, %54, %cst_15 [1] : vector<8x8xf32> to vector<8xf32>
    %56 = vector.shape_cast %55 : vector<8xf32> to vector<8x1xf32>
    %57 = vector.broadcast %56 : vector<8x1xf32> to vector<8x8xf32>
    %58 = arith.subf %54, %57 : vector<8x8xf32>
    %59 = math.exp %58 : vector<8x8xf32>
    %cst_16 = arith.constant dense<0.000000e+00> : vector<8xf32>
    %60 = vector.multi_reduction <add>, %59, %cst_16 [1] : vector<8x8xf32> to vector<8xf32>
    %61 = vector.shape_cast %60 : vector<8xf32> to vector<8x1xf32>
    %62 = tpu.reciprocal %61 {approx = true} : vector<8x1xf32> -> vector<8x1xf32>
    %63 = vector.broadcast %62 : vector<8x1xf32> to vector<8x8xf32>
    %64 = arith.mulf %59, %63 : vector<8x8xf32>
    %65 = arith.truncf %64 : vector<8x8xf32> to vector<8x8xbf16>
    %66 = vector.extract_strided_slice %11 {offsets = [0, 16], sizes = [8, 8], strides = [1, 1]} : vector<16x32xf32> to vector<8x8xf32>
    %67 = arith.truncf %66 : vector<8x8xf32> to vector<8x8xbf16>
    %cst_17 = arith.constant dense<0.000000e+00> : vector<8x8xf32>
    %68 = tpu.matmul %65, %67, %cst_17 {dimension_numbers = #tpu.dot_dimension_numbers<[1], [0], [0], [1], [0, 0, 1, 1], [], []>} : vector<8x8xbf16>, vector<8x8xbf16>, vector<8x8xf32> -> vector<8x8xf32>
    %69 = vector.extract_strided_slice %9 {offsets = [0, 24], sizes = [8, 8], strides = [1, 1]} : vector<16x32xf32> to vector<8x8xf32>
    %70 = arith.truncf %69 : vector<8x8xf32> to vector<8x8xbf16>
    %71 = vector.extract_strided_slice %10 {offsets = [0, 24], sizes = [8, 8], strides = [1, 1]} : vector<16x32xf32> to vector<8x8xf32>
    %72 = arith.truncf %71 : vector<8x8xf32> to vector<8x8xbf16>
    %cst_18 = arith.constant dense<0.000000e+00> : vector<8x8xf32>
    %73 = tpu.matmul %70, %72, %cst_18 {dimension_numbers = #tpu.dot_dimension_numbers<[1], [1], [0], [0], [0, 0, 1, 0], [], []>} : vector<8x8xbf16>, vector<8x8xbf16>, vector<8x8xf32> -> vector<8x8xf32>
    %cst_19 = arith.constant dense<0xFF800000> : vector<8xf32>
    %74 = vector.multi_reduction <maximumf>, %73, %cst_19 [1] : vector<8x8xf32> to vector<8xf32>
    %75 = vector.shape_cast %74 : vector<8xf32> to vector<8x1xf32>
    %76 = vector.broadcast %75 : vector<8x1xf32> to vector<8x8xf32>
    %77 = arith.subf %73, %76 : vector<8x8xf32>
    %78 = math.exp %77 : vector<8x8xf32>
    %cst_20 = arith.constant dense<0.000000e+00> : vector<8xf32>
    %79 = vector.multi_reduction <add>, %78, %cst_20 [1] : vector<8x8xf32> to vector<8xf32>
    %80 = vector.shape_cast %79 : vector<8xf32> to vector<8x1xf32>
    %81 = tpu.reciprocal %80 {approx = true} : vector<8x1xf32> -> vector<8x1xf32>
    %82 = vector.broadcast %81 : vector<8x1xf32> to vector<8x8xf32>
    %83 = arith.mulf %78, %82 : vector<8x8xf32>
    %84 = arith.truncf %83 : vector<8x8xf32> to vector<8x8xbf16>
    %85 = vector.extract_strided_slice %11 {offsets = [0, 24], sizes = [8, 8], strides = [1, 1]} : vector<16x32xf32> to vector<8x8xf32>
    %86 = arith.truncf %85 : vector<8x8xf32> to vector<8x8xbf16>
    %cst_21 = arith.constant dense<0.000000e+00> : vector<8x8xf32>
    %87 = tpu.matmul %84, %86, %cst_21 {dimension_numbers = #tpu.dot_dimension_numbers<[1], [0], [0], [1], [0, 0, 1, 1], [], []>} : vector<8x8xbf16>, vector<8x8xbf16>, vector<8x8xf32> -> vector<8x8xf32>
    %88 = tpu.concatenate %30, %49, %68, %87 in 1 : vector<8x8xf32>, vector<8x8xf32>, vector<8x8xf32>, vector<8x8xf32> -> vector<8x32xf32>
    %89 = vector.extract_strided_slice %9 {offsets = [8, 0], sizes = [8, 8], strides = [1, 1]} : vector<16x32xf32> to vector<8x8xf32>
    %90 = arith.truncf %89 : vector<8x8xf32> to vector<8x8xbf16>
    %91 = vector.extract_strided_slice %10 {offsets = [8, 0], sizes = [8, 8], strides = [1, 1]} : vector<16x32xf32> to vector<8x8xf32>
    %92 = arith.truncf %91 : vector<8x8xf32> to vector<8x8xbf16>
    %cst_22 = arith.constant dense<0.000000e+00> : vector<8x8xf32>
    %93 = tpu.matmul %90, %92, %cst_22 {dimension_numbers = #tpu.dot_dimension_numbers<[1], [1], [0], [0], [0, 0, 1, 0], [], []>} : vector<8x8xbf16>, vector<8x8xbf16>, vector<8x8xf32> -> vector<8x8xf32>
    %cst_23 = arith.constant dense<0xFF800000> : vector<8xf32>
    %94 = vector.multi_reduction <maximumf>, %93, %cst_23 [1] : vector<8x8xf32> to vector<8xf32>
    %95 = vector.shape_cast %94 : vector<8xf32> to vector<8x1xf32>
    %96 = vector.broadcast %95 : vector<8x1xf32> to vector<8x8xf32>
    %97 = arith.subf %93, %96 : vector<8x8xf32>
    %98 = math.exp %97 : vector<8x8xf32>
    %cst_24 = arith.constant dense<0.000000e+00> : vector<8xf32>
    %99 = vector.multi_reduction <add>, %98, %cst_24 [1] : vector<8x8xf32> to vector<8xf32>
    %100 = vector.shape_cast %99 : vector<8xf32> to vector<8x1xf32>
    %101 = tpu.reciprocal %100 {approx = true} : vector<8x1xf32> -> vector<8x1xf32>
    %102 = vector.broadcast %101 : vector<8x1xf32> to vector<8x8xf32>
    %103 = arith.mulf %98, %102 : vector<8x8xf32>
    %104 = arith.truncf %103 : vector<8x8xf32> to vector<8x8xbf16>
    %105 = vector.extract_strided_slice %11 {offsets = [8, 0], sizes = [8, 8], strides = [1, 1]} : vector<16x32xf32> to vector<8x8xf32>
    %106 = arith.truncf %105 : vector<8x8xf32> to vector<8x8xbf16>
    %cst_25 = arith.constant dense<0.000000e+00> : vector<8x8xf32>
    %107 = tpu.matmul %104, %106, %cst_25 {dimension_numbers = #tpu.dot_dimension_numbers<[1], [0], [0], [1], [0, 0, 1, 1], [], []>} : vector<8x8xbf16>, vector<8x8xbf16>, vector<8x8xf32> -> vector<8x8xf32>
    %108 = vector.extract_strided_slice %9 {offsets = [8, 8], sizes = [8, 8], strides = [1, 1]} : vector<16x32xf32> to vector<8x8xf32>
    %109 = arith.truncf %108 : vector<8x8xf32> to vector<8x8xbf16>
    %110 = vector.extract_strided_slice %10 {offsets = [8, 8], sizes = [8, 8], strides = [1, 1]} : vector<16x32xf32> to vector<8x8xf32>
    %111 = arith.truncf %110 : vector<8x8xf32> to vector<8x8xbf16>
    %cst_26 = arith.constant dense<0.000000e+00> : vector<8x8xf32>
    %112 = tpu.matmul %109, %111, %cst_26 {dimension_numbers = #tpu.dot_dimension_numbers<[1], [1], [0], [0], [0, 0, 1, 0], [], []>} : vector<8x8xbf16>, vector<8x8xbf16>, vector<8x8xf32> -> vector<8x8xf32>
    %cst_27 = arith.constant dense<0xFF800000> : vector<8xf32>
    %113 = vector.multi_reduction <maximumf>, %112, %cst_27 [1] : vector<8x8xf32> to vector<8xf32>
    %114 = vector.shape_cast %113 : vector<8xf32> to vector<8x1xf32>
    %115 = vector.broadcast %114 : vector<8x1xf32> to vector<8x8xf32>
    %116 = arith.subf %112, %115 : vector<8x8xf32>
    %117 = math.exp %116 : vector<8x8xf32>
    %cst_28 = arith.constant dense<0.000000e+00> : vector<8xf32>
    %118 = vector.multi_reduction <add>, %117, %cst_28 [1] : vector<8x8xf32> to vector<8xf32>
    %119 = vector.shape_cast %118 : vector<8xf32> to vector<8x1xf32>
    %120 = tpu.reciprocal %119 {approx = true} : vector<8x1xf32> -> vector<8x1xf32>
    %121 = vector.broadcast %120 : vector<8x1xf32> to vector<8x8xf32>
    %122 = arith.mulf %117, %121 : vector<8x8xf32>
    %123 = arith.truncf %122 : vector<8x8xf32> to vector<8x8xbf16>
    %124 = vector.extract_strided_slice %11 {offsets = [8, 8], sizes = [8, 8], strides = [1, 1]} : vector<16x32xf32> to vector<8x8xf32>
    %125 = arith.truncf %124 : vector<8x8xf32> to vector<8x8xbf16>
    %cst_29 = arith.constant dense<0.000000e+00> : vector<8x8xf32>
    %126 = tpu.matmul %123, %125, %cst_29 {dimension_numbers = #tpu.dot_dimension_numbers<[1], [0], [0], [1], [0, 0, 1, 1], [], []>} : vector<8x8xbf16>, vector<8x8xbf16>, vector<8x8xf32> -> vector<8x8xf32>
    %127 = vector.extract_strided_slice %9 {offsets = [8, 16], sizes = [8, 8], strides = [1, 1]} : vector<16x32xf32> to vector<8x8xf32>
    %128 = arith.truncf %127 : vector<8x8xf32> to vector<8x8xbf16>
    %129 = vector.extract_strided_slice %10 {offsets = [8, 16], sizes = [8, 8], strides = [1, 1]} : vector<16x32xf32> to vector<8x8xf32>
    %130 = arith.truncf %129 : vector<8x8xf32> to vector<8x8xbf16>
    %cst_30 = arith.constant dense<0.000000e+00> : vector<8x8xf32>
    %131 = tpu.matmul %128, %130, %cst_30 {dimension_numbers = #tpu.dot_dimension_numbers<[1], [1], [0], [0], [0, 0, 1, 0], [], []>} : vector<8x8xbf16>, vector<8x8xbf16>, vector<8x8xf32> -> vector<8x8xf32>
    %cst_31 = arith.constant dense<0xFF800000> : vector<8xf32>
    %132 = vector.multi_reduction <maximumf>, %131, %cst_31 [1] : vector<8x8xf32> to vector<8xf32>
    %133 = vector.shape_cast %132 : vector<8xf32> to vector<8x1xf32>
    %134 = vector.broadcast %133 : vector<8x1xf32> to vector<8x8xf32>
    %135 = arith.subf %131, %134 : vector<8x8xf32>
    %136 = math.exp %135 : vector<8x8xf32>
    %cst_32 = arith.constant dense<0.000000e+00> : vector<8xf32>
    %137 = vector.multi_reduction <add>, %136, %cst_32 [1] : vector<8x8xf32> to vector<8xf32>
    %138 = vector.shape_cast %137 : vector<8xf32> to vector<8x1xf32>
    %139 = tpu.reciprocal %138 {approx = true} : vector<8x1xf32> -> vector<8x1xf32>
    %140 = vector.broadcast %139 : vector<8x1xf32> to vector<8x8xf32>
    %141 = arith.mulf %136, %140 : vector<8x8xf32>
    %142 = arith.truncf %141 : vector<8x8xf32> to vector<8x8xbf16>
    %143 = vector.extract_strided_slice %11 {offsets = [8, 16], sizes = [8, 8], strides = [1, 1]} : vector<16x32xf32> to vector<8x8xf32>
    %144 = arith.truncf %143 : vector<8x8xf32> to vector<8x8xbf16>
    %cst_33 = arith.constant dense<0.000000e+00> : vector<8x8xf32>
    %145 = tpu.matmul %142, %144, %cst_33 {dimension_numbers = #tpu.dot_dimension_numbers<[1], [0], [0], [1], [0, 0, 1, 1], [], []>} : vector<8x8xbf16>, vector<8x8xbf16>, vector<8x8xf32> -> vector<8x8xf32>
    %146 = vector.extract_strided_slice %9 {offsets = [8, 24], sizes = [8, 8], strides = [1, 1]} : vector<16x32xf32> to vector<8x8xf32>
    %147 = arith.truncf %146 : vector<8x8xf32> to vector<8x8xbf16>
    %148 = vector.extract_strided_slice %10 {offsets = [8, 24], sizes = [8, 8], strides = [1, 1]} : vector<16x32xf32> to vector<8x8xf32>
    %149 = arith.truncf %148 : vector<8x8xf32> to vector<8x8xbf16>
    %cst_34 = arith.constant dense<0.000000e+00> : vector<8x8xf32>
    %150 = tpu.matmul %147, %149, %cst_34 {dimension_numbers = #tpu.dot_dimension_numbers<[1], [1], [0], [0], [0, 0, 1, 0], [], []>} : vector<8x8xbf16>, vector<8x8xbf16>, vector<8x8xf32> -> vector<8x8xf32>
    %cst_35 = arith.constant dense<0xFF800000> : vector<8xf32>
    %151 = vector.multi_reduction <maximumf>, %150, %cst_35 [1] : vector<8x8xf32> to vector<8xf32>
    %152 = vector.shape_cast %151 : vector<8xf32> to vector<8x1xf32>
    %153 = vector.broadcast %152 : vector<8x1xf32> to vector<8x8xf32>
    %154 = arith.subf %150, %153 : vector<8x8xf32>
    %155 = math.exp %154 : vector<8x8xf32>
    %cst_36 = arith.constant dense<0.000000e+00> : vector<8xf32>
    %156 = vector.multi_reduction <add>, %155, %cst_36 [1] : vector<8x8xf32> to vector<8xf32>
    %157 = vector.shape_cast %156 : vector<8xf32> to vector<8x1xf32>
    %158 = tpu.reciprocal %157 {approx = true} : vector<8x1xf32> -> vector<8x1xf32>
    %159 = vector.broadcast %158 : vector<8x1xf32> to vector<8x8xf32>
    %160 = arith.mulf %155, %159 : vector<8x8xf32>
    %161 = arith.truncf %160 : vector<8x8xf32> to vector<8x8xbf16>
    %162 = vector.extract_strided_slice %11 {offsets = [8, 24], sizes = [8, 8], strides = [1, 1]} : vector<16x32xf32> to vector<8x8xf32>
    %163 = arith.truncf %162 : vector<8x8xf32> to vector<8x8xbf16>
    %cst_37 = arith.constant dense<0.000000e+00> : vector<8x8xf32>
    %164 = tpu.matmul %161, %163, %cst_37 {dimension_numbers = #tpu.dot_dimension_numbers<[1], [0], [0], [1], [0, 0, 1, 1], [], []>} : vector<8x8xbf16>, vector<8x8xbf16>, vector<8x8xf32> -> vector<8x8xf32>
    %165 = tpu.concatenate %107, %126, %145, %164 in 1 : vector<8x8xf32>, vector<8x8xf32>, vector<8x8xf32>, vector<8x8xf32> -> vector<8x32xf32>
    %166 = tpu.concatenate %88, %165 in 0 : vector<8x32xf32>, vector<8x32xf32> -> vector<16x32xf32>
    %167 = arith.truncf %166 : vector<16x32xf32> to vector<16x32xbf16>
    %c0_38 = arith.constant 0 : index
    %c0_39 = arith.constant 0 : index
    %168 = vector.load %arg4[%c0_38, %c0_39] : memref<32x32xbf16, #tpu.memory_space<vmem>>, vector<32x32xbf16>
    %cst_40 = arith.constant dense<0.000000e+00> : vector<16x32xf32>
    %169 = tpu.matmul %167, %168, %cst_40 {dimension_numbers = #tpu.dot_dimension_numbers<[1], [0], [0], [1], [0, 0, 1, 1], [], []>} : vector<16x32xbf16>, vector<32x32xbf16>, vector<16x32xf32> -> vector<16x32xf32>
    %c0_41 = arith.constant 0 : index
    %c0_42 = arith.constant 0 : index
    %170 = vector.load %arg5[%c0_41, %c0_42] : memref<1x32xf32, #tpu.memory_space<vmem>>, vector<1x32xf32>
    %171 = vector.broadcast %170 : vector<1x32xf32> to vector<16x32xf32>
    %172 = arith.addf %169, %171 : vector<16x32xf32>
    %173 = arith.addf %172, %0 : vector<16x32xf32>
    %c0_43 = arith.constant 0 : index
    %c0_44 = arith.constant 0 : index
    %174 = vector.load %arg6[%c0_43, %c0_44] : memref<1x32xf32, #tpu.memory_space<vmem>>, vector<1x32xf32>
    %c0_45 = arith.constant 0 : index
    %c0_46 = arith.constant 0 : index
    %175 = vector.load %arg7[%c0_45, %c0_46] : memref<1x32xf32, #tpu.memory_space<vmem>>, vector<1x32xf32>
    %cst_47 = arith.constant dense<0.000000e+00> : vector<16xf32>
    %176 = vector.multi_reduction <add>, %173, %cst_47 [1] : vector<16x32xf32> to vector<16xf32>
    %177 = vector.shape_cast %176 : vector<16xf32> to vector<16x1xf32>
    %cst_48 = arith.constant 3.200000e+01 : f32
    %178 = vector.broadcast %cst_48 : f32 to vector<16x1xf32>
    %179 = arith.divf %177, %178 : vector<16x1xf32>
    %180 = vector.broadcast %179 : vector<16x1xf32> to vector<16x32xf32>
    %181 = arith.subf %173, %180 : vector<16x32xf32>
    %182 = arith.mulf %181, %181 : vector<16x32xf32>
    %cst_49 = arith.constant dense<0.000000e+00> : vector<16xf32>
    %183 = vector.multi_reduction <add>, %182, %cst_49 [1] : vector<16x32xf32> to vector<16xf32>
    %184 = vector.shape_cast %183 : vector<16xf32> to vector<16x1xf32>
    %cst_50 = arith.constant 3.200000e+01 : f32
    %185 = vector.broadcast %cst_50 : f32 to vector<16x1xf32>
    %186 = arith.divf %184, %185 : vector<16x1xf32>
    %187 = vector.broadcast %179 : vector<16x1xf32> to vector<16x32xf32>
    %188 = arith.subf %173, %187 : vector<16x32xf32>
    %cst_51 = arith.constant 9.99999996E-13 : f32
    %189 = vector.broadcast %cst_51 : f32 to vector<16x1xf32>
    %190 = arith.addf %186, %189 : vector<16x1xf32>
    %191 = math.rsqrt %190 : vector<16x1xf32>
    %192 = vector.broadcast %191 : vector<16x1xf32> to vector<16x32xf32>
    %193 = arith.mulf %188, %192 : vector<16x32xf32>
    %194 = vector.broadcast %174 : vector<1x32xf32> to vector<16x32xf32>
    %195 = arith.mulf %193, %194 : vector<16x32xf32>
    %196 = vector.broadcast %175 : vector<1x32xf32> to vector<16x32xf32>
    %197 = arith.addf %195, %196 : vector<16x32xf32>
    %198 = arith.truncf %197 : vector<16x32xf32> to vector<16x32xbf16>
    %c0_52 = arith.constant 0 : index
    %c0_53 = arith.constant 0 : index
    %199 = vector.load %arg8[%c0_52, %c0_53] : memref<32x64xbf16, #tpu.memory_space<vmem>>, vector<32x64xbf16>
    %cst_54 = arith.constant dense<0.000000e+00> : vector<16x64xf32>
    %200 = tpu.matmul %198, %199, %cst_54 {dimension_numbers = #tpu.dot_dimension_numbers<[1], [0], [0], [1], [0, 0, 1, 1], [], []>} : vector<16x32xbf16>, vector<32x64xbf16>, vector<16x64xf32> -> vector<16x64xf32>
    %c0_55 = arith.constant 0 : index
    %c0_56 = arith.constant 0 : index
    %201 = vector.load %arg9[%c0_55, %c0_56] : memref<1x64xf32, #tpu.memory_space<vmem>>, vector<1x64xf32>
    %202 = vector.broadcast %201 : vector<1x64xf32> to vector<16x64xf32>
    %203 = arith.addf %200, %202 : vector<16x64xf32>
    %204 = arith.mulf %203, %203 : vector<16x64xf32>
    %205 = arith.mulf %203, %204 : vector<16x64xf32>
    %cst_57 = arith.constant 4.471500e-02 : f32
    %206 = vector.broadcast %cst_57 : f32 to vector<16x64xf32>
    %207 = arith.mulf %206, %205 : vector<16x64xf32>
    %208 = arith.addf %203, %207 : vector<16x64xf32>
    %cst_58 = arith.constant 0.797884583 : f32
    %209 = vector.broadcast %cst_58 : f32 to vector<16x64xf32>
    %210 = arith.mulf %209, %208 : vector<16x64xf32>
    %211 = math.tanh %210 : vector<16x64xf32>
    %cst_59 = arith.constant 1.000000e+00 : f32
    %212 = vector.broadcast %cst_59 : f32 to vector<16x64xf32>
    %213 = arith.addf %212, %211 : vector<16x64xf32>
    %cst_60 = arith.constant 5.000000e-01 : f32
    %214 = vector.broadcast %cst_60 : f32 to vector<16x64xf32>
    %215 = arith.mulf %214, %213 : vector<16x64xf32>
    %216 = arith.mulf %203, %215 : vector<16x64xf32>
    %217 = arith.truncf %216 : vector<16x64xf32> to vector<16x64xbf16>
    %c0_61 = arith.constant 0 : index
    %c0_62 = arith.constant 0 : index
    %218 = vector.load %arg10[%c0_61, %c0_62] : memref<64x32xbf16, #tpu.memory_space<vmem>>, vector<64x32xbf16>
    %cst_63 = arith.constant dense<0.000000e+00> : vector<16x32xf32>
    %219 = tpu.matmul %217, %218, %cst_63 {dimension_numbers = #tpu.dot_dimension_numbers<[1], [0], [0], [1], [0, 0, 1, 1], [], []>} : vector<16x64xbf16>, vector<64x32xbf16>, vector<16x32xf32> -> vector<16x32xf32>
    %c0_64 = arith.constant 0 : index
    %c0_65 = arith.constant 0 : index
    %220 = vector.load %arg11[%c0_64, %c0_65] : memref<1x32xf32, #tpu.memory_space<vmem>>, vector<1x32xf32>
    %221 = vector.broadcast %220 : vector<1x32xf32> to vector<16x32xf32>
    %222 = arith.addf %219, %221 : vector<16x32xf32>
    %223 = arith.addf %222, %197 : vector<16x32xf32>
    %c0_66 = arith.constant 0 : index
    %c0_67 = arith.constant 0 : index
    %224 = vector.load %arg12[%c0_66, %c0_67] : memref<1x32xf32, #tpu.memory_space<vmem>>, vector<1x32xf32>
    %c0_68 = arith.constant 0 : index
    %c0_69 = arith.constant 0 : index
    %225 = vector.load %arg13[%c0_68, %c0_69] : memref<1x32xf32, #tpu.memory_space<vmem>>, vector<1x32xf32>
    %cst_70 = arith.constant dense<0.000000e+00> : vector<16xf32>
    %226 = vector.multi_reduction <add>, %223, %cst_70 [1] : vector<16x32xf32> to vector<16xf32>
    %227 = vector.shape_cast %226 : vector<16xf32> to vector<16x1xf32>
    %cst_71 = arith.constant 3.200000e+01 : f32
    %228 = vector.broadcast %cst_71 : f32 to vector<16x1xf32>
    %229 = arith.divf %227, %228 : vector<16x1xf32>
    %230 = vector.broadcast %229 : vector<16x1xf32> to vector<16x32xf32>
    %231 = arith.subf %223, %230 : vector<16x32xf32>
    %232 = arith.mulf %231, %231 : vector<16x32xf32>
    %cst_72 = arith.constant dense<0.000000e+00> : vector<16xf32>
    %233 = vector.multi_reduction <add>, %232, %cst_72 [1] : vector<16x32xf32> to vector<16xf32>
    %234 = vector.shape_cast %233 : vector<16xf32> to vector<16x1xf32>
    %cst_73 = arith.constant 3.200000e+01 : f32
    %235 = vector.broadcast %cst_73 : f32 to vector<16x1xf32>
    %236 = arith.divf %234, %235 : vector<16x1xf32>
    %237 = vector.broadcast %229 : vector<16x1xf32> to vector<16x32xf32>
    %238 = arith.subf %223, %237 : vector<16x32xf32>
    %cst_74 = arith.constant 9.99999996E-13 : f32
    %239 = vector.broadcast %cst_74 : f32 to vector<16x1xf32>
    %240 = arith.addf %236, %239 : vector<16x1xf32>
    %241 = math.rsqrt %240 : vector<16x1xf32>
    %242 = vector.broadcast %241 : vector<16x1xf32> to vector<16x32xf32>
    %243 = arith.mulf %238, %242 : vector<16x32xf32>
    %244 = vector.broadcast %224 : vector<1x32xf32> to vector<16x32xf32>
    %245 = arith.mulf %243, %244 : vector<16x32xf32>
    %246 = vector.broadcast %225 : vector<1x32xf32> to vector<16x32xf32>
    %247 = arith.addf %245, %246 : vector<16x32xf32>
    %c0_75 = arith.constant 0 : index
    %c0_76 = arith.constant 0 : index
    %248 = vector.load %arg14[%c0_75, %c0_76] : memref<16x32xf32, #tpu.memory_space<vmem>>, vector<16x32xf32>
    tpu.vector_store %arg14[%c0_75, %c0_76], %247 {strides = array<i32>} : memref<16x32xf32, #tpu.memory_space<vmem>>, vector<16x32xf32>,
    return
  }
  func.func @transform_0(%arg0: i32) -> (i32, i32) {
    %c0_i32 = arith.constant 0 : i32
    %c0_i32_0 = arith.constant 0 : i32
    return %arg0, %c0_i32 : i32, i32
  }
  func.func @transform_1(%arg0: i32) -> (i32, i32) {
    %c0_i32 = arith.constant 0 : i32
    %c0_i32_0 = arith.constant 0 : i32
    %c0_i32_1 = arith.constant 0 : i32
    return %c0_i32, %c0_i32_0 : i32, i32
  }
  func.func @transform_2(%arg0: i32) -> (i32, i32) {
    %c0_i32 = arith.constant 0 : i32
    %c0_i32_0 = arith.constant 0 : i32
    %c0_i32_1 = arith.constant 0 : i32
    return %c0_i32, %c0_i32_0 : i32, i32
  }
  func.func @transform_3(%arg0: i32) -> (i32, i32) {
    %c0_i32 = arith.constant 0 : i32
    %c0_i32_0 = arith.constant 0 : i32
    %c0_i32_1 = arith.constant 0 : i32
    return %c0_i32, %c0_i32_0 : i32, i32
  }
  func.func @transform_4(%arg0: i32) -> (i32, i32) {
    %c0_i32 = arith.constant 0 : i32
    %c0_i32_0 = arith.constant 0 : i32
    %c0_i32_1 = arith.constant 0 : i32
    return %c0_i32, %c0_i32_0 : i32, i32
  }
  func.func @transform_5(%arg0: i32) -> (i32, i32) {
    %c0_i32 = arith.constant 0 : i32
    %c0_i32_0 = arith.constant 0 : i32
    %c0_i32_1 = arith.constant 0 : i32
    return %c0_i32, %c0_i32_0 : i32, i32
  }
  func.func @transform_6(%arg0: i32) -> (i32, i32) {
    %c0_i32 = arith.constant 0 : i32
    %c0_i32_0 = arith.constant 0 : i32
    %c0_i32_1 = arith.constant 0 : i32
    return %c0_i32, %c0_i32_0 : i32, i32
  }
  func.func @transform_7(%arg0: i32) -> (i32, i32) {
    %c0_i32 = arith.constant 0 : i32
    %c0_i32_0 = arith.constant 0 : i32
    %c0_i32_1 = arith.constant 0 : i32
    return %c0_i32, %c0_i32_0 : i32, i32
  }
  func.func @transform_8(%arg0: i32) -> (i32, i32) {
    %c0_i32 = arith.constant 0 : i32
    %c0_i32_0 = arith.constant 0 : i32
    %c0_i32_1 = arith.constant 0 : i32
    return %c0_i32, %c0_i32_0 : i32, i32
  }
  func.func @transform_9(%arg0: i32) -> (i32, i32) {
    %c0_i32 = arith.constant 0 : i32
    %c0_i32_0 = arith.constant 0 : i32
    %c0_i32_1 = arith.constant 0 : i32
    return %c0_i32, %c0_i32_0 : i32, i32
  }
  func.func @transform_10(%arg0: i32) -> (i32, i32) {
    %c0_i32 = arith.constant 0 : i32
    %c0_i32_0 = arith.constant 0 : i32
    %c0_i32_1 = arith.constant 0 : i32
    return %c0_i32, %c0_i32_0 : i32, i32
  }
  func.func @transform_11(%arg0: i32) -> (i32, i32) {
    %c0_i32 = arith.constant 0 : i32
    %c0_i32_0 = arith.constant 0 : i32
    %c0_i32_1 = arith.constant 0 : i32
    return %c0_i32, %c0_i32_0 : i32, i32
  }
  func.func @transform_12(%arg0: i32) -> (i32, i32) {
    %c0_i32 = arith.constant 0 : i32
    %c0_i32_0 = arith.constant 0 : i32
    %c0_i32_1 = arith.constant 0 : i32
    return %c0_i32, %c0_i32_0 : i32, i32
  }
  func.func @transform_13(%arg0: i32) -> (i32, i32) {
    %c0_i32 = arith.constant 0 : i32
    %c0_i32_0 = arith.constant 0 : i32
    return %arg0, %c0_i32 : i32, i32
  }
}

module attributes {stable_mosaic.version = 11 : i64} {
  func.func @_proj_norm_kernel(%arg0: i32, %arg1: memref<16x32xf32, #tpu.memory_space<vmem>>, %arg2: memref<32x48xbf16, #tpu.memory_space<vmem>>, %arg3: memref<1x48xf32, #tpu.memory_space<vmem>>, %arg4: memref<1x48xf32, #tpu.memory_space<vmem>>, %arg5: memref<1x48xf32, #tpu.memory_space<vmem>>, %arg6: memref<16x48xf32, #tpu.memory_space<vmem>>) attributes {dimension_semantics = [#tpu.dimension_semantics<parallel>], iteration_bounds = array<i64: 1>, scalar_prefetch = 0 : i64, scratch_operands = 0 : i64, tpu.core_type = #tpu.core_type<tc>, window_params = [{transform_indices = @transform_0, window_bounds = array<i64: 16, 32>}, {pipeline_mode = #tpu.pipeline_mode<synchronous>, transform_indices = @transform_1, window_bounds = array<i64: 32, 48>}, {pipeline_mode = #tpu.pipeline_mode<synchronous>, transform_indices = @transform_2, window_bounds = array<i64: 1, 48>}, {pipeline_mode = #tpu.pipeline_mode<synchronous>, transform_indices = @transform_3, window_bounds = array<i64: 1, 48>}, {pipeline_mode = #tpu.pipeline_mode<synchronous>, transform_indices = @transform_4, window_bounds = array<i64: 1, 48>}, {transform_indices = @transform_5, window_bounds = array<i64: 16, 48>}]} {
    %c0 = arith.constant 0 : index
    %c0_0 = arith.constant 0 : index
    %0 = vector.load %arg1[%c0, %c0_0] : memref<16x32xf32, #tpu.memory_space<vmem>>, vector<16x32xf32>
    %1 = arith.truncf %0 : vector<16x32xf32> to vector<16x32xbf16>
    %c0_1 = arith.constant 0 : index
    %c0_2 = arith.constant 0 : index
    %2 = vector.load %arg2[%c0_1, %c0_2] : memref<32x48xbf16, #tpu.memory_space<vmem>>, vector<32x48xbf16>
    %cst = arith.constant dense<0.000000e+00> : vector<16x48xf32>
    %3 = tpu.matmul %1, %2, %cst {dimension_numbers = #tpu.dot_dimension_numbers<[1], [0], [0], [1], [0, 0, 1, 1], [], []>} : vector<16x32xbf16>, vector<32x48xbf16>, vector<16x48xf32> -> vector<16x48xf32>
    %c0_3 = arith.constant 0 : index
    %c0_4 = arith.constant 0 : index
    %4 = vector.load %arg3[%c0_3, %c0_4] : memref<1x48xf32, #tpu.memory_space<vmem>>, vector<1x48xf32>
    %5 = vector.broadcast %4 : vector<1x48xf32> to vector<16x48xf32>
    %6 = arith.addf %3, %5 : vector<16x48xf32>
    %c0_5 = arith.constant 0 : index
    %c0_6 = arith.constant 0 : index
    %7 = vector.load %arg4[%c0_5, %c0_6] : memref<1x48xf32, #tpu.memory_space<vmem>>, vector<1x48xf32>
    %c0_7 = arith.constant 0 : index
    %c0_8 = arith.constant 0 : index
    %8 = vector.load %arg5[%c0_7, %c0_8] : memref<1x48xf32, #tpu.memory_space<vmem>>, vector<1x48xf32>
    %cst_9 = arith.constant dense<0.000000e+00> : vector<16xf32>
    %9 = vector.multi_reduction <add>, %6, %cst_9 [1] : vector<16x48xf32> to vector<16xf32>
    %10 = vector.shape_cast %9 : vector<16xf32> to vector<16x1xf32>
    %cst_10 = arith.constant 4.800000e+01 : f32
    %11 = vector.broadcast %cst_10 : f32 to vector<16x1xf32>
    %12 = arith.divf %10, %11 : vector<16x1xf32>
    %13 = vector.broadcast %12 : vector<16x1xf32> to vector<16x48xf32>
    %14 = arith.subf %6, %13 : vector<16x48xf32>
    %15 = arith.mulf %14, %14 : vector<16x48xf32>
    %cst_11 = arith.constant dense<0.000000e+00> : vector<16xf32>
    %16 = vector.multi_reduction <add>, %15, %cst_11 [1] : vector<16x48xf32> to vector<16xf32>
    %17 = vector.shape_cast %16 : vector<16xf32> to vector<16x1xf32>
    %cst_12 = arith.constant 4.800000e+01 : f32
    %18 = vector.broadcast %cst_12 : f32 to vector<16x1xf32>
    %19 = arith.divf %17, %18 : vector<16x1xf32>
    %20 = vector.broadcast %12 : vector<16x1xf32> to vector<16x48xf32>
    %21 = arith.subf %6, %20 : vector<16x48xf32>
    %cst_13 = arith.constant 9.99999974E-6 : f32
    %22 = vector.broadcast %cst_13 : f32 to vector<16x1xf32>
    %23 = arith.addf %19, %22 : vector<16x1xf32>
    %24 = math.rsqrt %23 : vector<16x1xf32>
    %25 = vector.broadcast %24 : vector<16x1xf32> to vector<16x48xf32>
    %26 = arith.mulf %21, %25 : vector<16x48xf32>
    %27 = vector.broadcast %7 : vector<1x48xf32> to vector<16x48xf32>
    %28 = arith.mulf %26, %27 : vector<16x48xf32>
    %29 = vector.broadcast %8 : vector<1x48xf32> to vector<16x48xf32>
    %30 = arith.addf %28, %29 : vector<16x48xf32>
    %c0_14 = arith.constant 0 : index
    %c0_15 = arith.constant 0 : index
    %31 = vector.load %arg6[%c0_14, %c0_15] : memref<16x48xf32, #tpu.memory_space<vmem>>, vector<16x48xf32>
    tpu.vector_store %arg6[%c0_14, %c0_15], %30 {strides = array<i32>} : memref<16x48xf32, #tpu.memory_space<vmem>>, vector<16x48xf32>,
    return
  }
  func.func @transform_0(%arg0: i32) -> (i32, i32) {
    %c0_i32 = arith.constant 0 : i32
    %c0_i32_0 = arith.constant 0 : i32
    return %arg0, %c0_i32 : i32, i32
  }
  func.func @transform_1(%arg0: i32) -> (i32, i32) {
    %c0_i32 = arith.constant 0 : i32
    %c0_i32_0 = arith.constant 0 : i32
    %c0_i32_1 = arith.constant 0 : i32
    return %c0_i32, %c0_i32_0 : i32, i32
  }
  func.func @transform_2(%arg0: i32) -> (i32, i32) {
    %c0_i32 = arith.constant 0 : i32
    %c0_i32_0 = arith.constant 0 : i32
    %c0_i32_1 = arith.constant 0 : i32
    return %c0_i32, %c0_i32_0 : i32, i32
  }
  func.func @transform_3(%arg0: i32) -> (i32, i32) {
    %c0_i32 = arith.constant 0 : i32
    %c0_i32_0 = arith.constant 0 : i32
    %c0_i32_1 = arith.constant 0 : i32
    return %c0_i32, %c0_i32_0 : i32, i32
  }
  func.func @transform_4(%arg0: i32) -> (i32, i32) {
    %c0_i32 = arith.constant 0 : i32
    %c0_i32_0 = arith.constant 0 : i32
    %c0_i32_1 = arith.constant 0 : i32
    return %c0_i32, %c0_i32_0 : i32, i32
  }
  func.func @transform_5(%arg0: i32) -> (i32, i32) {
    %c0_i32 = arith.constant 0 : i32
    %c0_i32_0 = arith.constant 0 : i32
    return %arg0, %c0_i32 : i32, i32
  }
}

</mosaic_0001>

<bundles_post_ra>
// kernel: encoder_projector_qformer.5
= control target key start
LH: loop header
LB: loop body
LE: loop exit
PB: predicated region body
PF: predicated region fallthrough
CT: control target
= control target key end

     0   :  { %vm17_vm0 = vcmask 261120   ;;  %s90_s0 = inlined_call_operand.vmem [shape: f32[8,32], index: 0, kind: input, shape index: {}]   ;;  %s91_s1 = inlined_call_operand.vmem [shape: f32[1,32], index: 1, kind: input, shape index: {}]   ;;  %s92_s2 = inlined_call_operand.vmem [shape: f32[1,32], index: 2, kind: input, shape index: {}]   ;;  %s93_s3 = inlined_call_operand.vmem [shape: f32[8,32], index: 3, kind: output, shape index: {}]  }
   0x1   :  { %v14_v0 = vld [vmem:[%s90_s0] sm:$0xff] }
   0x2   :  { %v18_v1 = vsel %vm17_vm0, %v14_v0, 0.0  ;;  %v51_v11 = vld [vmem:[%s91_s1] ss:$0 sm:$0xff] }
   0x3   :  { %19 = vadd.xlane.f32.xlu0 %v18_v1  ;;  %v52_v13 = vld [vmem:[%s92_s2] ss:$0 sm:$0xff] }
  0x90   :  { %v20_v2 = vpop.xlane.xlu0 %19 }
  0x91   :  { %v22_v3 = vmul.f32 0.03125, %v20_v2 }
  0x93   :  { %v23_v4 = vsub.f32 %v14_v0, %v22_v3 }
  0x95   :  { %v24_v5 = vmul.f32 %v23_v4, %v23_v4 }
  0x97   :  { %v25_v6 = vsel %vm17_vm0, %v24_v5, 0.0 }
  0x98   :  { %26 = vadd.xlane.f32.xlu0 %v25_v6 }
 0x125   :  { %v27_v7 = vpop.xlane.xlu0 %26 }
 0x126   :  { %v28_v8 = vmul.f32 0.03125, %v27_v7 }
 0x128   :  { %v29_v9 = vadd.f32 1e-12, %v28_v8 }
 0x12a   :  { %53 = vrsqrt.f32 %v29_v9 }
 0x134   :  { %v54_v10 = vpop.eup %53 }
 0x135   :  { %v31_v12 = vmul.f32 %v54_v10, %v23_v4 }
 0x137   :  { %v38_v14 = vmul.f32 %v51_v11, %v31_v12 }
 0x139   :  { %v45_v15 = vadd.f32 %v52_v13, %v38_v14 }
 0x13b   :  { %46 = vst.msk [vmem:[%s93_s3] sm:$0xff] %vm17_vm0, %v45_v15 }

// kernel: encoder_projector_qformer.6
= control target key start
LH: loop header
LB: loop body
LE: loop exit
PB: predicated region body
PF: predicated region fallthrough
CT: control target
= control target key end

     0   :  { %8 = vsyncpa [#allocation3], 0  ;;  %s394_s0 = inlined_call_operand.hbm [shape: f32[32,32], index: 0, kind: input, shape index: {}]   ;;  %s395_s1 = inlined_call_operand.hbm [shape: bf16[32,64], index: 1, kind: input, shape index: {}]   ;;  %s396_s2 = inlined_call_operand.hbm [shape: f32[1,64], index: 2, kind: input, shape index: {}]   ;;  %s397_s3 = inlined_call_operand.hbm [shape: bf16[32,64], index: 3, kind: output, shape index: {}]  }
   0x1   :  { %9 = vsyncpa [#allocation6], 0 }
   0x2   :  { %10 = vsyncpa [#allocation4], 0  ;;  %s308_s12 = smov [#allocation5]   ;;  %s214_s16 = scalar_lea.hbm %s395_s1, 256 }
   0x3   :  { %s28_s13 = sshll.u32 %s308_s12, 4  ;;  %p215_p0 = scmp.ne.s32.totalorder %s395_s1, %s214_s16  ;;  %s29_s13 = int_to_ptr.vmem [resolvable:$true] %s28_s13 }
   0x4   :  { %p218_p1 = scmp.lt.u32.totalorder %s214_s16, %s395_s1 }
   0x6   :  { %p220_p2 = pnand %p218_p1, %p215_p0 }
   0x8   :  { %223 = shalt.err (!%p220_p2)
}
   0x9   :  { %s224_s21 = scalar_lea.vmem %s29_s13, 256  ;;  %p229_p4 = scmp.lt.s32.totalorder %s29_s13, %s29_s13 }
   0xa   :  { %p225_p3 = scmp.ne.s32.totalorder %s29_s13, %s224_s21  ;;  %p230_p5 = scmp.lt.s32.totalorder %s224_s21, %s224_s21 }
   0xc   :  { %p231_p6 = por %p230_p5, %p229_p4 }
   0xe   :  { %p232_p7 = pnand %p231_p6, %p225_p3 }
  0x10   :  { %235 = shalt.err (!%p232_p7)
}
  0x11   :  { %s309_s22 = smov 64   ;;  %s310_s23 = smov 4  }
  0x12   :  { %34 = dma.hbm_to_vmem [thread:$0]  %s395_s1, 256, %s29_s13, [#allocation6], %s309_s22, %s309_s22, %s310_s23  }
  0x13   :  { %s311_s26 = smov [#allocation2]   ;;  %s236_s30 = scalar_lea.hbm %s394_s0, 512 }
  0x14   :  { %s16_s27 = sshll.u32 %s311_s26, 4  ;;  %p237_p8 = scmp.ne.s32.totalorder %s394_s0, %s236_s30  ;;  %s17_s27 = int_to_ptr.vmem [resolvable:$true] %s16_s27 }
  0x15   :  { %p240_p9 = scmp.lt.u32.totalorder %s236_s30, %s394_s0 }
  0x17   :  { %p242_p10 = pnand %p240_p9, %p237_p8 }
  0x19   :  { %245 = shalt.err (!%p242_p10)
}
  0x1a   :  { %s246_s8 = scalar_lea.vmem %s17_s27, 512  ;;  %p251_p12 = scmp.lt.s32.totalorder %s17_s27, %s17_s27 }
  0x1b   :  { %p247_p11 = scmp.ne.s32.totalorder %s17_s27, %s246_s8  ;;  %p252_p13 = scmp.lt.s32.totalorder %s246_s8, %s246_s8 }
  0x1d   :  { %p253_p0 = por %p252_p13, %p251_p12 }
  0x1f   :  { %p254_p1 = pnand %p253_p0, %p247_p11 }
  0x21   :  { %257 = shalt.err (!%p254_p1)
}
  0x22   :  { %s312_s1 = smov 128   ;;  %s313_s9 = smov 8  }
  0x23   :  { %22 = dma.hbm_to_vmem [thread:$0]  %s394_s0, 512, %s17_s27, [#allocation3], %s312_s1, %s312_s1, %s313_s9  }
  0x24   :  { %s314_s12 = smov [#allocation7]   ;;  %s258_s16 = scalar_lea.hbm %s396_s2, 16 }
  0x25   :  { %s41_s13 = sshll.u32 %s314_s12, 4  ;;  %p259_p2 = scmp.ne.s32.totalorder %s396_s2, %s258_s16  ;;  %s42_s13 = int_to_ptr.vmem [resolvable:$true] %s41_s13 }
  0x26   :  { %p262_p3 = scmp.lt.u32.totalorder %s258_s16, %s396_s2 }
  0x28   :  { %p264_p4 = pnand %p262_p3, %p259_p2 }
  0x2a   :  { %267 = shalt.err (!%p264_p4)
}
  0x2b   :  { %s268_s21 = scalar_lea.vmem %s42_s13, 16  ;;  %s272_s0 = scalar_lea.vmem %s42_s13, 32 }
  0x2c   :  { %p269_p5 = scmp.ne.s32.totalorder %s42_s13, %s268_s21  ;;  %p273_p6 = scmp.lt.s32.totalorder %s42_s13, %s42_s13 }
  0x2d   :  { %p274_p7 = scmp.lt.s32.totalorder %s272_s0, %s268_s21 }
  0x2f   :  { %p275_p8 = por %p274_p7, %p273_p6 }
  0x31   :  { %p276_p9 = pnand %p275_p8, %p269_p5 }
  0x33   :  { %279 = shalt.err (!%p276_p9)
}
  0x34   :  { %44 = dma.hbm_to_vmem [thread:$0]  %s396_s2, 16, %s42_s13, [#allocation6]  }
  0x35   :  { %302 = dma.done.wait [#allocation3], 512  }
  0x36   :  { %303 = vsyncadd [#allocation3], 4294966784 }
  0x37   :  { %304 = dma.done.wait [#allocation6], 272  }
  0x38   :  { %305 = vsyncadd [#allocation6], 4294967024  ;;  %v212_v0 = vld [vmem:[#allocation5] sm:$0xff]   ;;  %v213_v1 = vld [vmem:[#allocation5 + $0x8] sm:$0xff]   ;;  %vm84_vm0 = vcmask 261120   ;;  %vm156_vm1 = vcmask 519168  }
  0x39   :  { %196 = vmatprep.subr.bf16.mxu0 %v212_v0  ;;  %v55_v2 = vld [vmem:[#allocation2] sm:$0xff]  ;;  %v56_v3 = vld [vmem:[#allocation2 + $0x8] sm:$0xff]  ;;  %v57_v5 = vld [vmem:[#allocation2 + $0x10] sm:$0xff]  ;;  %s315_s2 = smov [#allocation8]  }
  0x3a   :  { %197 = vmatpush3.bf16.msra.mxu0 %v212_v0  ;;  %v59_v4 = vpack.c.bf16 %v56_v3, %v55_v2  ;;  %v58_v6 = vld [vmem:[#allocation2 + $0x18] sm:$0xff]  ;;  %v179_v8 = vld [vmem:[#allocation7] ss:$0 sm:$0xff]  ;;  %s166_s26 = sshll.u32 %s315_s2, 4  ;;  %s167_s26 = int_to_ptr.vmem [resolvable:$true] %s166_s26 }
  0x3b   :  { %198 = vmatprep.subr.bf16.mxu0 %v213_v1  ;;  %v60_v7 = vpack.c.bf16 %v58_v6, %v57_v5  ;;  %s280_s27 = scalar_lea.vmem %s167_s26, 256  ;;  %p285_p11 = scmp.lt.s32.totalorder %s167_s26, %s167_s26 }
  0x3c   :  { %200 = vmatprep.mubr.msk.bf16.mxu0 %vm84_vm0, %v59_v4  ;;  %p281_p10 = scmp.ne.s32.totalorder %s167_s26, %s280_s27  ;;  %p286_p12 = scmp.lt.s32.totalorder %s280_s27, %s280_s27 }
  0x3e   :  { %199 = vmatpush3.bf16.msra.mxu0 %v213_v1  ;;  %p287_p13 = por %p286_p12, %p285_p11 }
  0x40   :  { %p288_p0 = pnand %p287_p13, %p281_p10 }
  0x41   :  { %201 = vmatmul.mubr.msk.bf16.vlgmr.msra.gmra.mrb[0].mxu0 %vm84_vm0, %v60_v7 }
 0x114   :  { %v202_v9 = vpop.f32.mrb[0].mxu0 }
 0x115   :  { %v134_v10 = vadd.f32 %v202_v9, %v179_v8  ;;  %v125_v11 = vpop.f32.mrb[1].mxu0 }
 0x116   :  { %v126_v12 = vadd.f32 %v179_v8, %v125_v11  ;;  %v203_v13 = vpop.f32.mrb[2].mxu0 }
 0x117   :  { %v190_v14 = vpack.c.bf16 %v134_v10, %v134_v10  ;;  %v137_v15 = vadd.f32 %v203_v13, %v179_v8  ;;  %v128_v16 = vpop.f32.mrb[3].mxu0 }
 0x118   :  { %v188_v17 = vpack.c.bf16 %v126_v12, %v126_v12  ;;  %v129_v18 = vadd.f32 %v179_v8, %v128_v16 }
 0x119   :  { %159 = vst.msk [vmem:[#allocation8 + $0x8] sm:$0xf] %vm156_vm1, %v190_v14  ;;  %v191_v19 = vpack.c.bf16 %v137_v15, %v137_v15 }
 0x11a   :  { %157 = vst.msk [vmem:[#allocation8] sm:$0xf] %vm156_vm1, %v188_v17  ;;  %v189_v20 = vpack.c.bf16 %v129_v18, %v129_v18 }
 0x11b   :  { %160 = vst.msk [vmem:[#allocation8 + $0xc] sm:$0xf] %vm156_vm1, %v191_v19 }
 0x11c   :  { %158 = vst.msk [vmem:[#allocation8 + $0x4] sm:$0xf] %vm156_vm1, %v189_v20 }
 0x11d   :  { %291 = shalt.err (!%p288_p0)
}
 0x11e   :  { %s292_s30 = scalar_lea.hbm %s397_s3, 256 }
 0x11f   :  { %p293_p1 = scmp.ne.s32.totalorder %s397_s3, %s292_s30  ;;  %p296_p2 = scmp.lt.u32.totalorder %s292_s30, %s397_s3 }
 0x121   :  { %p298_p3 = pnand %p296_p2, %p293_p1 }
 0x123   :  { %301 = shalt.err (!%p298_p3)
}
 0x124   :  { %172 = dma.vmem_to_hbm [thread:$0]  %s167_s26, 256, %s397_s3, [#allocation4], %s309_s22, %s309_s22, %s310_s23  }
 0x125   :  { %306 = dma.done.wait [#allocation4], 256  }
 0x126   :  { %307 = vsyncadd [#allocation4], 4294967040 }
 0x127   :  { %176 = vsyncpa [#allocation3], 1 }
 0x128   :  { %177 = vsyncpa [#allocation6], 1 }
 0x129   :  { %178 = vsyncpa [#allocation4], 1 }

// kernel: encoder_projector_qformer.9
= control target key start
LH: loop header
LB: loop body
LE: loop exit
PB: predicated region body
PF: predicated region fallthrough
CT: control target
= control target key end

     0   :  { %10 = vsyncpa [#allocation3], 0  ;;  %s523_s0 = inlined_call_operand.hbm [shape: f32[16,32], index: 0, kind: input, shape index: {}]   ;;  %s524_s1 = inlined_call_operand.hbm [shape: bf16[32,48], index: 1, kind: input, shape index: {}]   ;;  %s525_s2 = inlined_call_operand.hbm [shape: f32[1,48], index: 2, kind: input, shape index: {}]   ;;  %s526_s3 = inlined_call_operand.hbm [shape: f32[1,48], index: 3, kind: input, shape index: {}]   ;;  %s527_s4 = inlined_call_operand.hbm [shape: f32[1,48], index: 4, kind: input, shape index: {}]   ;;  %s528_s5 = inlined_call_operand.hbm [shape: f32[16,48], index: 5, kind: output, shape index: {}]  }
   0x1   :  { %11 = vsyncpa [#allocation6], 0 }
   0x2   :  { %12 = vsyncpa [#allocation9], 0 }
   0x3   :  { %13 = vsyncpa [#allocation4], 0  ;;  %s397_s18 = smov [#allocation5]   ;;  %s257_s22 = scalar_lea.hbm %s524_s1, 256 }
   0x4   :  { %s31_s19 = sshll.u32 %s397_s18, 4  ;;  %p258_p0 = scmp.ne.s32.totalorder %s524_s1, %s257_s22  ;;  %s32_s19 = int_to_ptr.vmem [resolvable:$true] %s31_s19 }
   0x5   :  { %p261_p1 = scmp.lt.u32.totalorder %s257_s22, %s524_s1 }
   0x7   :  { %p263_p2 = pnand %p261_p1, %p258_p0 }
   0x9   :  { %266 = shalt.err (!%p263_p2)
}
   0xa   :  { %s267_s27 = scalar_lea.vmem %s32_s19, 256  ;;  %p272_p4 = scmp.lt.s32.totalorder %s32_s19, %s32_s19 }
   0xb   :  { %p268_p3 = scmp.ne.s32.totalorder %s32_s19, %s267_s27  ;;  %p273_p5 = scmp.lt.s32.totalorder %s267_s27, %s267_s27 }
   0xd   :  { %p274_p6 = por %p273_p5, %p272_p4 }
   0xf   :  { %p275_p7 = pnand %p274_p6, %p268_p3 }
  0x11   :  { %278 = shalt.err (!%p275_p7)
}
  0x12   :  { %s398_s28 = smov 64   ;;  %s399_s29 = smov 4  }
  0x13   :  { %37 = dma.hbm_to_vmem [thread:$0]  %s524_s1, 256, %s32_s19, [#allocation6], %s398_s28, %s398_s28, %s399_s29  }
  0x14   :  { %s400_s7 = smov [#allocation8]   ;;  %s401_s9 = smov [#allocation2]  }
  0x15   :  { %s54_s8 = sshll.u32 %s400_s7, 4  ;;  %s19_s10 = sshll.u32 %s401_s9, 4  ;;  %s55_s8 = int_to_ptr.vmem [resolvable:$true] %s54_s8  ;;  %s20_s10 = int_to_ptr.vmem [resolvable:$true] %s19_s10 }
  0x16   :  { %s279_s13 = scalar_lea.hbm %s526_s3, 16 }
  0x17   :  { %p280_p8 = scmp.ne.s32.totalorder %s526_s3, %s279_s13  ;;  %p283_p9 = scmp.lt.u32.totalorder %s279_s13, %s526_s3 }
  0x19   :  { %p285_p10 = pnand %p283_p9, %p280_p8 }
  0x1b   :  { %288 = shalt.err (!%p285_p10)
}
  0x1c   :  { %s289_s1 = scalar_lea.vmem %s55_s8, 16  ;;  %s293_s18 = scalar_lea.vmem %s55_s8, 32 }
  0x1d   :  { %p290_p11 = scmp.ne.s32.totalorder %s55_s8, %s289_s1  ;;  %p294_p12 = scmp.lt.s32.totalorder %s55_s8, %s55_s8 }
  0x1e   :  { %p295_p13 = scmp.lt.s32.totalorder %s293_s18, %s289_s1 }
  0x20   :  { %p296_p0 = por %p295_p13, %p294_p12 }
  0x22   :  { %p297_p1 = pnand %p296_p0, %p290_p11 }
  0x24   :  { %300 = shalt.err (!%p297_p1)
}
  0x25   :  { %57 = dma.hbm_to_vmem [thread:$0]  %s526_s3, 16, %s55_s8, [#allocation9]  }
  0x26   :  { %s301_s23 = scalar_lea.hbm %s523_s0, 256 }
  0x27   :  { %p302_p2 = scmp.ne.s32.totalorder %s523_s0, %s301_s23  ;;  %p305_p3 = scmp.lt.u32.totalorder %s301_s23, %s523_s0 }
  0x29   :  { %p307_p4 = pnand %p305_p3, %p302_p2 }
  0x2b   :  { %310 = shalt.err (!%p307_p4)
}
  0x2c   :  { %s311_s28 = scalar_lea.vmem %s20_s10, 256  ;;  %p316_p6 = scmp.lt.s32.totalorder %s20_s10, %s20_s10 }
  0x2d   :  { %p312_p5 = scmp.ne.s32.totalorder %s20_s10, %s311_s28  ;;  %p317_p7 = scmp.lt.s32.totalorder %s311_s28, %s311_s28 }
  0x2f   :  { %p318_p8 = por %p317_p7, %p316_p6 }
  0x31   :  { %p319_p9 = pnand %p318_p8, %p312_p5 }
  0x33   :  { %322 = shalt.err (!%p319_p9)
}
  0x34   :  { %s402_s3 = smov 128   ;;  %s403_s29 = smov 8  }
  0x35   :  { %25 = dma.hbm_to_vmem [thread:$0]  %s523_s0, 256, %s20_s10, [#allocation3], %s402_s3, %s402_s3, %s403_s29  }
  0x36   :  { %s404_s7 = smov [#allocation7]   ;;  %s405_s9 = smov [#allocation10]  }
  0x37   :  { %s44_s8 = sshll.u32 %s404_s7, 4  ;;  %s64_s11 = sshll.u32 %s405_s9, 4  ;;  %s45_s8 = int_to_ptr.vmem [resolvable:$true] %s44_s8  ;;  %s65_s11 = int_to_ptr.vmem [resolvable:$true] %s64_s11 }
  0x38   :  { %s323_s14 = scalar_lea.hbm %s525_s2, 16 }
  0x39   :  { %p324_p10 = scmp.ne.s32.totalorder %s525_s2, %s323_s14  ;;  %p327_p11 = scmp.lt.u32.totalorder %s323_s14, %s525_s2 }
  0x3b   :  { %p329_p12 = pnand %p327_p11, %p324_p10 }
  0x3d   :  { %332 = shalt.err (!%p329_p12)
}
  0x3e   :  { %s333_s0 = scalar_lea.vmem %s45_s8, 16  ;;  %s337_s10 = scalar_lea.vmem %s45_s8, 32 }
  0x3f   :  { %p334_p13 = scmp.ne.s32.totalorder %s45_s8, %s333_s0  ;;  %p338_p0 = scmp.lt.s32.totalorder %s45_s8, %s45_s8 }
  0x40   :  { %p339_p1 = scmp.lt.s32.totalorder %s337_s10, %s333_s0 }
  0x42   :  { %p340_p2 = por %p339_p1, %p338_p0 }
  0x44   :  { %p341_p3 = pnand %p340_p2, %p334_p13 }
  0x46   :  { %344 = shalt.err (!%p341_p3)
}
  0x47   :  { %47 = dma.hbm_to_vmem [thread:$0]  %s525_s2, 16, %s45_s8, [#allocation6]  }
  0x48   :  { %s345_s22 = scalar_lea.hbm %s527_s4, 16 }
  0x49   :  { %p346_p4 = scmp.ne.s32.totalorder %s527_s4, %s345_s22  ;;  %p349_p5 = scmp.lt.u32.totalorder %s345_s22, %s527_s4 }
  0x4b   :  { %p351_p6 = pnand %p349_p5, %p346_p4 }
  0x4d   :  { %354 = shalt.err (!%p351_p6)
}
  0x4e   :  { %s355_s27 = scalar_lea.vmem %s65_s11, 16  ;;  %s359_s28 = scalar_lea.vmem %s65_s11, 32 }
  0x4f   :  { %p356_p7 = scmp.ne.s32.totalorder %s65_s11, %s355_s27  ;;  %p360_p8 = scmp.lt.s32.totalorder %s65_s11, %s65_s11 }
  0x50   :  { %p361_p9 = scmp.lt.s32.totalorder %s359_s28, %s355_s27 }
  0x52   :  { %p362_p10 = por %p361_p9, %p360_p8 }
  0x54   :  { %p363_p11 = pnand %p362_p10, %p356_p7 }
  0x56   :  { %366 = shalt.err (!%p363_p11)
}
  0x57   :  { %67 = dma.hbm_to_vmem [thread:$0]  %s527_s4, 16, %s65_s11, [#allocation9]  }
  0x58   :  { %389 = dma.done.wait [#allocation3], 256  }
  0x59   :  { %390 = vsyncadd [#allocation3], 4294967040 }
  0x5a   :  { %391 = dma.done.wait [#allocation6], 272  }
  0x5b   :  { %392 = vsyncadd [#allocation6], 4294967024 }
  0x5c   :  { %393 = dma.done.wait [#allocation9], 32  }
  0x5d   :  { %394 = vsyncadd [#allocation9], 4294967264  ;;  %v406_v0 = vmov 0.0   ;;  %vm407_vm0 = vmmov 0   ;;  %v251_v1 = vld [vmem:[#allocation5] sm:$0xff]   ;;  %v252_v2 = vld [vmem:[#allocation5 + $0x8] sm:$0xff]  }
  0x5e   :  { %231 = vmatprep.subr.bf16.mxu0 %v406_v0  ;;  %235 = vmatprep.mubr.msk.bf16.mxu0 %vm407_vm0, %v406_v0  ;;  %v84_v3 = vld [vmem:[#allocation2] sm:$0xff]  ;;  %v85_v4 = vld [vmem:[#allocation2 + $0x8] sm:$0xff]  ;;  %vm110_vm1 = vcmask 261120   ;;  %vm157_vm2 = vcmask 392192   ;;  %s408_s4 = smov [#allocation11]  }
  0x5f   :  { %232 = vmatpush3.bf16.msra.mxu0 %v251_v1  ;;  %v86_v5 = vpack.c.bf16 %v85_v4, %v84_v3  ;;  %v222_v6 = vld [vmem:[#allocation7] ss:$0 sm:$0xff]  ;;  %v226_v32 = vld [vmem:[#allocation8] ss:$0 sm:$0xff]  ;;  %v227_v34 = vld [vmem:[#allocation10] ss:$0 sm:$0xff] }
  0x60   :  { %233 = vmatprep.subr.bf16.mxu0 %v406_v0  ;;  %s208_s6 = sshll.u32 %s408_s4, 4  ;;  %s209_s6 = int_to_ptr.vmem [resolvable:$true] %s208_s6 }
  0x61   :  { %s367_s7 = scalar_lea.vmem %s209_s6, 256  ;;  %p372_p13 = scmp.lt.s32.totalorder %s209_s6, %s209_s6 }
  0x62   :  { %p368_p12 = scmp.ne.s32.totalorder %s209_s6, %s367_s7  ;;  %p373_p0 = scmp.lt.s32.totalorder %s367_s7, %s367_s7 }
  0x63   :  { %234 = vmatpush3.bf16.msra.mxu0 %v252_v2 }
  0x64   :  { %p374_p1 = por %p373_p0, %p372_p13 }
  0x66   :  { %236 = vmatmul.mubr.msk.bf16.vlgmr.msra.gmra.mrb[0].mxu0 %vm110_vm1, %v86_v5  ;;  %p375_p2 = pnand %p374_p1, %p368_p12 }
 0x139   :  { %v148_v7 = vpop.f32.mrb[0].mxu0 }
 0x13a   :  { %v149_v8 = vadd.f32 %v222_v6, %v148_v7  ;;  %v237_v9 = vpop.f32.mrb[1].mxu0 }
 0x13b   :  { %v151_v10 = vpop.f32.mrb[2].mxu0 }
 0x13c   :  { %v152_v11 = vadd.f32 %v222_v6, %v151_v10  ;;  %v238_v12 = vpop.f32.mrb[3].mxu0  ;;  %v158_v13 = vsel %vm157_vm2, %v149_v8, 0.0 }
 0x13d   :  { %159 = vadd.xlane.f32.xlu0 %v158_v13 }
 0x13e   :  { %v161_v14 = vsel %vm157_vm2, %v152_v11, 0.0 }
 0x141   :  { %162 = vadd.xlane.f32.xlu0 %v161_v14 }
 0x1ca   :  { %v160_v15 = vpop.xlane.xlu0 %159 }
 0x1cb   :  { %v165_v16 = vmul.f32 0.020833334, %v160_v15 }
 0x1cd   :  { %v167_v17 = vsub.f32 %v149_v8, %v165_v16 }
 0x1ce   :  { %v163_v18 = vpop.xlane.xlu0 %162 }
 0x1cf   :  { %v166_v19 = vmul.f32 0.020833334, %v163_v18  ;;  %v169_v20 = vmul.f32 %v167_v17, %v167_v17 }
 0x1d1   :  { %v168_v21 = vsub.f32 %v152_v11, %v166_v19  ;;  %v171_v22 = vsel %vm157_vm2, %v169_v20, 0.0 }
 0x1d2   :  { %172 = vadd.xlane.f32.xlu1 %v171_v22 }
 0x1d3   :  { %v170_v23 = vmul.f32 %v168_v21, %v168_v21 }
 0x1d5   :  { %v174_v24 = vsel %vm157_vm2, %v170_v23, 0.0 }
 0x1d6   :  { %175 = vadd.xlane.f32.xlu1 %v174_v24 }
 0x25f   :  { %v173_v25 = vpop.xlane.xlu1 %172 }
 0x260   :  { %v177_v26 = vmul.f32 0.020833334, %v173_v25 }
 0x262   :  { %v179_v27 = vadd.f32 1e-05, %v177_v26 }
 0x263   :  { %v176_v28 = vpop.xlane.xlu1 %175 }
 0x264   :  { %253 = vrsqrt.f32 %v179_v27  ;;  %v178_v29 = vmul.f32 0.020833334, %v176_v28 }
 0x266   :  { %v180_v30 = vadd.f32 1e-05, %v178_v29 }
 0x268   :  { %255 = vrsqrt.f32 %v180_v30 }
 0x26e   :  { %v254_v31 = vpop.eup %253 }
 0x26f   :  { %v183_v33 = vmul.f32 %v254_v31, %v167_v17 }
 0x271   :  { %v191_v35 = vmul.f32 %v226_v32, %v183_v33 }
 0x272   :  { %v256_v36 = vpop.eup %255 }
 0x273   :  { %v184_v37 = vmul.f32 %v256_v36, %v168_v21  ;;  %v199_v38 = vadd.f32 %v227_v34, %v191_v35 }
 0x275   :  { %v192_v39 = vmul.f32 %v226_v32, %v184_v37  ;;  %201 = vst.msk [vmem:[#allocation11] sm:$0xff] %vm157_vm2, %v199_v38 }
 0x277   :  { %v200_v40 = vadd.f32 %v227_v34, %v192_v39 }
 0x279   :  { %202 = vst.msk [vmem:[#allocation11 + $0x8] sm:$0xff] %vm157_vm2, %v200_v40 }
 0x27a   :  { %378 = shalt.err (!%p375_p2)
}
 0x27b   :  { %s379_s11 = scalar_lea.hbm %s528_s5, 256 }
 0x27c   :  { %p380_p3 = scmp.ne.s32.totalorder %s528_s5, %s379_s11  ;;  %p383_p4 = scmp.lt.u32.totalorder %s379_s11, %s528_s5 }
 0x27e   :  { %p385_p5 = pnand %p383_p4, %p380_p3 }
 0x280   :  { %388 = shalt.err (!%p385_p5)
}
 0x281   :  { %214 = dma.vmem_to_hbm [thread:$0]  %s209_s6, 256, %s528_s5, [#allocation4], %s402_s3, %s402_s3, %s403_s29  }
 0x282   :  { %395 = dma.done.wait [#allocation4], 256  }
 0x283   :  { %396 = vsyncadd [#allocation4], 4294967040 }
 0x284   :  { %218 = vsyncpa [#allocation3], 1 }
 0x285   :  { %219 = vsyncpa [#allocation6], 1 }
 0x286   :  { %220 = vsyncpa [#allocation9], 1 }
 0x287   :  { %221 = vsyncpa [#allocation4], 1 }

// kernel: encoder_projector_qformer.8
= control target key start
LH: loop header
LB: loop body
LE: loop exit
PB: predicated region body
PF: predicated region fallthrough
CT: control target
= control target key end

     0   :  { %18 = vsyncpa [#allocation3], 0  ;;  %s2689_s0 = inlined_call_operand.hbm [shape: f32[16,32], index: 0, kind: input, shape index: {}]   ;;  %s2690_s1 = inlined_call_operand.hbm [shape: bf16[32,96], index: 1, kind: input, shape index: {}]   ;;  %s2691_s2 = inlined_call_operand.hbm [shape: f32[1,96], index: 2, kind: input, shape index: {}]   ;;  %s2692_s3 = inlined_call_operand.hbm [shape: bf16[32,32], index: 3, kind: input, shape index: {}]   ;;  %s2693_s4 = inlined_call_operand.hbm [shape: f32[1,32], index: 4, kind: input, shape index: {}]   ;;  %s2694_s5 = inlined_call_operand.hbm [shape: f32[1,32], index: 5, kind: input, shape index: {}]   ;;  %s2695_s6 = inlined_call_operand.hbm [shape: f32[1,32], index: 6, kind: input, shape index: {}]   ;;  %s2696_s7 = inlined_call_operand.hbm [shape: bf16[32,64], index: 7, kind: input, shape index: {}]   ;;  %s2697_s8 = inlined_call_operand.hbm [shape: f32[1,64], index: 8, kind: input, shape index: {}]   ;;  %s2698_s9 = inlined_call_operand.hbm [shape: bf16[64,32], index: 9, kind: input, shape index: {}]   ;;  %s2699_s10 = inlined_call_operand.hbm [shape: f32[1,32], index: 10, kind: input, shape index: {}]   ;;  %s2700_s11 = inlined_call_operand.hbm [shape: f32[1,32], index: 11, kind: input, shape index: {}]   ;;  %s2701_s12 = inlined_call_operand.hbm [shape: f32[1,32], index: 12, kind: input, shape index: {}]   ;;  %s2702_s13 = inlined_call_operand.hbm [shape: f32[16,32], index: 13, kind: output, shape index: {}]  }
   0x1   :  { %19 = vsyncpa [#allocation6], 0 }
   0x2   :  { %20 = vsyncpa [#allocation9], 0 }
   0x3   :  { %21 = vsyncpa [#allocation12], 0 }
   0x4   :  { %22 = vsyncpa [#allocation15], 0 }
   0x5   :  { %23 = vsyncpa [#allocation18], 0 }
   0x6   :  { %24 = vsyncpa [#allocation21], 0 }
   0x7   :  { %25 = vsyncpa [#allocation4], 0  ;;  %s2195_s25 = smov [#allocation5]   ;;  %s1871_s29 = scalar_lea.hbm %s2690_s1, 256 }
   0x8   :  { %s43_s26 = sshll.u32 %s2195_s25, 4  ;;  %p1872_p0 = scmp.ne.s32.totalorder %s2690_s1, %s1871_s29  ;;  %s44_s26 = int_to_ptr.vmem [resolvable:$true] %s43_s26 }
   0x9   :  { %p1875_p1 = scmp.lt.u32.totalorder %s1871_s29, %s2690_s1 }
   0xb   :  { %p1877_p2 = pnand %p1875_p1, %p1872_p0 }
   0xd   :  { %1880 = shalt.err (!%p1877_p2)
}
   0xe   :  { %s1881_s17 = scalar_lea.vmem %s44_s26, 256  ;;  %p1886_p4 = scmp.lt.s32.totalorder %s44_s26, %s44_s26 }
   0xf   :  { %p1882_p3 = scmp.ne.s32.totalorder %s44_s26, %s1881_s17  ;;  %p1887_p5 = scmp.lt.s32.totalorder %s1881_s17, %s1881_s17 }
  0x11   :  { %p1888_p6 = por %p1887_p5, %p1886_p4 }
  0x13   :  { %p1889_p7 = pnand %p1888_p6, %p1882_p3 }
  0x15   :  { %1892 = shalt.err (!%p1889_p7)
}
  0x16   :  { %s2196_s18 = smov 64   ;;  %s2197_s19 = smov 4  }
  0x17   :  { %49 = dma.hbm_to_vmem [thread:$0]  %s2690_s1, 256, %s44_s26, [#allocation6], %s2196_s18, %s2196_s18, %s2197_s19  }
  0x18   :  { %s2198_s22 = smov [#allocation8]   ;;  %s2199_s24 = smov [#allocation11]  }
  0x19   :  { %s65_s23 = sshll.u32 %s2198_s22, 4  ;;  %s88_s25 = sshll.u32 %s2199_s24, 4  ;;  %s66_s23 = int_to_ptr.vmem [resolvable:$true] %s65_s23  ;;  %s89_s25 = int_to_ptr.vmem [resolvable:$true] %s88_s25 }
  0x1a   :  { %s1893_s29 = scalar_lea.hbm %s2692_s3, 256 }
  0x1b   :  { %p1894_p8 = scmp.ne.s32.totalorder %s2692_s3, %s1893_s29  ;;  %p1897_p9 = scmp.lt.u32.totalorder %s1893_s29, %s2692_s3 }
  0x1d   :  { %p1899_p10 = pnand %p1897_p9, %p1894_p8 }
  0x1f   :  { %1902 = shalt.err (!%p1899_p10)
}
  0x20   :  { %s1903_s1 = scalar_lea.vmem %s66_s23, 256  ;;  %p1908_p12 = scmp.lt.s32.totalorder %s66_s23, %s66_s23 }
  0x21   :  { %p1904_p11 = scmp.ne.s32.totalorder %s66_s23, %s1903_s1  ;;  %p1909_p13 = scmp.lt.s32.totalorder %s1903_s1, %s1903_s1 }
  0x23   :  { %p1910_p0 = por %p1909_p13, %p1908_p12 }
  0x25   :  { %p1911_p1 = pnand %p1910_p0, %p1904_p11 }
  0x27   :  { %1914 = shalt.err (!%p1911_p1)
}
  0x28   :  { %71 = dma.hbm_to_vmem [thread:$0]  %s2692_s3, 256, %s66_s23, [#allocation9], %s2196_s18, %s2196_s18, %s2197_s19  }
  0x29   :  { %s1915_s22 = scalar_lea.hbm %s2694_s5, 16 }
  0x2a   :  { %p1916_p2 = scmp.ne.s32.totalorder %s2694_s5, %s1915_s22  ;;  %p1919_p3 = scmp.lt.u32.totalorder %s1915_s22, %s2694_s5 }
  0x2c   :  { %p1921_p4 = pnand %p1919_p3, %p1916_p2 }
  0x2e   :  { %1924 = shalt.err (!%p1921_p4)
}
  0x2f   :  { %s1925_s30 = scalar_lea.vmem %s89_s25, 16  ;;  %s1929_s14 = scalar_lea.vmem %s89_s25, 32 }
  0x30   :  { %p1926_p5 = scmp.ne.s32.totalorder %s89_s25, %s1925_s30  ;;  %p1930_p6 = scmp.lt.s32.totalorder %s89_s25, %s89_s25 }
  0x31   :  { %p1931_p7 = scmp.lt.s32.totalorder %s1929_s14, %s1925_s30 }
  0x33   :  { %p1932_p8 = por %p1931_p7, %p1930_p6 }
  0x35   :  { %p1933_p9 = pnand %p1932_p8, %p1926_p5 }
  0x37   :  { %1936 = shalt.err (!%p1933_p9)
}
  0x38   :  { %91 = dma.hbm_to_vmem [thread:$0]  %s2694_s5, 16, %s89_s25, [#allocation12]  }
  0x39   :  { %s2200_s15 = smov [#allocation14]   ;;  %s2201_s1 = smov [#allocation17]  }
  0x3a   :  { %s107_s16 = sshll.u32 %s2200_s15, 4  ;;  %s129_s26 = sshll.u32 %s2201_s1, 4  ;;  %s108_s16 = int_to_ptr.vmem [resolvable:$true] %s107_s16  ;;  %s130_s26 = int_to_ptr.vmem [resolvable:$true] %s129_s26 }
  0x3b   :  { %s1937_s21 = scalar_lea.hbm %s2696_s7, 256 }
  0x3c   :  { %p1938_p10 = scmp.ne.s32.totalorder %s2696_s7, %s1937_s21  ;;  %p1941_p11 = scmp.lt.u32.totalorder %s1937_s21, %s2696_s7 }
  0x3e   :  { %p1943_p12 = pnand %p1941_p11, %p1938_p10 }
  0x40   :  { %1946 = shalt.err (!%p1943_p12)
}
  0x41   :  { %s1947_s5 = scalar_lea.vmem %s108_s16, 256  ;;  %p1952_p0 = scmp.lt.s32.totalorder %s108_s16, %s108_s16 }
  0x42   :  { %p1948_p13 = scmp.ne.s32.totalorder %s108_s16, %s1947_s5  ;;  %p1953_p1 = scmp.lt.s32.totalorder %s1947_s5, %s1947_s5 }
  0x44   :  { %p1954_p2 = por %p1953_p1, %p1952_p0 }
  0x46   :  { %p1955_p3 = pnand %p1954_p2, %p1948_p13 }
  0x48   :  { %1958 = shalt.err (!%p1955_p3)
}
  0x49   :  { %113 = dma.hbm_to_vmem [thread:$0]  %s2696_s7, 256, %s108_s16, [#allocation15], %s2196_s18, %s2196_s18, %s2197_s19  }
  0x4a   :  { %s1959_s3 = scalar_lea.hbm %s2698_s9, 512 }
  0x4b   :  { %p1960_p4 = scmp.ne.s32.totalorder %s2698_s9, %s1959_s3  ;;  %p1963_p5 = scmp.lt.u32.totalorder %s1959_s3, %s2698_s9 }
  0x4d   :  { %p1965_p6 = pnand %p1963_p5, %p1960_p4 }
  0x4f   :  { %1968 = shalt.err (!%p1965_p6)
}
  0x50   :  { %s1969_s20 = scalar_lea.vmem %s130_s26, 512  ;;  %p1974_p8 = scmp.lt.s32.totalorder %s130_s26, %s130_s26 }
  0x51   :  { %p1970_p7 = scmp.ne.s32.totalorder %s130_s26, %s1969_s20  ;;  %p1975_p9 = scmp.lt.s32.totalorder %s1969_s20, %s1969_s20 }
  0x53   :  { %p1976_p10 = por %p1975_p9, %p1974_p8 }
  0x55   :  { %p1977_p11 = pnand %p1976_p10, %p1970_p7 }
  0x57   :  { %1980 = shalt.err (!%p1977_p11)
}
  0x58   :  { %135 = dma.hbm_to_vmem [thread:$0]  %s2698_s9, 512, %s130_s26, [#allocation18], %s2196_s18, %s2196_s18, %s2197_s19  }
  0x59   :  { %s2202_s21 = smov [#allocation20]   ;;  %s2203_s24 = smov [#allocation2]  }
  0x5a   :  { %s152_s22 = sshll.u32 %s2202_s21, 4  ;;  %s31_s27 = sshll.u32 %s2203_s24, 4  ;;  %s153_s22 = int_to_ptr.vmem [resolvable:$true] %s152_s22  ;;  %s32_s27 = int_to_ptr.vmem [resolvable:$true] %s31_s27 }
  0x5b   :  { %s1981_s25 = scalar_lea.hbm %s2700_s11, 16 }
  0x5c   :  { %p1982_p12 = scmp.ne.s32.totalorder %s2700_s11, %s1981_s25  ;;  %p1985_p13 = scmp.lt.u32.totalorder %s1981_s25, %s2700_s11 }
  0x5e   :  { %p1987_p0 = pnand %p1985_p13, %p1982_p12 }
  0x60   :  { %1990 = shalt.err (!%p1987_p0)
}
  0x61   :  { %s1991_s9 = scalar_lea.vmem %s153_s22, 16  ;;  %s1995_s19 = scalar_lea.vmem %s153_s22, 32 }
  0x62   :  { %p1992_p1 = scmp.ne.s32.totalorder %s153_s22, %s1991_s9  ;;  %p1996_p2 = scmp.lt.s32.totalorder %s153_s22, %s153_s22 }
  0x63   :  { %p1997_p3 = scmp.lt.s32.totalorder %s1995_s19, %s1991_s9 }
  0x65   :  { %p1998_p4 = por %p1997_p3, %p1996_p2 }
  0x67   :  { %p1999_p5 = pnand %p1998_p4, %p1992_p1 }
  0x69   :  { %2002 = shalt.err (!%p1999_p5)
}
  0x6a   :  { %155 = dma.hbm_to_vmem [thread:$0]  %s2700_s11, 16, %s153_s22, [#allocation21]  }
  0x6b   :  { %s2003_s17 = scalar_lea.hbm %s2689_s0, 256 }
  0x6c   :  { %p2004_p6 = scmp.ne.s32.totalorder %s2689_s0, %s2003_s17  ;;  %p2007_p7 = scmp.lt.u32.totalorder %s2003_s17, %s2689_s0 }
  0x6e   :  { %p2009_p8 = pnand %p2007_p7, %p2004_p6 }
  0x70   :  { %2012 = shalt.err (!%p2009_p8)
}
  0x71   :  { %s2013_s24 = scalar_lea.vmem %s32_s27, 256  ;;  %p2018_p10 = scmp.lt.s32.totalorder %s32_s27, %s32_s27 }
  0x72   :  { %p2014_p9 = scmp.ne.s32.totalorder %s32_s27, %s2013_s24  ;;  %p2019_p11 = scmp.lt.s32.totalorder %s2013_s24, %s2013_s24 }
  0x74   :  { %p2020_p12 = por %p2019_p11, %p2018_p10 }
  0x76   :  { %p2021_p13 = pnand %p2020_p12, %p2014_p9 }
  0x78   :  { %2024 = shalt.err (!%p2021_p13)
}
  0x79   :  { %s2204_s11 = smov 128   ;;  %s2205_s22 = smov 8  }
  0x7a   :  { %37 = dma.hbm_to_vmem [thread:$0]  %s2689_s0, 256, %s32_s27, [#allocation3], %s2204_s11, %s2204_s11, %s2205_s22  }
  0x7b   :  { %s2206_s25 = smov [#allocation7]   ;;  %s2207_s30 = smov [#allocation10]  }
  0x7c   :  { %s56_s29 = sshll.u32 %s2206_s25, 4  ;;  %s78_s14 = sshll.u32 %s2207_s30, 4  ;;  %s57_s29 = int_to_ptr.vmem [resolvable:$true] %s56_s29  ;;  %s79_s14 = int_to_ptr.vmem [resolvable:$true] %s78_s14 }
  0x7d   :  { %s2025_s19 = scalar_lea.hbm %s2691_s2, 16 }
  0x7e   :  { %p2026_p0 = scmp.ne.s32.totalorder %s2691_s2, %s2025_s19  ;;  %p2029_p1 = scmp.lt.u32.totalorder %s2025_s19, %s2691_s2 }
  0x80   :  { %p2031_p2 = pnand %p2029_p1, %p2026_p0 }
  0x82   :  { %2034 = shalt.err (!%p2031_p2)
}
  0x83   :  { %s2035_s0 = scalar_lea.vmem %s57_s29, 16  ;;  %s2039_s27 = scalar_lea.vmem %s57_s29, 32 }
  0x84   :  { %p2036_p3 = scmp.ne.s32.totalorder %s57_s29, %s2035_s0  ;;  %p2040_p4 = scmp.lt.s32.totalorder %s57_s29, %s57_s29 }
  0x85   :  { %p2041_p5 = scmp.lt.s32.totalorder %s2039_s27, %s2035_s0 }
  0x87   :  { %p2042_p6 = por %p2041_p5, %p2040_p4 }
  0x89   :  { %p2043_p7 = pnand %p2042_p6, %p2036_p3 }
  0x8b   :  { %2046 = shalt.err (!%p2043_p7)
}
  0x8c   :  { %59 = dma.hbm_to_vmem [thread:$0]  %s2691_s2, 16, %s57_s29, [#allocation6]  }
  0x8d   :  { %s2047_s21 = scalar_lea.hbm %s2693_s4, 16 }
  0x8e   :  { %p2048_p8 = scmp.ne.s32.totalorder %s2693_s4, %s2047_s21  ;;  %p2051_p9 = scmp.lt.u32.totalorder %s2047_s21, %s2693_s4 }
  0x90   :  { %p2053_p10 = pnand %p2051_p9, %p2048_p8 }
  0x92   :  { %2056 = shalt.err (!%p2053_p10)
}
  0x93   :  { %s2057_s30 = scalar_lea.vmem %s79_s14, 16  ;;  %s2061_s3 = scalar_lea.vmem %s79_s14, 32 }
  0x94   :  { %p2058_p11 = scmp.ne.s32.totalorder %s79_s14, %s2057_s30  ;;  %p2062_p12 = scmp.lt.s32.totalorder %s79_s14, %s79_s14 }
  0x95   :  { %p2063_p13 = scmp.lt.s32.totalorder %s2061_s3, %s2057_s30 }
  0x97   :  { %p2064_p0 = por %p2063_p13, %p2062_p12 }
  0x99   :  { %p2065_p1 = pnand %p2064_p0, %p2058_p11 }
  0x9b   :  { %2068 = shalt.err (!%p2065_p1)
}
  0x9c   :  { %81 = dma.hbm_to_vmem [thread:$0]  %s2693_s4, 16, %s79_s14, [#allocation9]  }
  0x9d   :  { %s2208_s9 = smov [#allocation13]   ;;  %s2209_s26 = smov [#allocation16]  }
  0x9e   :  { %s98_s19 = sshll.u32 %s2208_s9, 4  ;;  %s120_s23 = sshll.u32 %s2209_s26, 4  ;;  %s99_s19 = int_to_ptr.vmem [resolvable:$true] %s98_s19  ;;  %s121_s23 = int_to_ptr.vmem [resolvable:$true] %s120_s23 }
  0x9f   :  { %s2069_s0 = scalar_lea.hbm %s2695_s6, 16 }
  0xa0   :  { %p2070_p2 = scmp.ne.s32.totalorder %s2695_s6, %s2069_s0  ;;  %p2073_p3 = scmp.lt.u32.totalorder %s2069_s0, %s2695_s6 }
  0xa2   :  { %p2075_p4 = pnand %p2073_p3, %p2070_p2 }
  0xa4   :  { %2078 = shalt.err (!%p2075_p4)
}
  0xa5   :  { %s2079_s4 = scalar_lea.vmem %s99_s19, 16  ;;  %s2083_s14 = scalar_lea.vmem %s99_s19, 32 }
  0xa6   :  { %p2080_p5 = scmp.ne.s32.totalorder %s99_s19, %s2079_s4  ;;  %p2084_p6 = scmp.lt.s32.totalorder %s99_s19, %s99_s19 }
  0xa7   :  { %p2085_p7 = scmp.lt.s32.totalorder %s2083_s14, %s2079_s4 }
  0xa9   :  { %p2086_p8 = por %p2085_p7, %p2084_p6 }
  0xab   :  { %p2087_p9 = pnand %p2086_p8, %p2080_p5 }
  0xad   :  { %2090 = shalt.err (!%p2087_p9)
}
  0xae   :  { %101 = dma.hbm_to_vmem [thread:$0]  %s2695_s6, 16, %s99_s19, [#allocation12]  }
  0xaf   :  { %s2091_s5 = scalar_lea.hbm %s2697_s8, 16 }
  0xb0   :  { %p2092_p10 = scmp.ne.s32.totalorder %s2697_s8, %s2091_s5  ;;  %p2095_p11 = scmp.lt.u32.totalorder %s2091_s5, %s2697_s8 }
  0xb2   :  { %p2097_p12 = pnand %p2095_p11, %p2092_p10 }
  0xb4   :  { %2100 = shalt.err (!%p2097_p12)
}
  0xb5   :  { %s2101_s29 = scalar_lea.vmem %s121_s23, 16  ;;  %s2105_s9 = scalar_lea.vmem %s121_s23, 32 }
  0xb6   :  { %p2102_p13 = scmp.ne.s32.totalorder %s121_s23, %s2101_s29  ;;  %p2106_p0 = scmp.lt.s32.totalorder %s121_s23, %s121_s23 }
  0xb7   :  { %p2107_p1 = scmp.lt.s32.totalorder %s2105_s9, %s2101_s29 }
  0xb9   :  { %p2108_p2 = por %p2107_p1, %p2106_p0 }
  0xbb   :  { %p2109_p3 = pnand %p2108_p2, %p2102_p13 }
  0xbd   :  { %2112 = shalt.err (!%p2109_p3)
}
  0xbe   :  { %123 = dma.hbm_to_vmem [thread:$0]  %s2697_s8, 16, %s121_s23, [#allocation15]  }
  0xbf   :  { %s2210_s26 = smov [#allocation19]   ;;  %s2211_s1 = smov [#allocation22]  }
  0xc0   :  { %s142_s15 = sshll.u32 %s2210_s26, 4  ;;  %s162_s0 = sshll.u32 %s2211_s1, 4  ;;  %s143_s15 = int_to_ptr.vmem [resolvable:$true] %s142_s15  ;;  %s163_s0 = int_to_ptr.vmem [resolvable:$true] %s162_s0 }
  0xc1   :  { %s2113_s20 = scalar_lea.hbm %s2699_s10, 16 }
  0xc2   :  { %p2114_p4 = scmp.ne.s32.totalorder %s2699_s10, %s2113_s20  ;;  %p2117_p5 = scmp.lt.u32.totalorder %s2113_s20, %s2699_s10 }
  0xc4   :  { %p2119_p6 = pnand %p2117_p5, %p2114_p4 }
  0xc6   :  { %2122 = shalt.err (!%p2119_p6)
}
  0xc7   :  { %s2123_s8 = scalar_lea.vmem %s143_s15, 16  ;;  %s2127_s23 = scalar_lea.vmem %s143_s15, 32 }
  0xc8   :  { %p2124_p7 = scmp.ne.s32.totalorder %s143_s15, %s2123_s8  ;;  %p2128_p8 = scmp.lt.s32.totalorder %s143_s15, %s143_s15 }
  0xc9   :  { %p2129_p9 = scmp.lt.s32.totalorder %s2127_s23, %s2123_s8 }
  0xcb   :  { %p2130_p10 = por %p2129_p9, %p2128_p8 }
  0xcd   :  { %p2131_p11 = pnand %p2130_p10, %p2124_p7 }
  0xcf   :  { %2134 = shalt.err (!%p2131_p11)
}
  0xd0   :  { %145 = dma.hbm_to_vmem [thread:$0]  %s2699_s10, 16, %s143_s15, [#allocation18]  }
  0xd1   :  { %s2135_s25 = scalar_lea.hbm %s2701_s12, 16 }
  0xd2   :  { %p2136_p12 = scmp.ne.s32.totalorder %s2701_s12, %s2135_s25  ;;  %p2139_p13 = scmp.lt.u32.totalorder %s2135_s25, %s2701_s12 }
  0xd4   :  { %p2141_p0 = pnand %p2139_p13, %p2136_p12 }
  0xd6   :  { %2144 = shalt.err (!%p2141_p0)
}
  0xd7   :  { %s2145_s9 = scalar_lea.vmem %s163_s0, 16  ;;  %s2149_s6 = scalar_lea.vmem %s163_s0, 32 }
  0xd8   :  { %p2146_p1 = scmp.ne.s32.totalorder %s163_s0, %s2145_s9  ;;  %p2150_p2 = scmp.lt.s32.totalorder %s163_s0, %s163_s0 }
  0xd9   :  { %p2151_p3 = scmp.lt.s32.totalorder %s2149_s6, %s2145_s9 }
  0xdb   :  { %p2152_p4 = por %p2151_p3, %p2150_p2 }
  0xdd   :  { %p2153_p5 = pnand %p2152_p4, %p2146_p1 }
  0xdf   :  { %2156 = shalt.err (!%p2153_p5)
}
  0xe0   :  { %165 = dma.hbm_to_vmem [thread:$0]  %s2701_s12, 16, %s163_s0, [#allocation21]  }
  0xe1   :  { %2179 = dma.done.wait [#allocation3], 256  }
  0xe2   :  { %2180 = vsyncadd [#allocation3], 4294967040 }
  0xe3   :  { %2181 = dma.done.wait [#allocation6], 272  }
  0xe4   :  { %2182 = vsyncadd [#allocation6], 4294967024 }
  0xe5   :  { %2183 = dma.done.wait [#allocation9], 272  }
  0xe6   :  { %2184 = vsyncadd [#allocation9], 4294967024 }
  0xe7   :  { %2185 = dma.done.wait [#allocation12], 32  }
  0xe8   :  { %2186 = vsyncadd [#allocation12], 4294967264 }
  0xe9   :  { %2187 = dma.done.wait [#allocation15], 272  }
  0xea   :  { %2188 = vsyncadd [#allocation15], 4294967024 }
  0xeb   :  { %2189 = dma.done.wait [#allocation18], 528  }
  0xec   :  { %2190 = vsyncadd [#allocation18], 4294966768 }
  0xed   :  { %2191 = dma.done.wait [#allocation21], 32  }
  0xee   :  { %2192 = vsyncadd [#allocation21], 4294967264  ;;  %v2212_v0 = vmov 0.0   ;;  %vm2213_vm0 = vmmov 0   ;;  %v1817_v1 = vld [vmem:[#allocation5] sm:$0xff]   ;;  %v1818_v2 = vld [vmem:[#allocation5 + $0x8] sm:$0xff]  }
  0xef   :  { %1638 = vmatprep.subr.bf16.mxu0 %v2212_v0  ;;  %1642 = vmatprep.mubr.msk.bf16.mxu0 %vm2213_vm0, %v2212_v0  ;;  %v2474_v3 = vld [vmem:[#allocation2] sm:$0xff]  ;;  %v2476_v4 = vld [vmem:[#allocation2 + $0x8] sm:$0xff]  ;;  %vm232_vm1 = vcmask 261120   ;;  %s2214_s12 = smov 96   ;;  %s2215_s26 = smov 120   ;;  %vm284_vm2 = vcmask 64512  }
  0xf0   :  { %1646 = vmatprep.subr.bf16.mxu1 %v2212_v0  ;;  %1648 = vmatprep.mubr.msk.bf16.mxu1 %vm2213_vm0, %v2212_v0  ;;  %v208_v5 = vpack.c.bf16 %v2476_v4, %v2474_v3  ;;  %v1554_v6 = vld [vmem:[#allocation7] ss:$0 sm:$0xff]  ;;  %s2216_s15 = smov 88   ;;  %s2217_s1 = smov 80   ;;  %vm348_vm3 = vcmask 1043456   ;;  %vm736_vm4 = vcmask 130048  }
  0xf1   :  { %1639 = vmatpush3.bf16.msra.mxu0 %v1817_v1  ;;  %s2218_s0 = smov 112   ;;  %s2219_s27 = smov 72   ;;  %vm738_vm5 = vcmask 195584   ;;  %vm1438_vm6 = vcmask 523264  }
  0xf2   :  { %1640 = vmatprep.subr.bf16.mxu0 %v2212_v0  ;;  %s2220_s17 = smov 104   ;;  %s2221_s20 = smov 56  }
  0xf3   :  { %s2222_s7 = smov 48   ;;  %s2223_s4 = smov 40  }
  0xf4   :  { %s2225_s14 = smov 24   ;;  %s2226_s16 = smov [#allocation23]  }
  0xf5   :  { %1641 = vmatpush3.bf16.msra.mxu0 %v1818_v2  ;;  %s1536_s8 = sshll.u32 %s2226_s16, 4  ;;  %s1537_s8 = int_to_ptr.vmem [resolvable:$true] %s1536_s8 }
  0xf6   :  { %1652 = vmatprep.subr.bf16.mxu0 %v2212_v0  ;;  %s2157_s23 = scalar_lea.vmem %s1537_s8, 256  ;;  %p2162_p7 = scmp.lt.s32.totalorder %s1537_s8, %s1537_s8 }
  0xf7   :  { %p2158_p6 = scmp.ne.s32.totalorder %s1537_s8, %s2157_s23  ;;  %p2163_p8 = scmp.lt.s32.totalorder %s2157_s23, %s2157_s23 }
  0xf8   :  { %1643 = vmatmul.mubr.msk.bf16.vlgmr.msra.gmra.mrb[0].mxu0 %vm232_vm1, %v208_v5 }
  0xf9   :  { %1654 = vmatprep.mubr.msk.bf16.mxu0 %vm2213_vm0, %v2212_v0  ;;  %p2164_p9 = por %p2163_p8, %p2162_p7 }
  0xfb   :  { %p2165_p10 = pnand %p2164_p9, %p2158_p6 }
 0x1cb   :  { %v270_v7 = vpop.f32.mrb[0].mxu0 }
 0x1cc   :  { %v271_v8 = vadd.f32 %v1554_v6, %v270_v7  ;;  %v1644_v9 = vpop.f32.mrb[1].mxu0 }
 0x1cd   :  { %v273_v10 = vpop.f32.mrb[2].mxu0 }
 0x1ce   :  { %v277_v11 = vmul.f32 0.35355338, %v271_v8  ;;  %v2485_v12 = vpack.c.bf16 %v271_v8, %v271_v8  ;;  %v1645_v13 = vpop.f32.mrb[3].mxu0  ;;  %v274_v15 = vadd.f32 %v1554_v6, %v273_v10 }
 0x1d0   :  { %v279_v14 = vpack.c.bf16 %v277_v11, %v277_v11  ;;  %282 = vrot.lane.b32.xlu0 %v2485_v12, %s2214_s12  ;;  %v278_v16 = vmul.f32 0.35355338, %v274_v15  ;;  %v2491_v17 = vpack.c.bf16 %v274_v15, %v274_v15 }
 0x1d2   :  { %393 = vrot.lane.b32.xlu1 %v279_v14, %s2215_s26  ;;  %v740_v18 = vpack.c.bf16 %v278_v16, %v278_v16 }
 0x1d4   :  { %395 = vrot.lane.b32.xlu0 %v2485_v12, %s2216_s15 }
 0x1d6   :  { %505 = vrot.lane.b32.xlu1 %v2485_v12, %s2217_s1 }
 0x1d8   :  { %503 = vrot.lane.b32.xlu0 %v279_v14, %s2218_s0 }
 0x1da   :  { %615 = vrot.lane.b32.xlu1 %v2485_v12, %s2219_s27 }
 0x1dc   :  { %613 = vrot.lane.b32.xlu0 %v279_v14, %s2220_s17 }
 0x1de   :  { %743 = vrot.lane.b32.xlu1 %v2491_v17, %s2214_s12 }
 0x1e0   :  { %854 = vrot.lane.b32.xlu0 %v2491_v17, %s2216_s15 }
 0x1e2   :  { %852 = vrot.lane.b32.xlu1 %v740_v18, %s2215_s26 }
 0x1e4   :  { %964 = vrot.lane.b32.xlu0 %v2491_v17, %s2217_s1 }
 0x1e6   :  { %962 = vrot.lane.b32.xlu1 %v740_v18, %s2218_s0 }
 0x1e8   :  { %1074 = vrot.lane.b32.xlu0 %v2491_v17, %s2219_s27 }
 0x1ea   :  { %1072 = vrot.lane.b32.xlu1 %v740_v18, %s2220_s17 }
 0x242   :  { %v283_v19 = vpop.permute.xlu0 %282 }
 0x243   :  { %v289_v20 = vsel %vm284_vm2, %v283_v19, 0 }
 0x244   :  { %1647 = vmatpush3.bf16.xpose.msra.mxu1 %v289_v20  ;;  %v394_v22 = vpop.permute.xlu1 %393 }
 0x245   :  { %1658 = vmatprep.subr.bf16.mxu1 %v2212_v0 }
 0x246   :  { %v396_v21 = vpop.permute.xlu0 %395 }
 0x247   :  { %v401_v23 = vsel %vm284_vm2, %v396_v21, 0 }
 0x248   :  { %v506_v24 = vpop.permute.xlu1 %505 }
 0x249   :  { %v511_v25 = vsel %vm284_vm2, %v506_v24, 0 }
 0x24a   :  { %v504_v27 = vpop.permute.xlu0 %503 }
 0x24b   :  { %1649 = vmatmul.mubr.msk.bf16.vlgmr.msra.gmra.mrb[0].mxu1 %vm284_vm2, %v279_v14 }
 0x24c   :  { %1659 = vmatpush3.bf16.xpose.msra.mxu1 %v401_v23  ;;  %1660 = vmatprep.mubr.msk.bf16.mxu1 %vm2213_vm0, %v2212_v0  ;;  %v616_v26 = vpop.permute.xlu1 %615 }
 0x24d   :  { %1670 = vmatprep.subr.bf16.mxu1 %v2212_v0  ;;  %v621_v28 = vsel %vm284_vm2, %v616_v26, 0 }
 0x24e   :  { %v614_v30 = vpop.permute.xlu0 %613 }
 0x250   :  { %v744_v29 = vpop.permute.xlu1 %743 }
 0x251   :  { %v749_v31 = vsel %vm284_vm2, %v744_v29, 0 }
 0x252   :  { %v855_v32 = vpop.permute.xlu0 %854 }
 0x253   :  { %1661 = vmatmul.mubr.msk.bf16.vlgmr.msra.gmra.mrb[4].mxu1 %vm284_vm2, %v394_v22  ;;  %v860_v33 = vsel %vm284_vm2, %v855_v32, 0 }
 0x254   :  { %1671 = vmatpush3.bf16.xpose.msra.mxu1 %v511_v25  ;;  %1672 = vmatprep.mubr.msk.bf16.mxu1 %vm2213_vm0, %v2212_v0  ;;  %v853_v35 = vpop.permute.xlu1 %852 }
 0x255   :  { %1682 = vmatprep.subr.bf16.mxu1 %v2212_v0 }
 0x256   :  { %v965_v34 = vpop.permute.xlu0 %964 }
 0x257   :  { %v970_v36 = vsel %vm284_vm2, %v965_v34, 0 }
 0x258   :  { %v963_v38 = vpop.permute.xlu1 %962 }
 0x25a   :  { %v1075_v37 = vpop.permute.xlu0 %1074 }
 0x25b   :  { %1673 = vmatmul.mubr.msk.bf16.vlgmr.msra.gmra.mrb[8].mxu1 %vm284_vm2, %v504_v27  ;;  %v1080_v39 = vsel %vm284_vm2, %v1075_v37, 0 }
 0x25c   :  { %1683 = vmatpush3.bf16.xpose.msra.mxu1 %v621_v28  ;;  %1684 = vmatprep.mubr.msk.bf16.mxu1 %vm2213_vm0, %v2212_v0  ;;  %v1073_v40 = vpop.permute.xlu1 %1072 }
 0x25d   :  { %1694 = vmatprep.subr.bf16.mxu1 %v2212_v0 }
 0x263   :  { %1685 = vmatmul.mubr.msk.bf16.vlgmr.msra.gmra.mrb[12].mxu1 %vm284_vm2, %v614_v30 }
 0x264   :  { %1695 = vmatpush3.bf16.xpose.msra.mxu1 %v749_v31  ;;  %1696 = vmatprep.mubr.msk.bf16.mxu1 %vm2213_vm0, %v2212_v0 }
 0x265   :  { %1706 = vmatprep.subr.bf16.mxu1 %v2212_v0 }
 0x26b   :  { %1697 = vmatmul.mubr.msk.bf16.vlgmr.msra.gmra.mrb[16].mxu1 %vm284_vm2, %v740_v18 }
 0x26c   :  { %1707 = vmatpush3.bf16.xpose.msra.mxu1 %v860_v33  ;;  %1708 = vmatprep.mubr.msk.bf16.mxu1 %vm2213_vm0, %v2212_v0 }
 0x26d   :  { %1718 = vmatprep.subr.bf16.mxu1 %v2212_v0 }
 0x273   :  { %1709 = vmatmul.mubr.msk.bf16.vlgmr.msra.gmra.mrb[20].mxu1 %vm284_vm2, %v853_v35 }
 0x274   :  { %1719 = vmatpush3.bf16.xpose.msra.mxu1 %v970_v36  ;;  %1720 = vmatprep.mubr.msk.bf16.mxu1 %vm2213_vm0, %v2212_v0 }
 0x275   :  { %1730 = vmatprep.subr.bf16.mxu1 %v2212_v0 }
 0x27b   :  { %1721 = vmatmul.mubr.msk.bf16.vlgmr.msra.gmra.mrb[24].mxu1 %vm284_vm2, %v963_v38 }
 0x27c   :  { %1731 = vmatpush3.bf16.xpose.msra.mxu1 %v1080_v39  ;;  %1732 = vmatprep.mubr.msk.bf16.mxu1 %vm2213_vm0, %v2212_v0 }
 0x27d   :  { %1742 = vmatprep.subr.bf16.mxu1 %v2212_v0 }
 0x283   :  { %1733 = vmatmul.mubr.msk.bf16.vlgmr.msra.gmra.mrb[28].mxu1 %vm284_vm2, %v1073_v40 }
 0x284   :  { %1746 = vmatprep.mubr.msk.bf16.mxu1 %vm2213_vm0, %v2212_v0 }
 0x31e   :  { %v325_v41 = vpop.f32.mrb[0].mxu1 }
 0x31f   :  { %v1650_v42 = vpop.f32.mrb[1].mxu1  ;;  %v331_v43 = vsel %vm284_vm2, %v325_v41, -inf }
 0x320   :  { %v328_v44 = vpop.f32.mrb[2].mxu1  ;;  %332 = vmax.xlane.f32.xlu0 %v331_v43 }
 0x321   :  { %v1651_v45 = vpop.f32.mrb[3].mxu1 }
 0x326   :  { %v437_v46 = vpop.f32.mrb[4].mxu1 }
 0x327   :  { %v1662_v47 = vpop.f32.mrb[5].mxu1  ;;  %v443_v48 = vsel %vm284_vm2, %v437_v46, -inf }
 0x328   :  { %v440_v49 = vpop.f32.mrb[6].mxu1  ;;  %444 = vmax.xlane.f32.xlu1 %v443_v48 }
 0x329   :  { %v1663_v50 = vpop.f32.mrb[7].mxu1 }
 0x32e   :  { %v547_v51 = vpop.f32.mrb[8].mxu1 }
 0x32f   :  { %v1674_v52 = vpop.f32.mrb[9].mxu1  ;;  %v553_v53 = vsel %vm284_vm2, %v547_v51, -inf }
 0x330   :  { %v550_v54 = vpop.f32.mrb[10].mxu1  ;;  %554 = vmax.xlane.f32.xlu0 %v553_v53 }
 0x331   :  { %v1675_v55 = vpop.f32.mrb[11].mxu1 }
 0x336   :  { %v2540_v56 = vpop.f32.mrb[12].mxu1 }
 0x337   :  { %v1686_v57 = vpop.f32.mrb[13].mxu1  ;;  %v663_v58 = vsel %vm284_vm2, %v2540_v56, -inf }
 0x338   :  { %v660_v59 = vpop.f32.mrb[14].mxu1  ;;  %664 = vmax.xlane.f32.xlu0 %v663_v58 }
 0x339   :  { %v1687_v60 = vpop.f32.mrb[15].mxu1 }
 0x33e   :  { %v2544_v61 = vpop.f32.mrb[16].mxu1 }
 0x33f   :  { %v1698_v62 = vpop.f32.mrb[17].mxu1  ;;  %v791_v63 = vsel %vm284_vm2, %v2544_v61, -inf }
 0x340   :  { %792 = vmax.xlane.f32.xlu1 %v791_v63  ;;  %v788_v1 = vpop.f32.mrb[18].mxu1 }
 0x341   :  { %v1699_v2 = vpop.f32.mrb[19].mxu1 }
 0x346   :  { %v896_v5 = vpop.f32.mrb[20].mxu1 }
 0x347   :  { %v1710_v6 = vpop.f32.mrb[21].mxu1  ;;  %v902_v7 = vsel %vm284_vm2, %v896_v5, -inf }
 0x348   :  { %903 = vmax.xlane.f32.xlu0 %v902_v7  ;;  %v899_v8 = vpop.f32.mrb[22].mxu1 }
 0x349   :  { %v1711_v9 = vpop.f32.mrb[23].mxu1 }
 0x34e   :  { %v1006_v10 = vpop.f32.mrb[24].mxu1 }
 0x34f   :  { %v1722_v11 = vpop.f32.mrb[25].mxu1  ;;  %v1012_v13 = vsel %vm284_vm2, %v1006_v10, -inf }
 0x350   :  { %1013 = vmax.xlane.f32.xlu1 %v1012_v13  ;;  %v1009_v14 = vpop.f32.mrb[26].mxu1 }
 0x351   :  { %v1723_v15 = vpop.f32.mrb[27].mxu1 }
 0x356   :  { %v2550_v16 = vpop.f32.mrb[28].mxu1 }
 0x357   :  { %v1734_v18 = vpop.f32.mrb[29].mxu1  ;;  %v1122_v21 = vsel %vm284_vm2, %v2550_v16, -inf }
 0x358   :  { %v1119_v19 = vpop.f32.mrb[30].mxu1 }
 0x359   :  { %v1735_v20 = vpop.f32.mrb[31].mxu1 }
 0x35e   :  { %455 = vrot.lane.b32.xlu0 %v2485_v12, %s2221_s20 }
 0x361   :  { %343 = vrot.lane.b32.xlu1 %v2485_v12, %s2196_s18 }
 0x37d   :  { %1123 = vmax.xlane.f32.xlu0 %v1122_v21 }
 0x3ad   :  { %v333_v22 = vpop.xlane.xlu0 %332 }
 0x3ae   :  { %v334_v23 = vsub.f32 %v325_v41, %v333_v22 }
 0x3b0   :  { %v335_v24 = vmul.f32 1.442695, %v334_v23 }
 0x3b2   :  { %1827 = vpow2.f32 %v335_v24 }
 0x3b5   :  { %v445_v25 = vpop.xlane.xlu1 %444 }
 0x3b6   :  { %v446_v26 = vsub.f32 %v437_v46, %v445_v25 }
 0x3b8   :  { %v447_v27 = vmul.f32 1.442695, %v446_v26 }
 0x3ba   :  { %1829 = vpow2.f32 %v447_v27 }
 0x3bc   :  { %v2558_v28 = vpop.eup %1827 }
 0x3bd   :  { %v555_v29 = vpop.xlane.xlu0 %554  ;;  %v337_v30 = vsel %vm284_vm2, %v2558_v28, 0.0 }
 0x3be   :  { %v556_v31 = vsub.f32 %v547_v51, %v555_v29  ;;  %338 = vadd.xlane.f32.xlu1 %v337_v30 }
 0x3c0   :  { %v557_v32 = vmul.f32 1.442695, %v556_v31 }
 0x3c2   :  { %1831 = vpow2.f32 %v557_v32 }
 0x3c4   :  { %v2562_v33 = vpop.eup %1829 }
 0x3c5   :  { %v449_v34 = vsel %vm284_vm2, %v2562_v33, 0.0  ;;  %v665_v40 = vpop.xlane.xlu0 %664 }
 0x3c6   :  { %450 = vadd.xlane.f32.xlu0 %v449_v34  ;;  %v666_v42 = vsub.f32 %v2540_v56, %v665_v40 }
 0x3c8   :  { %v667_v43 = vmul.f32 1.442695, %v666_v42 }
 0x3ca   :  { %1833 = vpow2.f32 %v667_v43 }
 0x3cc   :  { %v2566_v35 = vpop.eup %1831 }
 0x3cd   :  { %v559_v36 = vsel %vm284_vm2, %v2566_v35, 0.0  ;;  %v793_v37 = vpop.xlane.xlu1 %792 }
 0x3ce   :  { %560 = vadd.xlane.f32.xlu1 %v559_v36  ;;  %v794_v44 = vsub.f32 %v2544_v61, %v793_v37 }
 0x3d0   :  { %v795_v47 = vmul.f32 1.442695, %v794_v44 }
 0x3d2   :  { %1835 = vpow2.f32 %v795_v47 }
 0x3d4   :  { %v1834_v50 = vpop.eup %1833 }
 0x3d5   :  { %v904_v45 = vpop.xlane.xlu0 %903  ;;  %v669_v51 = vsel %vm284_vm2, %v1834_v50, 0.0 }
 0x3d6   :  { %v905_v46 = vsub.f32 %v896_v5, %v904_v45 }
 0x3d8   :  { %v906_v49 = vmul.f32 1.442695, %v905_v46 }
 0x3d9   :  { %v456_v58 = vpop.permute.xlu0 %455 }
 0x3da   :  { %1837 = vpow2.f32 %v906_v49  ;;  %v461_v8 = vsel %vm348_vm3, %v456_v58, 0 }
 0x3dc   :  { %565 = vrot.lane.b32.xlu0 %v2485_v12, %s2222_s7  ;;  %v2579_v52 = vpop.eup %1835 }
 0x3dd   :  { %v1014_v38 = vpop.xlane.xlu1 %1013  ;;  %v797_v54 = vsel %vm284_vm2, %v2579_v52, 0.0 }
 0x3de   :  { %v1015_v48 = vsub.f32 %v1006_v10, %v1014_v38 }
 0x3df   :  { %675 = vrot.lane.b32.xlu1 %v2485_v12, %s2223_s4 }
 0x3e0   :  { %v1016_v12 = vmul.f32 1.442695, %v1015_v48 }
 0x3e1   :  { %v344_v39 = vpop.permute.xlu1 %343 }
 0x3e2   :  { %v350_v41 = vsel %vm348_vm3, %v344_v39, 0  ;;  %1839 = vpow2.f32 %v1016_v12 }
 0x3e3   :  { %1653 = vmatpush3.bf16.msra.mxu0 %v350_v41 }
 0x3e4   :  { %1664 = vmatprep.subr.bf16.mxu0 %v2212_v0  ;;  %v2581_v53 = vpop.eup %1837 }
 0x3e5   :  { %v908_v56 = vsel %vm284_vm2, %v2581_v53, 0.0 }
 0x3ec   :  { %v2585_v55 = vpop.eup %1839 }
 0x3ed   :  { %v1018_v57 = vsel %vm284_vm2, %v2585_v55, 0.0 }
 0x3fb   :  { %670 = vadd.xlane.f32.xlu0 %v669_v51 }
 0x3ff   :  { %798 = vadd.xlane.f32.xlu0 %v797_v54 }
 0x403   :  { %909 = vadd.xlane.f32.xlu1 %v908_v56  ;;  %1019 = vadd.xlane.f32.xlu0 %v1018_v57 }
 0x40a   :  { %v1124_v59 = vpop.xlane.xlu0 %1123 }
 0x40b   :  { %v1125_v60 = vsub.f32 %v2550_v16, %v1124_v59 }
 0x40d   :  { %v1126_v61 = vmul.f32 1.442695, %v1125_v60 }
 0x40f   :  { %1841 = vpow2.f32 %v1126_v61 }
 0x414   :  { %914 = vrot.lane.b32.xlu1 %v2491_v17, %s2221_s20 }
 0x418   :  { %1024 = vrot.lane.b32.xlu1 %v2491_v17, %s2222_s7 }
 0x419   :  { %v2596_v62 = vpop.eup %1841 }
 0x41a   :  { %v1128_v63 = vsel %vm284_vm2, %v2596_v62, 0.0 }
 0x41b   :  { %1129 = vadd.xlane.f32.xlu0 %v1128_v63 }
 0x41c   :  { %1134 = vrot.lane.b32.xlu1 %v2491_v17, %s2223_s4 }
 0x431   :  { %803 = vrot.lane.b32.xlu0 %v2491_v17, %s2196_s18  ;;  %s2224_s18 = smov 16  }
 0x44b   :  { %v339_v1 = vpop.xlane.xlu1 %338 }
 0x44c   :  { %1843 = vrcp.f32 %v339_v1 }
 0x453   :  { %v451_v2 = vpop.xlane.xlu0 %450 }
 0x454   :  { %1845 = vrcp.f32 %v451_v2 }
 0x456   :  { %v1844_v5 = vpop.eup %1843 }
 0x457   :  { %v341_v6 = vmul.f32 %v1844_v5, %v2558_v28  ;;  %v566_v11 = vpop.permute.xlu0 %565 }
 0x458   :  { %v571_v14 = vsel %vm348_vm3, %v566_v11, 0 }
 0x459   :  { %v342_v7 = vpack.c.bf16 %v341_v6, %v341_v6 }
 0x45b   :  { %1655 = vmatmul.mubr.msk.bf16.vlgmr.msra.gmra.mrb[4].mxu0 %vm284_vm2, %v342_v7  ;;  %v561_v9 = vpop.xlane.xlu1 %560 }
 0x45c   :  { %1665 = vmatpush3.bf16.msra.mxu0 %v461_v8  ;;  %1847 = vrcp.f32 %v561_v9  ;;  %1666 = vmatprep.mubr.msk.bf16.mxu0 %vm2213_vm0, %v2212_v0  ;;  %v1819_v8 = vld [vmem:[#allocation8] sm:$0xff]  }
 0x45d   :  { %1676 = vmatprep.subr.bf16.mxu0 %v2212_v0  ;;  %1743 = vmatpush3.bf16.msra.mxu1 %v1819_v8 }
 0x45e   :  { %v1846_v17 = vpop.eup %1845  ;;  %1744 = vmatprep.subr.bf16.mxu1 %v2212_v0 }
 0x45f   :  { %v453_v10 = vmul.f32 %v1846_v17, %v2562_v33  ;;  %v676_v18 = vpop.permute.xlu1 %675 }
 0x460   :  { %v681_v20 = vsel %vm348_vm3, %v676_v18, 0 }
 0x461   :  { %v454_v13 = vpack.c.bf16 %v453_v10, %v453_v10 }
 0x463   :  { %1667 = vmatmul.mubr.msk.bf16.vlgmr.msra.gmra.mrb[8].mxu0 %vm284_vm2, %v454_v13  ;;  %v1820_v13 = vld [vmem:[#allocation8 + $0x8] sm:$0xff]  }
 0x464   :  { %1677 = vmatpush3.bf16.msra.mxu0 %v571_v14  ;;  %1678 = vmatprep.mubr.msk.bf16.mxu0 %vm2213_vm0, %v2212_v0 }
 0x465   :  { %1688 = vmatprep.subr.bf16.mxu0 %v2212_v0  ;;  %1745 = vmatpush3.bf16.msra.mxu1 %v1820_v13 }
 0x466   :  { %v1848_v15 = vpop.eup %1847  ;;  %1758 = vmatprep.subr.bf16.mxu1 %v2212_v0 }
 0x467   :  { %v563_v16 = vmul.f32 %v1848_v15, %v2566_v35 }
 0x469   :  { %v564_v19 = vpack.c.bf16 %v563_v16, %v563_v16 }
 0x46b   :  { %1679 = vmatmul.mubr.msk.bf16.vlgmr.msra.gmra.mrb[12].mxu0 %vm284_vm2, %v564_v19 }
 0x46c   :  { %1689 = vmatpush3.bf16.msra.mxu0 %v681_v20  ;;  %1690 = vmatprep.mubr.msk.bf16.mxu0 %vm2213_vm0, %v2212_v0 }
 0x46d   :  { %1700 = vmatprep.subr.bf16.mxu0 %v2212_v0 }
 0x488   :  { %v671_v21 = vpop.xlane.xlu0 %670 }
 0x489   :  { %1849 = vrcp.f32 %v671_v21 }
 0x48c   :  { %v799_v25 = vpop.xlane.xlu0 %798 }
 0x48d   :  { %1851 = vrcp.f32 %v799_v25 }
 0x490   :  { %v910_v26 = vpop.xlane.xlu1 %909  ;;  %v1020_v27 = vpop.xlane.xlu0 %1019 }
 0x491   :  { %1853 = vrcp.f32 %v910_v26 }
 0x492   :  { %1855 = vrcp.f32 %v1020_v27 }
 0x493   :  { %v1850_v22 = vpop.eup %1849 }
 0x494   :  { %v673_v23 = vmul.f32 %v1850_v22, %v1834_v50  ;;  %v915_v33 = vpop.permute.xlu1 %914 }
 0x495   :  { %v920_v36 = vsel %vm348_vm3, %v915_v33, 0 }
 0x496   :  { %v674_v24 = vpack.c.bf16 %v673_v23, %v673_v23 }
 0x497   :  { %v1852_v28 = vpop.eup %1851 }
 0x498   :  { %1691 = vmatmul.mubr.msk.bf16.vlgmr.msra.gmra.mrb[16].mxu0 %vm284_vm2, %v674_v24  ;;  %v801_v30 = vmul.f32 %v1852_v28, %v2579_v52  ;;  %v1025_v38 = vpop.permute.xlu1 %1024 }
 0x499   :  { %1702 = vmatprep.mubr.msk.bf16.mxu0 %vm2213_vm0, %v2212_v0  ;;  %v1030_v41 = vsel %vm348_vm3, %v1025_v38, 0 }
 0x49a   :  { %v802_v34 = vpack.c.bf16 %v801_v30, %v801_v30 }
 0x49b   :  { %v1854_v35 = vpop.eup %1853 }
 0x49c   :  { %v912_v37 = vmul.f32 %v1854_v35, %v2581_v53  ;;  %v1856_v40 = vpop.eup %1855  ;;  %v1135_v43 = vpop.permute.xlu1 %1134 }
 0x49d   :  { %v1022_v42 = vmul.f32 %v1856_v40, %v2585_v55  ;;  %v1140_v46 = vsel %vm348_vm3, %v1135_v43, 0 }
 0x49e   :  { %v913_v39 = vpack.c.bf16 %v912_v37, %v912_v37 }
 0x49f   :  { %v1023_v44 = vpack.c.bf16 %v1022_v42, %v1022_v42 }
 0x4a8   :  { %v1130_v29 = vpop.xlane.xlu0 %1129 }
 0x4a9   :  { %1857 = vrcp.f32 %v1130_v29 }
 0x4ac   :  { %v804_v31 = vpop.permute.xlu0 %803 }
 0x4ad   :  { %v809_v32 = vsel %vm348_vm3, %v804_v31, 0 }
 0x4ae   :  { %1701 = vmatpush3.bf16.msra.mxu0 %v809_v32 }
 0x4af   :  { %1712 = vmatprep.subr.bf16.mxu0 %v2212_v0 }
 0x4b1   :  { %1703 = vmatmul.mubr.msk.bf16.vlgmr.msra.gmra.mrb[20].mxu0 %vm284_vm2, %v802_v34 }
 0x4b2   :  { %1713 = vmatpush3.bf16.msra.mxu0 %v920_v36  ;;  %1714 = vmatprep.mubr.msk.bf16.mxu0 %vm2213_vm0, %v2212_v0 }
 0x4b3   :  { %1724 = vmatprep.subr.bf16.mxu0 %v2212_v0  ;;  %v1858_v45 = vpop.eup %1857 }
 0x4b4   :  { %v1132_v47 = vmul.f32 %v1858_v45, %v2596_v62 }
 0x4b6   :  { %v1133_v48 = vpack.c.bf16 %v1132_v47, %v1132_v47 }
 0x4b9   :  { %1715 = vmatmul.mubr.msk.bf16.vlgmr.msra.gmra.mrb[24].mxu0 %vm284_vm2, %v913_v39 }
 0x4ba   :  { %1725 = vmatpush3.bf16.msra.mxu0 %v1030_v41  ;;  %1726 = vmatprep.mubr.msk.bf16.mxu0 %vm2213_vm0, %v2212_v0  ;;  %v1574_v41 = vld [vmem:[#allocation10] ss:$0 sm:$0xff] }
 0x4bb   :  { %1736 = vmatprep.subr.bf16.mxu0 %v2212_v0 }
 0x4c1   :  { %1727 = vmatmul.mubr.msk.bf16.vlgmr.msra.gmra.mrb[28].mxu0 %vm284_vm2, %v1023_v44 }
 0x4c2   :  { %1737 = vmatpush3.bf16.msra.mxu0 %v1140_v46  ;;  %1738 = vmatprep.mubr.msk.bf16.mxu0 %vm2213_vm0, %v2212_v0 }
 0x4c3   :  { %1750 = vmatprep.subr.bf16.mxu0 %v2212_v0 }
 0x4c9   :  { %1739 = vmatmul.mubr.msk.bf16.vlgmr.msra.gmra.mrb[32].mxu0 %vm284_vm2, %v1133_v48 }
 0x4ca   :  { %1754 = vmatprep.mubr.msk.bf16.mxu0 %vm2213_vm0, %v2212_v0 }
 0x52e   :  { %v386_v49 = vpop.f32.mrb[4].mxu0 }
 0x52f   :  { %v1656_v12 = vpop.f32.mrb[5].mxu0 }
 0x530   :  { %v389_v50 = vpop.f32.mrb[6].mxu0 }
 0x531   :  { %v1657_v51 = vpop.f32.mrb[7].mxu0 }
 0x536   :  { %v497_v52 = vpop.f32.mrb[8].mxu0 }
 0x537   :  { %v1668_v53 = vpop.f32.mrb[9].mxu0 }
 0x538   :  { %v500_v54 = vpop.f32.mrb[10].mxu0 }
 0x539   :  { %v1669_v55 = vpop.f32.mrb[11].mxu0 }
 0x53e   :  { %v607_v56 = vpop.f32.mrb[12].mxu0 }
 0x53f   :  { %v1680_v57 = vpop.f32.mrb[13].mxu0 }
 0x540   :  { %v610_v58 = vpop.f32.mrb[14].mxu0 }
 0x541   :  { %v1681_v59 = vpop.f32.mrb[15].mxu0 }
 0x56b   :  { %v717_v60 = vpop.f32.mrb[16].mxu0 }
 0x56c   :  { %v1692_v61 = vpop.f32.mrb[17].mxu0 }
 0x56d   :  { %v720_v62 = vpop.f32.mrb[18].mxu0 }
 0x56e   :  { %v1693_v63 = vpop.f32.mrb[19].mxu0 }
 0x584   :  { %v845_v1 = vpop.f32.mrb[20].mxu0 }
 0x585   :  { %v1704_v2 = vpop.f32.mrb[21].mxu0 }
 0x586   :  { %v848_v5 = vpop.f32.mrb[22].mxu0 }
 0x587   :  { %v1705_v6 = vpop.f32.mrb[23].mxu0 }
 0x58c   :  { %v956_v7 = vpop.f32.mrb[24].mxu0 }
 0x58d   :  { %v1802_v9 = vpack.i.bf16 %v956_v7, %v497_v52  ;;  %v1716_v17 = vpop.f32.mrb[25].mxu0  ;;  %v1578_v7 = vld [vmem:[#allocation11] ss:$0 sm:$0xff] }
 0x58e   :  { %v959_v10 = vpop.f32.mrb[26].mxu0 }
 0x58f   :  { %1803 = vrot.lane.b32.xlu1 %v1802_v9, %s2205_s22  ;;  %v1717_v11 = vpop.f32.mrb[27].mxu0 }
 0x590   :  { %v1579_v11 = vld [vmem:[#allocation13] ss:$0 sm:$0xff] }
 0x594   :  { %v1066_v14 = vpop.f32.mrb[28].mxu0 }
 0x595   :  { %v1807_v15 = vpack.i.bf16 %v1066_v14, %v607_v56  ;;  %v1728_v16 = vpop.f32.mrb[29].mxu0 }
 0x596   :  { %v1069_v18 = vpop.f32.mrb[30].mxu0 }
 0x597   :  { %1808 = vrot.lane.b32.xlu1 %v1807_v15, %s2224_s18  ;;  %v1729_v19 = vpop.f32.mrb[31].mxu0  ;;  %v1823_v18 = vld [vmem:[#allocation17] sm:$0xff]  }
 0x598   :  { %v1824_v19 = vld [vmem:[#allocation17 + $0x8] sm:$0xff]  }
 0x59c   :  { %v1176_v20 = vpop.f32.mrb[32].mxu0 }
 0x59d   :  { %v1812_v21 = vpack.i.bf16 %v1176_v20, %v717_v60  ;;  %v1740_v22 = vpop.f32.mrb[33].mxu0  ;;  %v1821_v60 = vld [vmem:[#allocation14] sm:$0xff]  }
 0x59e   :  { %v1179_v23 = vpop.f32.mrb[34].mxu0  ;;  %1751 = vmatpush3.bf16.msra.mxu0 %v1821_v60  ;;  %v1825_v20 = vld [vmem:[#allocation17 + $0x10] sm:$0xff]   ;;  %v1580_v22 = vld [vmem:[#allocation16] ss:$0 sm:$0xff] }
 0x59f   :  { %1813 = vrot.lane.b32.xlu0 %v1812_v21, %s2225_s14  ;;  %v1741_v24 = vpop.f32.mrb[35].mxu0  ;;  %1752 = vmatprep.subr.bf16.mxu0 %v2212_v0  ;;  %v1826_v21 = vld [vmem:[#allocation17 + $0x18] sm:$0xff]  }
 0x601   :  { %v1804_v25 = vpop.permute.xlu1 %1803 }
 0x602   :  { %v1806_v27 = vunpack.i.h.bf16 %v1804_v25  ;;  %v1805_v28 = vunpack.i.l.bf16 %v1804_v25 }
 0x604   :  { %v1194_v32 = vsel %vm284_vm2, %v845_v1, %v1806_v27  ;;  %v735_v33 = vsel %vm284_vm2, %v386_v49, %v1805_v28 }
 0x609   :  { %v1809_v26 = vpop.permute.xlu1 %1808 }
 0x60a   :  { %v1811_v29 = vunpack.i.h.bf16 %v1809_v26  ;;  %v1810_v30 = vunpack.i.l.bf16 %v1809_v26 }
 0x60c   :  { %v1195_v36 = vsel %vm736_vm4, %v1194_v32, %v1811_v29  ;;  %v737_v37 = vsel %vm736_vm4, %v735_v33, %v1810_v30 }
 0x611   :  { %v1814_v31 = vpop.permute.xlu0 %1813 }
 0x612   :  { %v1816_v34 = vunpack.i.h.bf16 %v1814_v31  ;;  %v1815_v35 = vunpack.i.l.bf16 %v1814_v31 }
 0x614   :  { %v1196_v38 = vsel %vm738_vm5, %v1195_v36, %v1816_v34  ;;  %v739_v39 = vsel %vm738_vm5, %v737_v37, %v1815_v35 }
 0x615   :  { %v1197_v40 = vpack.c.bf16 %v1196_v38, %v739_v39 }
 0x617   :  { %1747 = vmatmul.mubr.msk.bf16.vlgmr.msra.gmra.mrb[32].mxu1 %vm232_vm1, %v1197_v40 }
 0x618   :  { %1766 = vmatprep.mubr.msk.bf16.mxu1 %vm2213_vm0, %v2212_v0  ;;  %1759 = vmatpush3.bf16.msra.mxu1 %v1823_v18 }
 0x619   :  { %1760 = vmatprep.subr.bf16.mxu1 %v2212_v0 }
 0x61c   :  { %1761 = vmatpush3.bf16.msra.mxu1 %v1824_v19 }
 0x61d   :  { %1762 = vmatprep.subr.bf16.mxu1 %v2212_v0 }
 0x620   :  { %1763 = vmatpush3.bf16.msra.mxu1 %v1825_v20 }
 0x621   :  { %1764 = vmatprep.subr.bf16.mxu1 %v2212_v0 }
 0x624   :  { %1765 = vmatpush3.bf16.msra.mxu1 %v1826_v21 }
 0x6ea   :  { %v1258_v42 = vpop.f32.mrb[32].mxu1 }
 0x6eb   :  { %v1259_v43 = vadd.f32 %v1574_v41, %v1258_v42  ;;  %v1748_v44 = vpop.f32.mrb[33].mxu1 }
 0x6ec   :  { %v1261_v45 = vpop.f32.mrb[34].mxu1 }
 0x6ed   :  { %v1262_v46 = vadd.f32 %v1574_v41, %v1261_v45  ;;  %v1749_v47 = vpop.f32.mrb[35].mxu1  ;;  %v1265_v48 = vadd.f32 %v1259_v43, %v2474_v3 }
 0x6ee   :  { %v1584_v47 = vld [vmem:[#allocation19] ss:$0 sm:$0xff] }
 0x6ef   :  { %v1269_v49 = vsel %vm232_vm1, %v1265_v48, 0.0  ;;  %v1266_v12 = vadd.f32 %v1262_v46, %v2476_v4  ;;  %v1822_v4 = vld [vmem:[#allocation14 + $0x8] sm:$0xff]  }
 0x6f0   :  { %1270 = vadd.xlane.f32.xlu1 %v1269_v49  ;;  %1753 = vmatpush3.bf16.msra.mxu0 %v1822_v4 }
 0x6f1   :  { %v1272_v50 = vsel %vm232_vm1, %v1266_v12, 0.0 }
 0x6f2   :  { %1273 = vadd.xlane.f32.xlu0 %v1272_v50 }
 0x77d   :  { %v1271_v51 = vpop.xlane.xlu1 %1270 }
 0x77e   :  { %v1276_v52 = vmul.f32 0.03125, %v1271_v51 }
 0x77f   :  { %v1274_v53 = vpop.xlane.xlu0 %1273 }
 0x780   :  { %v1278_v54 = vsub.f32 %v1265_v48, %v1276_v52  ;;  %v1277_v55 = vmul.f32 0.03125, %v1274_v53 }
 0x782   :  { %v1279_v56 = vsub.f32 %v1266_v12, %v1277_v55  ;;  %v1280_v57 = vmul.f32 %v1278_v54, %v1278_v54 }
 0x784   :  { %v1282_v58 = vsel %vm232_vm1, %v1280_v57, 0.0  ;;  %v1281_v59 = vmul.f32 %v1279_v56, %v1279_v56 }
 0x785   :  { %1283 = vadd.xlane.f32.xlu0 %v1282_v58 }
 0x786   :  { %v1285_v3 = vsel %vm232_vm1, %v1281_v59, 0.0 }
 0x787   :  { %1286 = vadd.xlane.f32.xlu1 %v1285_v3 }
 0x812   :  { %v1284_v61 = vpop.xlane.xlu0 %1283 }
 0x813   :  { %v1288_v62 = vmul.f32 0.03125, %v1284_v61 }
 0x814   :  { %v1287_v63 = vpop.xlane.xlu1 %1286 }
 0x815   :  { %v1290_v1 = vadd.f32 1e-12, %v1288_v62  ;;  %v1289_v2 = vmul.f32 0.03125, %v1287_v63 }
 0x817   :  { %1859 = vrsqrt.f32 %v1290_v1  ;;  %v1291_v5 = vadd.f32 1e-12, %v1289_v2 }
 0x819   :  { %1861 = vrsqrt.f32 %v1291_v5 }
 0x821   :  { %v1860_v6 = vpop.eup %1859 }
 0x822   :  { %v1294_v8 = vmul.f32 %v1860_v6, %v1278_v54 }
 0x823   :  { %v1862_v9 = vpop.eup %1861 }
 0x824   :  { %v1302_v17 = vmul.f32 %v1578_v7, %v1294_v8  ;;  %v1295_v10 = vmul.f32 %v1862_v9, %v1279_v56 }
 0x826   :  { %v1303_v13 = vmul.f32 %v1578_v7, %v1295_v10  ;;  %v1310_v14 = vadd.f32 %v1579_v11, %v1302_v17  ;;  %v1590_v10 = vld [vmem:[#allocation20] ss:$0 sm:$0xff] }
 0x828   :  { %v1311_v15 = vadd.f32 %v1579_v11, %v1303_v13 }
 0x82a   :  { %v1312_v16 = vpack.c.bf16 %v1311_v15, %v1310_v14 }
 0x82c   :  { %1755 = vmatmul.mubr.msk.bf16.vlgmr.msra.gmra.mrb[36].mxu0 %vm232_vm1, %v1312_v16 }
 0x8ff   :  { %v1373_v23 = vpop.f32.mrb[36].mxu0 }
 0x900   :  { %v1374_v24 = vadd.f32 %v1580_v22, %v1373_v23  ;;  %v1756_v25 = vpop.f32.mrb[37].mxu0 }
 0x901   :  { %v1376_v26 = vpop.f32.mrb[38].mxu0 }
 0x902   :  { %v1380_v27 = vmul.f32 %v1374_v24, %v1374_v24  ;;  %v1377_v28 = vadd.f32 %v1580_v22, %v1376_v26  ;;  %v1757_v29 = vpop.f32.mrb[39].mxu0 }
 0x904   :  { %v1382_v30 = vmul.f32 %v1380_v27, %v1374_v24  ;;  %v1381_v31 = vmul.f32 %v1377_v28, %v1377_v28 }
 0x906   :  { %v1384_v32 = vmul.f32 0.044715, %v1382_v30  ;;  %v1383_v33 = vmul.f32 %v1381_v31, %v1377_v28 }
 0x908   :  { %v1386_v34 = vadd.f32 %v1384_v32, %v1374_v24  ;;  %v1385_v35 = vmul.f32 0.044715, %v1383_v33 }
 0x90a   :  { %v1388_v36 = vmul.f32 0.7978846, %v1386_v34  ;;  %v1387_v37 = vadd.f32 %v1385_v35, %v1377_v28 }
 0x90c   :  { %1863 = vtanh.f32 %v1388_v36  ;;  %v1389_v0 = vmul.f32 0.7978846, %v1387_v37 }
 0x90e   :  { %1865 = vtanh.f32 %v1389_v0 }
 0x916   :  { %v1864_v38 = vpop.eup %1863 }
 0x917   :  { %v1392_v39 = vadd.f32 1.0, %v1864_v38 }
 0x918   :  { %v1866_v40 = vpop.eup %1865 }
 0x919   :  { %v1394_v41 = vmul.f32 0.5, %v1392_v39  ;;  %v1393_v42 = vadd.f32 1.0, %v1866_v40 }
 0x91b   :  { %v1395_v43 = vmul.f32 0.5, %v1393_v42  ;;  %v1396_v44 = vmul.f32 %v1394_v41, %v1374_v24 }
 0x91d   :  { %v1397_v45 = vmul.f32 %v1395_v43, %v1377_v28 }
 0x91f   :  { %v1398_v46 = vpack.c.bf16 %v1397_v45, %v1396_v44 }
 0x921   :  { %1767 = vmatmul.mubr.msk.bf16.vlgmr.msra.gmra.mrb[36].mxu1 %vm1438_vm6, %v1398_v46 }
 0x9f4   :  { %v1476_v48 = vpop.f32.mrb[36].mxu1 }
 0x9f5   :  { %v1477_v49 = vadd.f32 %v1584_v47, %v1476_v48  ;;  %v1768_v12 = vpop.f32.mrb[37].mxu1 }
 0x9f6   :  { %v1479_v50 = vpop.f32.mrb[38].mxu1 }
 0x9f7   :  { %v1480_v51 = vadd.f32 %v1584_v47, %v1479_v50  ;;  %v1769_v52 = vpop.f32.mrb[39].mxu1  ;;  %v1483_v53 = vadd.f32 %v1477_v49, %v1310_v14  ;;  %v1591_v14 = vld [vmem:[#allocation22] ss:$0 sm:$0xff] }
 0x9f9   :  { %v1487_v54 = vsel %vm232_vm1, %v1483_v53, 0.0  ;;  %v1484_v55 = vadd.f32 %v1480_v51, %v1311_v15 }
 0x9fa   :  { %1488 = vadd.xlane.f32.xlu0 %v1487_v54 }
 0x9fb   :  { %v1490_v56 = vsel %vm232_vm1, %v1484_v55, 0.0 }
 0x9fc   :  { %1491 = vadd.xlane.f32.xlu1 %v1490_v56 }
 0xa87   :  { %v1489_v57 = vpop.xlane.xlu0 %1488 }
 0xa88   :  { %v1493_v58 = vmul.f32 0.03125, %v1489_v57 }
 0xa89   :  { %v1492_v59 = vpop.xlane.xlu1 %1491 }
 0xa8a   :  { %v1495_v3 = vsub.f32 %v1483_v53, %v1493_v58  ;;  %v1494_v60 = vmul.f32 0.03125, %v1492_v59 }
 0xa8c   :  { %v1496_v4 = vsub.f32 %v1484_v55, %v1494_v60  ;;  %v1497_v61 = vmul.f32 %v1495_v3, %v1495_v3 }
 0xa8e   :  { %v1499_v62 = vsel %vm232_vm1, %v1497_v61, 0.0  ;;  %v1498_v63 = vmul.f32 %v1496_v4, %v1496_v4 }
 0xa8f   :  { %1500 = vadd.xlane.f32.xlu0 %v1499_v62 }
 0xa90   :  { %v1502_v1 = vsel %vm232_vm1, %v1498_v63, 0.0 }
 0xa91   :  { %1503 = vadd.xlane.f32.xlu1 %v1502_v1 }
 0xb1c   :  { %v1501_v2 = vpop.xlane.xlu0 %1500 }
 0xb1d   :  { %v1505_v5 = vmul.f32 0.03125, %v1501_v2 }
 0xb1e   :  { %v1504_v6 = vpop.xlane.xlu1 %1503 }
 0xb1f   :  { %v1507_v7 = vadd.f32 1e-12, %v1505_v5  ;;  %v1506_v8 = vmul.f32 0.03125, %v1504_v6 }
 0xb21   :  { %1867 = vrsqrt.f32 %v1507_v7  ;;  %v1508_v9 = vadd.f32 1e-12, %v1506_v8 }
 0xb23   :  { %1869 = vrsqrt.f32 %v1508_v9 }
 0xb2b   :  { %v1868_v17 = vpop.eup %1867 }
 0xb2c   :  { %v1511_v11 = vmul.f32 %v1868_v17, %v1495_v3 }
 0xb2d   :  { %v1870_v13 = vpop.eup %1869 }
 0xb2e   :  { %v1512_v15 = vmul.f32 %v1870_v13, %v1496_v4  ;;  %v1519_v16 = vmul.f32 %v1590_v10, %v1511_v11 }
 0xb30   :  { %v1520_v18 = vmul.f32 %v1590_v10, %v1512_v15  ;;  %v1527_v19 = vadd.f32 %v1591_v14, %v1519_v16 }
 0xb32   :  { %v1528_v20 = vadd.f32 %v1591_v14, %v1520_v18  ;;  %1529 = vst.msk [vmem:[#allocation23] sm:$0xff] %vm232_vm1, %v1527_v19 }
 0xb34   :  { %1530 = vst.msk [vmem:[#allocation23 + $0x8] sm:$0xff] %vm232_vm1, %v1528_v20 }
 0xb35   :  { %2168 = shalt.err (!%p2165_p10)
}
 0xb36   :  { %s2169_s28 = scalar_lea.hbm %s2702_s13, 256 }
 0xb37   :  { %p2170_p11 = scmp.ne.s32.totalorder %s2702_s13, %s2169_s28  ;;  %p2173_p12 = scmp.lt.u32.totalorder %s2169_s28, %s2702_s13 }
 0xb39   :  { %p2175_p13 = pnand %p2173_p12, %p2170_p11 }
 0xb3b   :  { %2178 = shalt.err (!%p2175_p13)
}
 0xb3c   :  { %1542 = dma.vmem_to_hbm [thread:$0]  %s1537_s8, 256, %s2702_s13, [#allocation4], %s2204_s11, %s2204_s11, %s2205_s22  }
 0xb3d   :  { %2193 = dma.done.wait [#allocation4], 256  }
 0xb3e   :  { %2194 = vsyncadd [#allocation4], 4294967040 }
 0xb3f   :  { %1546 = vsyncpa [#allocation3], 1 }
 0xb40   :  { %1547 = vsyncpa [#allocation6], 1 }
 0xb41   :  { %1548 = vsyncpa [#allocation9], 1 }
 0xb42   :  { %1549 = vsyncpa [#allocation12], 1 }
 0xb43   :  { %1550 = vsyncpa [#allocation15], 1 }
 0xb44   :  { %1551 = vsyncpa [#allocation18], 1 }
 0xb45   :  { %1552 = vsyncpa [#allocation21], 1 }
 0xb46   :  { %1553 = vsyncpa [#allocation4], 1 }

// kernel: encoder_projector_qformer.7
= control target key start
LH: loop header
LB: loop body
LE: loop exit
PB: predicated region body
PF: predicated region fallthrough
CT: control target
= control target key end

     0   :  { %s4722_s0 = inlined_call_operand.hbm [shape: f32[16,32], index: 0, kind: input, shape index: {}]   ;;  %s4723_s1 = inlined_call_operand.hbm [shape: bf16[2,16,64], index: 1, kind: input, shape index: {}]   ;;  %s4724_s2 = inlined_call_operand.hbm [shape: f32[2,1,16], index: 2, kind: input, shape index: {}]   ;;  %s4725_s3 = inlined_call_operand.hbm [shape: bf16[32,96], index: 3, kind: input, shape index: {}]   ;;  %s4726_s4 = inlined_call_operand.hbm [shape: f32[1,96], index: 4, kind: input, shape index: {}]   ;;  %s4727_s5 = inlined_call_operand.hbm [shape: bf16[32,32], index: 5, kind: input, shape index: {}]   ;;  %s4728_s6 = inlined_call_operand.hbm [shape: f32[1,32], index: 6, kind: input, shape index: {}]   ;;  %s4729_s7 = inlined_call_operand.hbm [shape: f32[1,32], index: 7, kind: input, shape index: {}]   ;;  %s4730_s8 = inlined_call_operand.hbm [shape: f32[1,32], index: 8, kind: input, shape index: {}]   ;;  %s4731_s9 = inlined_call_operand.hbm [shape: bf16[32,32], index: 9, kind: input, shape index: {}]   ;;  %s4732_s10 = inlined_call_operand.hbm [shape: f32[1,32], index: 10, kind: input, shape index: {}]   ;;  %s4733_s11 = inlined_call_operand.hbm [shape: bf16[32,32], index: 11, kind: input, shape index: {}]   ;;  %s4734_s12 = inlined_call_operand.hbm [shape: f32[1,32], index: 12, kind: input, shape index: {}]   ;;  %s4735_s13 = inlined_call_operand.hbm [shape: f32[1,32], index: 13, kind: input, shape index: {}]   ;;  %s4736_s14 = inlined_call_operand.hbm [shape: f32[1,32], index: 14, kind: input, shape index: {}]   ;;  %s4737_s15 = inlined_call_operand.hbm [shape: bf16[32,64], index: 15, kind: input, shape index: {}]   ;;  %s4738_s16 = inlined_call_operand.hbm [shape: f32[1,64], index: 16, kind: input, shape index: {}]   ;;  %s4739_s17 = inlined_call_operand.hbm [shape: bf16[64,32], index: 17, kind: input, shape index: {}]   ;;  %s4740_s18 = inlined_call_operand.hbm [shape: f32[1,32], index: 18, kind: input, shape index: {}]   ;;  %s4741_s19 = inlined_call_operand.hbm [shape: f32[1,32], index: 19, kind: input, shape index: {}]   ;;  %s4742_s20 = inlined_call_operand.hbm [shape: f32[1,32], index: 20, kind: input, shape index: {}]   ;;  %s4743_s21 = inlined_call_operand.hbm [shape: f32[16,32], index: 21, kind: output, shape index: {}]  }
   0x1   :  { %4753 = sst [smem:[#allocation48_spill]] %s4722_s0 }
   0x2   :  { %4754 = sst [smem:[#allocation49_spill]] %s4723_s1 }
   0x3   :  { %4755 = sst [smem:[#allocation50_spill]] %s4724_s2 }
   0x4   :  { %4756 = sst [smem:[#allocation51_spill]] %s4725_s3 }
   0x5   :  { %4757 = sst [smem:[#allocation52_spill]] %s4726_s4 }
   0x6   :  { %4758 = sst [smem:[#allocation53_spill]] %s4727_s5 }
   0x7   :  { %4759 = sst [smem:[#allocation54_spill]] %s4740_s18 }
   0x8   :  { %4760 = sst [smem:[#allocation55_spill]] %s4742_s20 }
   0x9   :  { %4761 = sst [smem:[#allocation56_spill]] %s4743_s21 }
   0xa   :  { %26 = vsyncpa [#allocation3], 0 }
   0xb   :  { %27 = vsyncpa [#allocation6], 0 }
   0xc   :  { %28 = vsyncpa [#allocation9], 0 }
   0xd   :  { %29 = vsyncpa [#allocation12], 0 }
   0xe   :  { %30 = vsyncpa [#allocation15], 0 }
   0xf   :  { %31 = vsyncpa [#allocation18], 0 }
  0x10   :  { %32 = vsyncpa [#allocation21], 0 }
  0x11   :  { %33 = vsyncpa [#allocation24], 0 }
  0x12   :  { %34 = vsyncpa [#allocation27], 0 }
  0x13   :  { %35 = vsyncpa [#allocation30], 0 }
  0x14   :  { %36 = vsyncpa [#allocation33], 0 }
  0x15   :  { %37 = vsyncpa [#allocation4], 0  ;;  %s3857_s2 = smov [#allocation5]   ;;  %s4762_s3 = sld [smem:[#allocation49_spill]] }
  0x16   :  { %s55_s25 = sshll.u32 %s3857_s2, 4  ;;  %s56_s25 = int_to_ptr.vmem [resolvable:$true] %s55_s25 }
  0x1b   :  { %s3349_s28 = scalar_lea.hbm %s4762_s3, 256 }
  0x1c   :  { %p3350_p0 = scmp.ne.s32.totalorder %s4762_s3, %s3349_s28  ;;  %p3353_p1 = scmp.lt.u32.totalorder %s3349_s28, %s4762_s3 }
  0x1e   :  { %p3355_p2 = pnand %p3353_p1, %p3350_p0 }
  0x20   :  { %3358 = shalt.err (!%p3355_p2)
}
  0x21   :  { %s3359_s5 = scalar_lea.vmem %s56_s25, 256  ;;  %p3364_p4 = scmp.lt.s32.totalorder %s56_s25, %s56_s25 }
  0x22   :  { %p3360_p3 = scmp.ne.s32.totalorder %s56_s25, %s3359_s5  ;;  %p3365_p5 = scmp.lt.s32.totalorder %s3359_s5, %s3359_s5 }
  0x24   :  { %p3366_p6 = por %p3365_p5, %p3364_p4 }
  0x26   :  { %p3367_p7 = pnand %p3366_p6, %p3360_p3 }
  0x28   :  { %3370 = shalt.err (!%p3367_p7)
}
  0x29   :  { %s3858_s22 = smov 64   ;;  %s3859_s23 = smov 4  }
  0x2a   :  { %61 = dma.hbm_to_vmem [thread:$0]  %s4762_s3, 256, %s56_s25, [#allocation6], %s3858_s22, %s3858_s22, %s3859_s23  }
  0x2b   :  { %s3860_s2 = smov [#allocation8]   ;;  %s3861_s27 = smov [#allocation11]  }
  0x2c   :  { %s79_s26 = sshll.u32 %s3860_s2, 4  ;;  %s101_s28 = sshll.u32 %s3861_s27, 4  ;;  %s80_s26 = int_to_ptr.vmem [resolvable:$true] %s79_s26  ;;  %s102_s28 = int_to_ptr.vmem [resolvable:$true] %s101_s28 }
  0x2d   :  { %s4763_s4 = sld [smem:[#allocation51_spill]] }
  0x33   :  { %s3371_s30 = scalar_lea.hbm %s4763_s4, 256 }
  0x34   :  { %p3372_p8 = scmp.ne.s32.totalorder %s4763_s4, %s3371_s30  ;;  %p3375_p9 = scmp.lt.u32.totalorder %s3371_s30, %s4763_s4 }
  0x36   :  { %p3377_p10 = pnand %p3375_p9, %p3372_p8 }
  0x38   :  { %3380 = shalt.err (!%p3377_p10)
}
  0x39   :  { %s3381_s25 = scalar_lea.vmem %s80_s26, 256  ;;  %p3386_p12 = scmp.lt.s32.totalorder %s80_s26, %s80_s26 }
  0x3a   :  { %p3382_p11 = scmp.ne.s32.totalorder %s80_s26, %s3381_s25  ;;  %p3387_p13 = scmp.lt.s32.totalorder %s3381_s25, %s3381_s25 }
  0x3c   :  { %p3388_p0 = por %p3387_p13, %p3386_p12 }
  0x3e   :  { %p3389_p1 = pnand %p3388_p0, %p3382_p11 }
  0x40   :  { %3392 = shalt.err (!%p3389_p1)
}
  0x41   :  { %85 = dma.hbm_to_vmem [thread:$0]  %s4763_s4, 256, %s80_s26, [#allocation9], %s3858_s22, %s3858_s22, %s3859_s23  }
  0x42   :  { %s4764_s20 = sld [smem:[#allocation53_spill]] }
  0x48   :  { %s3393_s24 = scalar_lea.hbm %s4764_s20, 256 }
  0x49   :  { %p3394_p2 = scmp.ne.s32.totalorder %s4764_s20, %s3393_s24  ;;  %p3397_p3 = scmp.lt.u32.totalorder %s3393_s24, %s4764_s20 }
  0x4b   :  { %p3399_p4 = pnand %p3397_p3, %p3394_p2 }
  0x4d   :  { %3402 = shalt.err (!%p3399_p4)
}
  0x4e   :  { %s3403_s30 = scalar_lea.vmem %s102_s28, 256  ;;  %p3408_p6 = scmp.lt.s32.totalorder %s102_s28, %s102_s28 }
  0x4f   :  { %p3404_p5 = scmp.ne.s32.totalorder %s102_s28, %s3403_s30  ;;  %p3409_p7 = scmp.lt.s32.totalorder %s3403_s30, %s3403_s30 }
  0x51   :  { %p3410_p8 = por %p3409_p7, %p3408_p6 }
  0x53   :  { %p3411_p9 = pnand %p3410_p8, %p3404_p5 }
  0x55   :  { %3414 = shalt.err (!%p3411_p9)
}
  0x56   :  { %107 = dma.hbm_to_vmem [thread:$0]  %s4764_s20, 256, %s102_s28, [#allocation12], %s3858_s22, %s3858_s22, %s3859_s23  }
  0x57   :  { %s3862_s5 = smov [#allocation14]   ;;  %s3863_s3 = smov [#allocation17]  }
  0x58   :  { %s124_s25 = sshll.u32 %s3862_s5, 4  ;;  %s143_s1 = sshll.u32 %s3863_s3, 4  ;;  %s125_s25 = int_to_ptr.vmem [resolvable:$true] %s124_s25  ;;  %s144_s1 = int_to_ptr.vmem [resolvable:$true] %s143_s1 }
  0x59   :  { %s3415_s24 = scalar_lea.hbm %s4729_s7, 16 }
  0x5a   :  { %p3416_p10 = scmp.ne.s32.totalorder %s4729_s7, %s3415_s24  ;;  %p3419_p11 = scmp.lt.u32.totalorder %s3415_s24, %s4729_s7 }
  0x5c   :  { %p3421_p12 = pnand %p3419_p11, %p3416_p10 }
  0x5e   :  { %3424 = shalt.err (!%p3421_p12)
}
  0x5f   :  { %s3425_s28 = scalar_lea.vmem %s125_s25, 16  ;;  %s3429_s20 = scalar_lea.vmem %s125_s25, 32 }
  0x60   :  { %p3426_p13 = scmp.ne.s32.totalorder %s125_s25, %s3425_s28  ;;  %p3430_p0 = scmp.lt.s32.totalorder %s125_s25, %s125_s25 }
  0x61   :  { %p3431_p1 = scmp.lt.s32.totalorder %s3429_s20, %s3425_s28 }
  0x63   :  { %p3432_p2 = por %p3431_p1, %p3430_p0 }
  0x65   :  { %p3433_p3 = pnand %p3432_p2, %p3426_p13 }
  0x67   :  { %3436 = shalt.err (!%p3433_p3)
}
  0x68   :  { %127 = dma.hbm_to_vmem [thread:$0]  %s4729_s7, 16, %s125_s25, [#allocation15]  }
  0x69   :  { %s3437_s3 = scalar_lea.hbm %s4731_s9, 256 }
  0x6a   :  { %p3438_p4 = scmp.ne.s32.totalorder %s4731_s9, %s3437_s3  ;;  %p3441_p5 = scmp.lt.u32.totalorder %s3437_s3, %s4731_s9 }
  0x6c   :  { %p3443_p6 = pnand %p3441_p5, %p3438_p4 }
  0x6e   :  { %3446 = shalt.err (!%p3443_p6)
}
  0x6f   :  { %s3447_s27 = scalar_lea.vmem %s144_s1, 256  ;;  %p3452_p8 = scmp.lt.s32.totalorder %s144_s1, %s144_s1 }
  0x70   :  { %p3448_p7 = scmp.ne.s32.totalorder %s144_s1, %s3447_s27  ;;  %p3453_p9 = scmp.lt.s32.totalorder %s3447_s27, %s3447_s27 }
  0x72   :  { %p3454_p10 = por %p3453_p9, %p3452_p8 }
  0x74   :  { %p3455_p11 = pnand %p3454_p10, %p3448_p7 }
  0x76   :  { %3458 = shalt.err (!%p3455_p11)
}
  0x77   :  { %149 = dma.hbm_to_vmem [thread:$0]  %s4731_s9, 256, %s144_s1, [#allocation18], %s3858_s22, %s3858_s22, %s3859_s23  }
  0x78   :  { %s3864_s29 = smov [#allocation20]   ;;  %s3865_s28 = smov [#allocation23]  }
  0x79   :  { %s165_s0 = sshll.u32 %s3864_s29, 4  ;;  %s188_s20 = sshll.u32 %s3865_s28, 4  ;;  %s166_s0 = int_to_ptr.vmem [resolvable:$true] %s165_s0  ;;  %s189_s20 = int_to_ptr.vmem [resolvable:$true] %s188_s20 }
  0x7a   :  { %s3459_s4 = scalar_lea.hbm %s4733_s11, 256 }
  0x7b   :  { %p3460_p12 = scmp.ne.s32.totalorder %s4733_s11, %s3459_s4  ;;  %p3463_p13 = scmp.lt.u32.totalorder %s3459_s4, %s4733_s11 }
  0x7d   :  { %p3465_p0 = pnand %p3463_p13, %p3460_p12 }
  0x7f   :  { %3468 = shalt.err (!%p3465_p0)
}
  0x80   :  { %s3469_s9 = scalar_lea.vmem %s166_s0, 256  ;;  %p3474_p2 = scmp.lt.s32.totalorder %s166_s0, %s166_s0 }
  0x81   :  { %p3470_p1 = scmp.ne.s32.totalorder %s166_s0, %s3469_s9  ;;  %p3475_p3 = scmp.lt.s32.totalorder %s3469_s9, %s3469_s9 }
  0x83   :  { %p3476_p4 = por %p3475_p3, %p3474_p2 }
  0x85   :  { %p3477_p5 = pnand %p3476_p4, %p3470_p1 }
  0x87   :  { %3480 = shalt.err (!%p3477_p5)
}
  0x88   :  { %171 = dma.hbm_to_vmem [thread:$0]  %s4733_s11, 256, %s166_s0, [#allocation21], %s3858_s22, %s3858_s22, %s3859_s23  }
  0x89   :  { %s3481_s7 = scalar_lea.hbm %s4735_s13, 16 }
  0x8a   :  { %p3482_p6 = scmp.ne.s32.totalorder %s4735_s13, %s3481_s7  ;;  %p3485_p7 = scmp.lt.u32.totalorder %s3481_s7, %s4735_s13 }
  0x8c   :  { %p3487_p8 = pnand %p3485_p7, %p3482_p6 }
  0x8e   :  { %3490 = shalt.err (!%p3487_p8)
}
  0x8f   :  { %s3491_s26 = scalar_lea.vmem %s189_s20, 16  ;;  %s3495_s4 = scalar_lea.vmem %s189_s20, 32 }
  0x90   :  { %p3492_p9 = scmp.ne.s32.totalorder %s189_s20, %s3491_s26  ;;  %p3496_p10 = scmp.lt.s32.totalorder %s189_s20, %s189_s20 }
  0x91   :  { %p3497_p11 = scmp.lt.s32.totalorder %s3495_s4, %s3491_s26 }
  0x93   :  { %p3498_p12 = por %p3497_p11, %p3496_p10 }
  0x95   :  { %p3499_p13 = pnand %p3498_p12, %p3492_p9 }
  0x97   :  { %3502 = shalt.err (!%p3499_p13)
}
  0x98   :  { %191 = dma.hbm_to_vmem [thread:$0]  %s4735_s13, 16, %s189_s20, [#allocation24]  }
  0x99   :  { %s3866_s5 = smov [#allocation26]   ;;  %s3867_s21 = smov [#allocation29]  }
  0x9a   :  { %s207_s3 = sshll.u32 %s3866_s5, 4  ;;  %s229_s18 = sshll.u32 %s3867_s21, 4  ;;  %s208_s3 = int_to_ptr.vmem [resolvable:$true] %s207_s3  ;;  %s230_s18 = int_to_ptr.vmem [resolvable:$true] %s229_s18 }
  0x9b   :  { %s3503_s24 = scalar_lea.hbm %s4737_s15, 256 }
  0x9c   :  { %p3504_p0 = scmp.ne.s32.totalorder %s4737_s15, %s3503_s24  ;;  %p3507_p1 = scmp.lt.u32.totalorder %s3503_s24, %s4737_s15 }
  0x9e   :  { %p3509_p2 = pnand %p3507_p1, %p3504_p0 }
  0xa0   :  { %3512 = shalt.err (!%p3509_p2)
}
  0xa1   :  { %s3513_s13 = scalar_lea.vmem %s208_s3, 256  ;;  %p3518_p4 = scmp.lt.s32.totalorder %s208_s3, %s208_s3 }
  0xa2   :  { %p3514_p3 = scmp.ne.s32.totalorder %s208_s3, %s3513_s13  ;;  %p3519_p5 = scmp.lt.s32.totalorder %s3513_s13, %s3513_s13 }
  0xa4   :  { %p3520_p6 = por %p3519_p5, %p3518_p4 }
  0xa6   :  { %p3521_p7 = pnand %p3520_p6, %p3514_p3 }
  0xa8   :  { %3524 = shalt.err (!%p3521_p7)
}
  0xa9   :  { %213 = dma.hbm_to_vmem [thread:$0]  %s4737_s15, 256, %s208_s3, [#allocation27], %s3858_s22, %s3858_s22, %s3859_s23  }
  0xaa   :  { %s3525_s26 = scalar_lea.hbm %s4739_s17, 512 }
  0xab   :  { %p3526_p8 = scmp.ne.s32.totalorder %s4739_s17, %s3525_s26  ;;  %p3529_p9 = scmp.lt.u32.totalorder %s3525_s26, %s4739_s17 }
  0xad   :  { %p3531_p10 = pnand %p3529_p9, %p3526_p8 }
  0xaf   :  { %3534 = shalt.err (!%p3531_p10)
}
  0xb0   :  { %s3535_s21 = scalar_lea.vmem %s230_s18, 512  ;;  %p3540_p12 = scmp.lt.s32.totalorder %s230_s18, %s230_s18 }
  0xb1   :  { %p3536_p11 = scmp.ne.s32.totalorder %s230_s18, %s3535_s21  ;;  %p3541_p13 = scmp.lt.s32.totalorder %s3535_s21, %s3535_s21 }
  0xb3   :  { %p3542_p0 = por %p3541_p13, %p3540_p12 }
  0xb5   :  { %p3543_p1 = pnand %p3542_p0, %p3536_p11 }
  0xb7   :  { %3546 = shalt.err (!%p3543_p1)
}
  0xb8   :  { %235 = dma.hbm_to_vmem [thread:$0]  %s4739_s17, 512, %s230_s18, [#allocation30], %s3858_s22, %s3858_s22, %s3859_s23  }
  0xb9   :  { %s3868_s9 = smov [#allocation32]   ;;  %s3869_s24 = smov [#allocation2]  }
  0xba   :  { %s252_s1 = sshll.u32 %s3868_s9, 4  ;;  %s43_s2 = sshll.u32 %s3869_s24, 4  ;;  %s253_s1 = int_to_ptr.vmem [resolvable:$true] %s252_s1  ;;  %s44_s2 = int_to_ptr.vmem [resolvable:$true] %s43_s2 }
  0xbb   :  { %s3547_s25 = scalar_lea.hbm %s4741_s19, 16 }
  0xbc   :  { %p3548_p2 = scmp.ne.s32.totalorder %s4741_s19, %s3547_s25  ;;  %p3551_p3 = scmp.lt.u32.totalorder %s3547_s25, %s4741_s19 }
  0xbe   :  { %p3553_p4 = pnand %p3551_p3, %p3548_p2 }
  0xc0   :  { %3556 = shalt.err (!%p3553_p4)
}
  0xc1   :  { %s3557_s17 = scalar_lea.vmem %s253_s1, 16  ;;  %s3561_s23 = scalar_lea.vmem %s253_s1, 32 }
  0xc2   :  { %p3558_p5 = scmp.ne.s32.totalorder %s253_s1, %s3557_s17  ;;  %p3562_p6 = scmp.lt.s32.totalorder %s253_s1, %s253_s1 }
  0xc3   :  { %p3563_p7 = scmp.lt.s32.totalorder %s3561_s23, %s3557_s17 }
  0xc5   :  { %p3564_p8 = por %p3563_p7, %p3562_p6 }
  0xc7   :  { %p3565_p9 = pnand %p3564_p8, %p3558_p5 }
  0xc9   :  { %3568 = shalt.err (!%p3565_p9)
}
  0xca   :  { %255 = dma.hbm_to_vmem [thread:$0]  %s4741_s19, 16, %s253_s1, [#allocation33]  }
  0xcb   :  { %s4765_s11 = sld [smem:[#allocation48_spill]] }
  0xd1   :  { %s3569_s0 = scalar_lea.hbm %s4765_s11, 256 }
  0xd2   :  { %p3570_p10 = scmp.ne.s32.totalorder %s4765_s11, %s3569_s0  ;;  %p3573_p11 = scmp.lt.u32.totalorder %s3569_s0, %s4765_s11 }
  0xd4   :  { %p3575_p12 = pnand %p3573_p11, %p3570_p10 }
  0xd6   :  { %3578 = shalt.err (!%p3575_p12)
}
  0xd7   :  { %s3579_s9 = scalar_lea.vmem %s44_s2, 256  ;;  %p3584_p0 = scmp.lt.s32.totalorder %s44_s2, %s44_s2 }
  0xd8   :  { %p3580_p13 = scmp.ne.s32.totalorder %s44_s2, %s3579_s9  ;;  %p3585_p1 = scmp.lt.s32.totalorder %s3579_s9, %s3579_s9 }
  0xda   :  { %p3586_p2 = por %p3585_p1, %p3584_p0 }
  0xdc   :  { %p3587_p3 = pnand %p3586_p2, %p3580_p13 }
  0xde   :  { %3590 = shalt.err (!%p3587_p3)
}
  0xdf   :  { %s3870_s19 = smov 128   ;;  %s3871_s1 = smov 8  }
  0xe0   :  { %49 = dma.hbm_to_vmem [thread:$0]  %s4765_s11, 256, %s44_s2, [#allocation3], %s3870_s19, %s3870_s19, %s3871_s1  }
  0xe1   :  { %s3872_s7 = smov [#allocation7]   ;;  %s4766_s29 = sld [smem:[#allocation50_spill]] }
  0xe2   :  { %s67_s25 = sshll.u32 %s3872_s7, 4  ;;  %s68_s25 = int_to_ptr.vmem [resolvable:$true] %s67_s25 }
  0xe7   :  { %s3591_s28 = scalar_lea.hbm %s4766_s29, 32 }
  0xe8   :  { %p3592_p4 = scmp.ne.s32.totalorder %s4766_s29, %s3591_s28  ;;  %p3595_p5 = scmp.lt.u32.totalorder %s3591_s28, %s4766_s29 }
  0xea   :  { %p3597_p6 = pnand %p3595_p5, %p3592_p4 }
  0xec   :  { %3600 = shalt.err (!%p3597_p6)
}
  0xed   :  { %s3601_s26 = scalar_lea.vmem %s68_s25, 32  ;;  %p3606_p8 = scmp.lt.s32.totalorder %s68_s25, %s68_s25 }
  0xee   :  { %p3602_p7 = scmp.ne.s32.totalorder %s68_s25, %s3601_s26  ;;  %p3607_p9 = scmp.lt.s32.totalorder %s3601_s26, %s3601_s26 }
  0xf0   :  { %p3608_p10 = por %p3607_p9, %p3606_p8 }
  0xf2   :  { %p3609_p11 = pnand %p3608_p10, %p3602_p7 }
  0xf4   :  { %3612 = shalt.err (!%p3609_p11)
}
  0xf5   :  { %s3873_s2 = smov 16   ;;  %s3874_s4 = smov 1  }
  0xf6   :  { %73 = dma.hbm_to_vmem [thread:$0]  %s4766_s29, 32, %s68_s25, [#allocation6], %s3873_s2, %s3873_s2, %s3874_s4  }
  0xf7   :  { %s3875_s5 = smov [#allocation10]   ;;  %s3876_s15 = smov [#allocation13]  }
  0xf8   :  { %s92_s21 = sshll.u32 %s3875_s5, 4  ;;  %s114_s3 = sshll.u32 %s3876_s15, 4  ;;  %s93_s21 = int_to_ptr.vmem [resolvable:$true] %s92_s21  ;;  %s115_s3 = int_to_ptr.vmem [resolvable:$true] %s114_s3 }
  0xf9   :  { %s4767_s27 = sld [smem:[#allocation52_spill]] }
  0xff   :  { %s3613_s7 = scalar_lea.hbm %s4767_s27, 16 }
 0x100   :  { %p3614_p12 = scmp.ne.s32.totalorder %s4767_s27, %s3613_s7  ;;  %p3617_p13 = scmp.lt.u32.totalorder %s3613_s7, %s4767_s27 }
 0x102   :  { %p3619_p0 = pnand %p3617_p13, %p3614_p12 }
 0x104   :  { %3622 = shalt.err (!%p3619_p0)
}
 0x105   :  { %s3623_s25 = scalar_lea.vmem %s93_s21, 16  ;;  %s3627_s29 = scalar_lea.vmem %s93_s21, 32 }
 0x106   :  { %p3624_p1 = scmp.ne.s32.totalorder %s93_s21, %s3623_s25  ;;  %p3628_p2 = scmp.lt.s32.totalorder %s93_s21, %s93_s21 }
 0x107   :  { %p3629_p3 = scmp.lt.s32.totalorder %s3627_s29, %s3623_s25 }
 0x109   :  { %p3630_p4 = por %p3629_p3, %p3628_p2 }
 0x10b   :  { %p3631_p5 = pnand %p3630_p4, %p3624_p1 }
 0x10d   :  { %3634 = shalt.err (!%p3631_p5)
}
 0x10e   :  { %95 = dma.hbm_to_vmem [thread:$0]  %s4767_s27, 16, %s93_s21, [#allocation9]  }
 0x10f   :  { %s3635_s4 = scalar_lea.hbm %s4728_s6, 16 }
 0x110   :  { %p3636_p6 = scmp.ne.s32.totalorder %s4728_s6, %s3635_s4  ;;  %p3639_p7 = scmp.lt.u32.totalorder %s3635_s4, %s4728_s6 }
 0x112   :  { %p3641_p8 = pnand %p3639_p7, %p3636_p6 }
 0x114   :  { %3644 = shalt.err (!%p3641_p8)
}
 0x115   :  { %s3645_s9 = scalar_lea.vmem %s115_s3, 16  ;;  %s3649_s24 = scalar_lea.vmem %s115_s3, 32 }
 0x116   :  { %p3646_p9 = scmp.ne.s32.totalorder %s115_s3, %s3645_s9  ;;  %p3650_p10 = scmp.lt.s32.totalorder %s115_s3, %s115_s3 }
 0x117   :  { %p3651_p11 = scmp.lt.s32.totalorder %s3649_s24, %s3645_s9 }
 0x119   :  { %p3652_p12 = por %p3651_p11, %p3650_p10 }
 0x11b   :  { %p3653_p13 = pnand %p3652_p12, %p3646_p9 }
 0x11d   :  { %3656 = shalt.err (!%p3653_p13)
}
 0x11e   :  { %117 = dma.hbm_to_vmem [thread:$0]  %s4728_s6, 16, %s115_s3, [#allocation12]  }
 0x11f   :  { %s3877_s7 = smov [#allocation16]   ;;  %s3878_s20 = smov [#allocation19]  }
 0x120   :  { %s134_s13 = sshll.u32 %s3877_s7, 4  ;;  %s156_s28 = sshll.u32 %s3878_s20, 4  ;;  %s135_s13 = int_to_ptr.vmem [resolvable:$true] %s134_s13  ;;  %s157_s28 = int_to_ptr.vmem [resolvable:$true] %s156_s28 }
 0x121   :  { %s3657_s29 = scalar_lea.hbm %s4730_s8, 16 }
 0x122   :  { %p3658_p0 = scmp.ne.s32.totalorder %s4730_s8, %s3657_s29  ;;  %p3661_p1 = scmp.lt.u32.totalorder %s3657_s29, %s4730_s8 }
 0x124   :  { %p3663_p2 = pnand %p3661_p1, %p3658_p0 }
 0x126   :  { %3666 = shalt.err (!%p3663_p2)
}
 0x127   :  { %s3667_s6 = scalar_lea.vmem %s135_s13, 16  ;;  %s3671_s3 = scalar_lea.vmem %s135_s13, 32 }
 0x128   :  { %p3668_p3 = scmp.ne.s32.totalorder %s135_s13, %s3667_s6  ;;  %p3672_p4 = scmp.lt.s32.totalorder %s135_s13, %s135_s13 }
 0x129   :  { %p3673_p5 = scmp.lt.s32.totalorder %s3671_s3, %s3667_s6 }
 0x12b   :  { %p3674_p6 = por %p3673_p5, %p3672_p4 }
 0x12d   :  { %p3675_p7 = pnand %p3674_p6, %p3668_p3 }
 0x12f   :  { %3678 = shalt.err (!%p3675_p7)
}
 0x130   :  { %137 = dma.hbm_to_vmem [thread:$0]  %s4730_s8, 16, %s135_s13, [#allocation15]  }
 0x131   :  { %s3679_s15 = scalar_lea.hbm %s4732_s10, 16 }
 0x132   :  { %p3680_p8 = scmp.ne.s32.totalorder %s4732_s10, %s3679_s15  ;;  %p3683_p9 = scmp.lt.u32.totalorder %s3679_s15, %s4732_s10 }
 0x134   :  { %p3685_p10 = pnand %p3683_p9, %p3680_p8 }
 0x136   :  { %3688 = shalt.err (!%p3685_p10)
}
 0x137   :  { %s3689_s7 = scalar_lea.vmem %s157_s28, 16  ;;  %s3693_s20 = scalar_lea.vmem %s157_s28, 32 }
 0x138   :  { %p3690_p11 = scmp.ne.s32.totalorder %s157_s28, %s3689_s7  ;;  %p3694_p12 = scmp.lt.s32.totalorder %s157_s28, %s157_s28 }
 0x139   :  { %p3695_p13 = scmp.lt.s32.totalorder %s3693_s20, %s3689_s7 }
 0x13b   :  { %p3696_p0 = por %p3695_p13, %p3694_p12 }
 0x13d   :  { %p3697_p1 = pnand %p3696_p0, %p3690_p11 }
 0x13f   :  { %3700 = shalt.err (!%p3697_p1)
}
 0x140   :  { %159 = dma.hbm_to_vmem [thread:$0]  %s4732_s10, 16, %s157_s28, [#allocation18]  }
 0x141   :  { %s3879_s17 = smov [#allocation22]   ;;  %s3880_s29 = smov [#allocation25]  }
 0x142   :  { %s178_s25 = sshll.u32 %s3879_s17, 4  ;;  %s198_s23 = sshll.u32 %s3880_s29, 4  ;;  %s179_s25 = int_to_ptr.vmem [resolvable:$true] %s178_s25  ;;  %s199_s23 = int_to_ptr.vmem [resolvable:$true] %s198_s23 }
 0x143   :  { %s3701_s26 = scalar_lea.hbm %s4734_s12, 16 }
 0x144   :  { %p3702_p2 = scmp.ne.s32.totalorder %s4734_s12, %s3701_s26  ;;  %p3705_p3 = scmp.lt.u32.totalorder %s3701_s26, %s4734_s12 }
 0x146   :  { %p3707_p4 = pnand %p3705_p3, %p3702_p2 }
 0x148   :  { %3710 = shalt.err (!%p3707_p4)
}
 0x149   :  { %s3711_s10 = scalar_lea.vmem %s179_s25, 16  ;;  %s3715_s28 = scalar_lea.vmem %s179_s25, 32 }
 0x14a   :  { %p3712_p5 = scmp.ne.s32.totalorder %s179_s25, %s3711_s10  ;;  %p3716_p6 = scmp.lt.s32.totalorder %s179_s25, %s179_s25 }
 0x14b   :  { %p3717_p7 = scmp.lt.s32.totalorder %s3715_s28, %s3711_s10 }
 0x14d   :  { %p3718_p8 = por %p3717_p7, %p3716_p6 }
 0x14f   :  { %p3719_p9 = pnand %p3718_p8, %p3712_p5 }
 0x151   :  { %3722 = shalt.err (!%p3719_p9)
}
 0x152   :  { %181 = dma.hbm_to_vmem [thread:$0]  %s4734_s12, 16, %s179_s25, [#allocation21]  }
 0x153   :  { %s3723_s24 = scalar_lea.hbm %s4736_s14, 16 }
 0x154   :  { %p3724_p10 = scmp.ne.s32.totalorder %s4736_s14, %s3723_s24  ;;  %p3727_p11 = scmp.lt.u32.totalorder %s3723_s24, %s4736_s14 }
 0x156   :  { %p3729_p12 = pnand %p3727_p11, %p3724_p10 }
 0x158   :  { %3732 = shalt.err (!%p3729_p12)
}
 0x159   :  { %s3733_s8 = scalar_lea.vmem %s199_s23, 16  ;;  %s3737_s13 = scalar_lea.vmem %s199_s23, 32 }
 0x15a   :  { %p3734_p13 = scmp.ne.s32.totalorder %s199_s23, %s3733_s8  ;;  %p3738_p0 = scmp.lt.s32.totalorder %s199_s23, %s199_s23 }
 0x15b   :  { %p3739_p1 = scmp.lt.s32.totalorder %s3737_s13, %s3733_s8 }
 0x15d   :  { %p3740_p2 = por %p3739_p1, %p3738_p0 }
 0x15f   :  { %p3741_p3 = pnand %p3740_p2, %p3734_p13 }
 0x161   :  { %3744 = shalt.err (!%p3741_p3)
}
 0x162   :  { %201 = dma.hbm_to_vmem [thread:$0]  %s4736_s14, 16, %s199_s23, [#allocation24]  }
 0x163   :  { %s3881_s25 = smov [#allocation28]   ;;  %s3882_s18 = smov [#allocation31]  }
 0x164   :  { %s220_s29 = sshll.u32 %s3881_s25, 4  ;;  %s242_s30 = sshll.u32 %s3882_s18, 4  ;;  %s221_s29 = int_to_ptr.vmem [resolvable:$true] %s220_s29  ;;  %s243_s30 = int_to_ptr.vmem [resolvable:$true] %s242_s30 }
 0x165   :  { %s3745_s3 = scalar_lea.hbm %s4738_s16, 16 }
 0x166   :  { %p3746_p4 = scmp.ne.s32.totalorder %s4738_s16, %s3745_s3  ;;  %p3749_p5 = scmp.lt.u32.totalorder %s3745_s3, %s4738_s16 }
 0x168   :  { %p3751_p6 = pnand %p3749_p5, %p3746_p4 }
 0x16a   :  { %3754 = shalt.err (!%p3751_p6)
}
 0x16b   :  { %s3755_s14 = scalar_lea.vmem %s221_s29, 16  ;;  %s3759_s23 = scalar_lea.vmem %s221_s29, 32 }
 0x16c   :  { %p3756_p7 = scmp.ne.s32.totalorder %s221_s29, %s3755_s14  ;;  %p3760_p8 = scmp.lt.s32.totalorder %s221_s29, %s221_s29 }
 0x16d   :  { %p3761_p9 = scmp.lt.s32.totalorder %s3759_s23, %s3755_s14 }
 0x16f   :  { %p3762_p10 = por %p3761_p9, %p3760_p8 }
 0x171   :  { %p3763_p11 = pnand %p3762_p10, %p3756_p7 }
 0x173   :  { %3766 = shalt.err (!%p3763_p11)
}
 0x174   :  { %223 = dma.hbm_to_vmem [thread:$0]  %s4738_s16, 16, %s221_s29, [#allocation27]  }
 0x175   :  { %s4768_s24 = sld [smem:[#allocation54_spill]] }
 0x17b   :  { %s3767_s21 = scalar_lea.hbm %s4768_s24, 16 }
 0x17c   :  { %p3768_p12 = scmp.ne.s32.totalorder %s4768_s24, %s3767_s21  ;;  %p3771_p13 = scmp.lt.u32.totalorder %s3767_s21, %s4768_s24 }
 0x17e   :  { %p3773_p0 = pnand %p3771_p13, %p3768_p12 }
 0x180   :  { %3776 = shalt.err (!%p3773_p0)
}
 0x181   :  { %s3777_s13 = scalar_lea.vmem %s243_s30, 16  ;;  %s3781_s12 = scalar_lea.vmem %s243_s30, 32 }
 0x182   :  { %p3778_p1 = scmp.ne.s32.totalorder %s243_s30, %s3777_s13  ;;  %p3782_p2 = scmp.lt.s32.totalorder %s243_s30, %s243_s30 }
 0x183   :  { %p3783_p3 = scmp.lt.s32.totalorder %s3781_s12, %s3777_s13 }
 0x185   :  { %p3784_p4 = por %p3783_p3, %p3782_p2 }
 0x187   :  { %p3785_p5 = pnand %p3784_p4, %p3778_p1 }
 0x189   :  { %3788 = shalt.err (!%p3785_p5)
}
 0x18a   :  { %245 = dma.hbm_to_vmem [thread:$0]  %s4768_s24, 16, %s243_s30, [#allocation30]  }
 0x18b   :  { %s3883_s25 = smov [#allocation34]   ;;  %s4769_s6 = sld [smem:[#allocation55_spill]] }
 0x18c   :  { %s262_s29 = sshll.u32 %s3883_s25, 4  ;;  %s263_s29 = int_to_ptr.vmem [resolvable:$true] %s262_s29 }
 0x191   :  { %s3789_s3 = scalar_lea.hbm %s4769_s6, 16 }
 0x192   :  { %p3790_p6 = scmp.ne.s32.totalorder %s4769_s6, %s3789_s3  ;;  %p3793_p7 = scmp.lt.u32.totalorder %s3789_s3, %s4769_s6 }
 0x194   :  { %p3795_p8 = pnand %p3793_p7, %p3790_p6 }
 0x196   :  { %3798 = shalt.err (!%p3795_p8)
}
 0x197   :  { %s3799_s14 = scalar_lea.vmem %s263_s29, 16  ;;  %s3803_s30 = scalar_lea.vmem %s263_s29, 32 }
 0x198   :  { %p3800_p9 = scmp.ne.s32.totalorder %s263_s29, %s3799_s14  ;;  %p3804_p10 = scmp.lt.s32.totalorder %s263_s29, %s263_s29 }
 0x199   :  { %p3805_p11 = scmp.lt.s32.totalorder %s3803_s30, %s3799_s14 }
 0x19b   :  { %p3806_p12 = por %p3805_p11, %p3804_p10 }
 0x19d   :  { %p3807_p13 = pnand %p3806_p12, %p3800_p9 }
 0x19f   :  { %3810 = shalt.err (!%p3807_p13)
}
 0x1a0   :  { %265 = dma.hbm_to_vmem [thread:$0]  %s4769_s6, 16, %s263_s29, [#allocation33]  }
 0x1a1   :  { %3833 = dma.done.wait [#allocation3], 256  }
 0x1a2   :  { %3834 = vsyncadd [#allocation3], 4294967040 }
 0x1a3   :  { %3835 = dma.done.wait [#allocation6], 288  }
 0x1a4   :  { %3836 = vsyncadd [#allocation6], 4294967008 }
 0x1a5   :  { %3837 = dma.done.wait [#allocation9], 272  }
 0x1a6   :  { %3838 = vsyncadd [#allocation9], 4294967024 }
 0x1a7   :  { %3839 = dma.done.wait [#allocation12], 272  }
 0x1a8   :  { %3840 = vsyncadd [#allocation12], 4294967024 }
 0x1a9   :  { %3841 = dma.done.wait [#allocation15], 32  }
 0x1aa   :  { %3842 = vsyncadd [#allocation15], 4294967264 }
 0x1ab   :  { %3843 = dma.done.wait [#allocation18], 272  }
 0x1ac   :  { %3844 = vsyncadd [#allocation18], 4294967024 }
 0x1ad   :  { %3845 = dma.done.wait [#allocation21], 272  }
 0x1ae   :  { %3846 = vsyncadd [#allocation21], 4294967024 }
 0x1af   :  { %3847 = dma.done.wait [#allocation24], 32  }
 0x1b0   :  { %3848 = vsyncadd [#allocation24], 4294967264 }
 0x1b1   :  { %3849 = dma.done.wait [#allocation27], 272  }
 0x1b2   :  { %3850 = vsyncadd [#allocation27], 4294967024 }
 0x1b3   :  { %3851 = dma.done.wait [#allocation30], 528  }
 0x1b4   :  { %3852 = vsyncadd [#allocation30], 4294966768 }
 0x1b5   :  { %3853 = dma.done.wait [#allocation33], 32  }
 0x1b6   :  { %3854 = vsyncadd [#allocation33], 4294967264  ;;  %v3884_v0 = vmov 0.0   ;;  %vm3885_vm0 = vmmov 0   ;;  %v3253_v1 = vld [vmem:[#allocation8] sm:$0xff]   ;;  %v3254_v2 = vld [vmem:[#allocation8 + $0x8] sm:$0xff]  }
 0x1b7   :  { %2938 = vmatprep.subr.bf16.mxu0 %v3884_v0  ;;  %2942 = vmatprep.mubr.msk.bf16.mxu0 %vm3885_vm0, %v3884_v0  ;;  %v4292_v3 = vld [vmem:[#allocation2] sm:$0xff]  ;;  %v4294_v4 = vld [vmem:[#allocation2 + $0x8] sm:$0xff]  ;;  %vm356_vm1 = vcmask 261120   ;;  %v2786_v6 = vld [vmem:[#allocation10] ss:$0 sm:$0xff]  ;;  %s3886_s5 = smov 96  }
 0x1b8   :  { %2946 = vmatprep.subr.bf16.mxu1 %v3884_v0  ;;  %2948 = vmatprep.mubr.msk.bf16.mxu1 %vm3885_vm0, %v3884_v0  ;;  %v332_v5 = vpack.c.bf16 %v4294_v4, %v4292_v3  ;;  %s3887_s15 = smov 120   ;;  %s3888_s9 = smov 88   ;;  %vm408_vm2 = vcmask 64512   ;;  %vm472_vm3 = vcmask 1043456   ;;  %vm860_vm4 = vcmask 130048  }
 0x1b9   :  { %2939 = vmatpush3.bf16.msra.mxu0 %v3253_v1  ;;  %s3889_s24 = smov 80   ;;  %s3890_s21 = smov 112   ;;  %vm862_vm5 = vcmask 195584   ;;  %vm2666_vm6 = vcmask 523264  }
 0x1ba   :  { %2940 = vmatprep.subr.bf16.mxu0 %v3884_v0  ;;  %s3891_s27 = smov 72   ;;  %s3892_s7 = smov 104  }
 0x1bb   :  { %s3893_s20 = smov 56   ;;  %s3894_s8 = smov 48  }
 0x1bc   :  { %s3895_s13 = smov 40  }
 0x1bd   :  { %2941 = vmatpush3.bf16.msra.mxu0 %v3254_v2 }
 0x1be   :  { %2952 = vmatprep.subr.bf16.mxu0 %v3884_v0 }
 0x1c0   :  { %2943 = vmatmul.mubr.msk.bf16.vlgmr.msra.gmra.mrb[0].mxu0 %vm356_vm1, %v332_v5 }
 0x1c1   :  { %2954 = vmatprep.mubr.msk.bf16.mxu0 %vm3885_vm0, %v3884_v0 }
 0x293   :  { %v394_v7 = vpop.f32.mrb[0].mxu0 }
 0x294   :  { %v395_v8 = vadd.f32 %v2786_v6, %v394_v7  ;;  %v2944_v9 = vpop.f32.mrb[1].mxu0 }
 0x295   :  { %v397_v10 = vpop.f32.mrb[2].mxu0 }
 0x296   :  { %v401_v11 = vmul.f32 0.35355338, %v395_v8  ;;  %v4303_v12 = vpack.c.bf16 %v395_v8, %v395_v8  ;;  %v2945_v13 = vpop.f32.mrb[3].mxu0  ;;  %v398_v15 = vadd.f32 %v2786_v6, %v397_v10 }
 0x298   :  { %v403_v14 = vpack.c.bf16 %v401_v11, %v401_v11  ;;  %406 = vrot.lane.b32.xlu0 %v4303_v12, %s3886_s5  ;;  %v402_v16 = vmul.f32 0.35355338, %v398_v15  ;;  %v4315_v17 = vpack.c.bf16 %v398_v15, %v398_v15 }
 0x29a   :  { %517 = vrot.lane.b32.xlu1 %v403_v14, %s3887_s15  ;;  %v864_v18 = vpack.c.bf16 %v402_v16, %v402_v16 }
 0x29c   :  { %519 = vrot.lane.b32.xlu0 %v4303_v12, %s3888_s9 }
 0x29e   :  { %629 = vrot.lane.b32.xlu1 %v4303_v12, %s3889_s24 }
 0x2a0   :  { %627 = vrot.lane.b32.xlu0 %v403_v14, %s3890_s21 }
 0x2a2   :  { %739 = vrot.lane.b32.xlu1 %v4303_v12, %s3891_s27 }
 0x2a4   :  { %737 = vrot.lane.b32.xlu0 %v403_v14, %s3892_s7 }
 0x2a6   :  { %867 = vrot.lane.b32.xlu1 %v4315_v17, %s3886_s5 }
 0x2a8   :  { %978 = vrot.lane.b32.xlu0 %v4315_v17, %s3888_s9 }
 0x2aa   :  { %976 = vrot.lane.b32.xlu1 %v864_v18, %s3887_s15 }
 0x2ac   :  { %1088 = vrot.lane.b32.xlu0 %v4315_v17, %s3889_s24 }
 0x2ae   :  { %1086 = vrot.lane.b32.xlu1 %v864_v18, %s3890_s21 }
 0x2b0   :  { %1198 = vrot.lane.b32.xlu0 %v4315_v17, %s3891_s27 }
 0x2b2   :  { %1196 = vrot.lane.b32.xlu1 %v864_v18, %s3892_s7 }
 0x30a   :  { %v407_v19 = vpop.permute.xlu0 %406 }
 0x30b   :  { %v413_v20 = vsel %vm408_vm2, %v407_v19, 0 }
 0x30c   :  { %2947 = vmatpush3.bf16.xpose.msra.mxu1 %v413_v20  ;;  %v518_v22 = vpop.permute.xlu1 %517 }
 0x30d   :  { %2958 = vmatprep.subr.bf16.mxu1 %v3884_v0 }
 0x30e   :  { %v520_v21 = vpop.permute.xlu0 %519 }
 0x30f   :  { %v525_v23 = vsel %vm408_vm2, %v520_v21, 0 }
 0x310   :  { %v630_v24 = vpop.permute.xlu1 %629 }
 0x311   :  { %v635_v25 = vsel %vm408_vm2, %v630_v24, 0 }
 0x312   :  { %v628_v27 = vpop.permute.xlu0 %627 }
 0x313   :  { %2949 = vmatmul.mubr.msk.bf16.vlgmr.msra.gmra.mrb[0].mxu1 %vm408_vm2, %v403_v14 }
 0x314   :  { %2959 = vmatpush3.bf16.xpose.msra.mxu1 %v525_v23  ;;  %2960 = vmatprep.mubr.msk.bf16.mxu1 %vm3885_vm0, %v3884_v0  ;;  %v740_v26 = vpop.permute.xlu1 %739 }
 0x315   :  { %2970 = vmatprep.subr.bf16.mxu1 %v3884_v0  ;;  %v745_v28 = vsel %vm408_vm2, %v740_v26, 0 }
 0x316   :  { %v738_v30 = vpop.permute.xlu0 %737 }
 0x318   :  { %v868_v29 = vpop.permute.xlu1 %867 }
 0x319   :  { %v873_v31 = vsel %vm408_vm2, %v868_v29, 0 }
 0x31a   :  { %v979_v32 = vpop.permute.xlu0 %978 }
 0x31b   :  { %2961 = vmatmul.mubr.msk.bf16.vlgmr.msra.gmra.mrb[4].mxu1 %vm408_vm2, %v518_v22  ;;  %v984_v33 = vsel %vm408_vm2, %v979_v32, 0 }
 0x31c   :  { %2971 = vmatpush3.bf16.xpose.msra.mxu1 %v635_v25  ;;  %2972 = vmatprep.mubr.msk.bf16.mxu1 %vm3885_vm0, %v3884_v0  ;;  %v977_v35 = vpop.permute.xlu1 %976 }
 0x31d   :  { %2982 = vmatprep.subr.bf16.mxu1 %v3884_v0 }
 0x31e   :  { %v1089_v34 = vpop.permute.xlu0 %1088 }
 0x31f   :  { %v1094_v36 = vsel %vm408_vm2, %v1089_v34, 0 }
 0x320   :  { %v1087_v38 = vpop.permute.xlu1 %1086 }
 0x322   :  { %v1199_v37 = vpop.permute.xlu0 %1198 }
 0x323   :  { %2973 = vmatmul.mubr.msk.bf16.vlgmr.msra.gmra.mrb[8].mxu1 %vm408_vm2, %v628_v27  ;;  %v1204_v39 = vsel %vm408_vm2, %v1199_v37, 0 }
 0x324   :  { %2983 = vmatpush3.bf16.xpose.msra.mxu1 %v745_v28  ;;  %2984 = vmatprep.mubr.msk.bf16.mxu1 %vm3885_vm0, %v3884_v0  ;;  %v1197_v40 = vpop.permute.xlu1 %1196 }
 0x325   :  { %2994 = vmatprep.subr.bf16.mxu1 %v3884_v0 }
 0x32b   :  { %2985 = vmatmul.mubr.msk.bf16.vlgmr.msra.gmra.mrb[12].mxu1 %vm408_vm2, %v738_v30 }
 0x32c   :  { %2995 = vmatpush3.bf16.xpose.msra.mxu1 %v873_v31  ;;  %2996 = vmatprep.mubr.msk.bf16.mxu1 %vm3885_vm0, %v3884_v0 }
 0x32d   :  { %3006 = vmatprep.subr.bf16.mxu1 %v3884_v0 }
 0x333   :  { %2997 = vmatmul.mubr.msk.bf16.vlgmr.msra.gmra.mrb[16].mxu1 %vm408_vm2, %v864_v18 }
 0x334   :  { %3007 = vmatpush3.bf16.xpose.msra.mxu1 %v984_v33  ;;  %3008 = vmatprep.mubr.msk.bf16.mxu1 %vm3885_vm0, %v3884_v0 }
 0x335   :  { %3018 = vmatprep.subr.bf16.mxu1 %v3884_v0 }
 0x33b   :  { %3009 = vmatmul.mubr.msk.bf16.vlgmr.msra.gmra.mrb[20].mxu1 %vm408_vm2, %v977_v35 }
 0x33c   :  { %3019 = vmatpush3.bf16.xpose.msra.mxu1 %v1094_v36  ;;  %3020 = vmatprep.mubr.msk.bf16.mxu1 %vm3885_vm0, %v3884_v0 }
 0x33d   :  { %3030 = vmatprep.subr.bf16.mxu1 %v3884_v0 }
 0x343   :  { %3021 = vmatmul.mubr.msk.bf16.vlgmr.msra.gmra.mrb[24].mxu1 %vm408_vm2, %v1087_v38 }
 0x344   :  { %3031 = vmatpush3.bf16.xpose.msra.mxu1 %v1204_v39  ;;  %3032 = vmatprep.mubr.msk.bf16.mxu1 %vm3885_vm0, %v3884_v0 }
 0x345   :  { %3042 = vmatprep.subr.bf16.mxu1 %v3884_v0 }
 0x34b   :  { %3033 = vmatmul.mubr.msk.bf16.vlgmr.msra.gmra.mrb[28].mxu1 %vm408_vm2, %v1197_v40 }
 0x34c   :  { %3046 = vmatprep.mubr.msk.bf16.mxu1 %vm3885_vm0, %v3884_v0 }
 0x3e6   :  { %v449_v41 = vpop.f32.mrb[0].mxu1 }
 0x3e7   :  { %v2950_v42 = vpop.f32.mrb[1].mxu1  ;;  %v455_v43 = vsel %vm408_vm2, %v449_v41, -inf }
 0x3e8   :  { %v452_v44 = vpop.f32.mrb[2].mxu1  ;;  %456 = vmax.xlane.f32.xlu0 %v455_v43 }
 0x3e9   :  { %v2951_v45 = vpop.f32.mrb[3].mxu1 }
 0x3ee   :  { %v561_v46 = vpop.f32.mrb[4].mxu1 }
 0x3ef   :  { %v2962_v47 = vpop.f32.mrb[5].mxu1  ;;  %v567_v48 = vsel %vm408_vm2, %v561_v46, -inf }
 0x3f0   :  { %v564_v49 = vpop.f32.mrb[6].mxu1  ;;  %568 = vmax.xlane.f32.xlu1 %v567_v48 }
 0x3f1   :  { %v2963_v50 = vpop.f32.mrb[7].mxu1 }
 0x3f6   :  { %v671_v51 = vpop.f32.mrb[8].mxu1 }
 0x3f7   :  { %v2974_v52 = vpop.f32.mrb[9].mxu1  ;;  %v677_v53 = vsel %vm408_vm2, %v671_v51, -inf }
 0x3f8   :  { %v674_v54 = vpop.f32.mrb[10].mxu1  ;;  %678 = vmax.xlane.f32.xlu0 %v677_v53 }
 0x3f9   :  { %v2975_v55 = vpop.f32.mrb[11].mxu1 }
 0x3fe   :  { %v4372_v56 = vpop.f32.mrb[12].mxu1 }
 0x3ff   :  { %v2986_v57 = vpop.f32.mrb[13].mxu1  ;;  %v787_v58 = vsel %vm408_vm2, %v4372_v56, -inf }
 0x400   :  { %v784_v59 = vpop.f32.mrb[14].mxu1  ;;  %788 = vmax.xlane.f32.xlu0 %v787_v58 }
 0x401   :  { %v2987_v60 = vpop.f32.mrb[15].mxu1 }
 0x406   :  { %v4376_v61 = vpop.f32.mrb[16].mxu1 }
 0x407   :  { %v2998_v62 = vpop.f32.mrb[17].mxu1  ;;  %v915_v63 = vsel %vm408_vm2, %v4376_v61, -inf }
 0x408   :  { %916 = vmax.xlane.f32.xlu1 %v915_v63  ;;  %v912_v1 = vpop.f32.mrb[18].mxu1 }
 0x409   :  { %v2999_v2 = vpop.f32.mrb[19].mxu1 }
 0x40e   :  { %v1020_v5 = vpop.f32.mrb[20].mxu1 }
 0x40f   :  { %v3010_v6 = vpop.f32.mrb[21].mxu1  ;;  %v1026_v7 = vsel %vm408_vm2, %v1020_v5, -inf }
 0x410   :  { %1027 = vmax.xlane.f32.xlu0 %v1026_v7  ;;  %v1023_v8 = vpop.f32.mrb[22].mxu1 }
 0x411   :  { %v3011_v9 = vpop.f32.mrb[23].mxu1 }
 0x416   :  { %v1130_v10 = vpop.f32.mrb[24].mxu1 }
 0x417   :  { %v3022_v11 = vpop.f32.mrb[25].mxu1  ;;  %v1136_v13 = vsel %vm408_vm2, %v1130_v10, -inf }
 0x418   :  { %1137 = vmax.xlane.f32.xlu1 %v1136_v13  ;;  %v1133_v14 = vpop.f32.mrb[26].mxu1 }
 0x419   :  { %v3023_v15 = vpop.f32.mrb[27].mxu1 }
 0x41e   :  { %v4382_v16 = vpop.f32.mrb[28].mxu1 }
 0x41f   :  { %v3034_v18 = vpop.f32.mrb[29].mxu1  ;;  %v1246_v21 = vsel %vm408_vm2, %v4382_v16, -inf }
 0x420   :  { %v1243_v19 = vpop.f32.mrb[30].mxu1 }
 0x421   :  { %v3035_v20 = vpop.f32.mrb[31].mxu1 }
 0x426   :  { %579 = vrot.lane.b32.xlu0 %v4303_v12, %s3893_s20 }
 0x429   :  { %467 = vrot.lane.b32.xlu1 %v4303_v12, %s3858_s22 }
 0x445   :  { %1247 = vmax.xlane.f32.xlu0 %v1246_v21 }
 0x475   :  { %v457_v22 = vpop.xlane.xlu0 %456 }
 0x476   :  { %v458_v23 = vsub.f32 %v449_v41, %v457_v22 }
 0x478   :  { %v459_v24 = vmul.f32 1.442695, %v458_v23 }
 0x47a   :  { %3269 = vpow2.f32 %v459_v24 }
 0x47d   :  { %v569_v25 = vpop.xlane.xlu1 %568 }
 0x47e   :  { %v570_v26 = vsub.f32 %v561_v46, %v569_v25 }
 0x480   :  { %v571_v27 = vmul.f32 1.442695, %v570_v26 }
 0x482   :  { %3271 = vpow2.f32 %v571_v27 }
 0x484   :  { %v4390_v28 = vpop.eup %3269 }
 0x485   :  { %v679_v29 = vpop.xlane.xlu0 %678  ;;  %v461_v30 = vsel %vm408_vm2, %v4390_v28, 0.0 }
 0x486   :  { %v680_v31 = vsub.f32 %v671_v51, %v679_v29  ;;  %462 = vadd.xlane.f32.xlu1 %v461_v30 }
 0x488   :  { %v681_v32 = vmul.f32 1.442695, %v680_v31 }
 0x48a   :  { %3273 = vpow2.f32 %v681_v32 }
 0x48c   :  { %v4394_v33 = vpop.eup %3271 }
 0x48d   :  { %v573_v34 = vsel %vm408_vm2, %v4394_v33, 0.0  ;;  %v789_v40 = vpop.xlane.xlu0 %788 }
 0x48e   :  { %574 = vadd.xlane.f32.xlu0 %v573_v34  ;;  %v790_v42 = vsub.f32 %v4372_v56, %v789_v40 }
 0x490   :  { %v791_v43 = vmul.f32 1.442695, %v790_v42 }
 0x492   :  { %3275 = vpow2.f32 %v791_v43 }
 0x494   :  { %v4398_v35 = vpop.eup %3273 }
 0x495   :  { %v683_v36 = vsel %vm408_vm2, %v4398_v35, 0.0  ;;  %v917_v37 = vpop.xlane.xlu1 %916 }
 0x496   :  { %684 = vadd.xlane.f32.xlu1 %v683_v36  ;;  %v918_v44 = vsub.f32 %v4376_v61, %v917_v37 }
 0x498   :  { %v919_v47 = vmul.f32 1.442695, %v918_v44 }
 0x49a   :  { %3277 = vpow2.f32 %v919_v47 }
 0x49c   :  { %v3276_v50 = vpop.eup %3275 }
 0x49d   :  { %v1028_v45 = vpop.xlane.xlu0 %1027  ;;  %v793_v51 = vsel %vm408_vm2, %v3276_v50, 0.0 }
 0x49e   :  { %v1029_v46 = vsub.f32 %v1020_v5, %v1028_v45 }
 0x4a0   :  { %v1030_v49 = vmul.f32 1.442695, %v1029_v46 }
 0x4a1   :  { %v580_v58 = vpop.permute.xlu0 %579 }
 0x4a2   :  { %3279 = vpow2.f32 %v1030_v49  ;;  %v585_v8 = vsel %vm472_vm3, %v580_v58, 0 }
 0x4a4   :  { %689 = vrot.lane.b32.xlu0 %v4303_v12, %s3894_s8  ;;  %v4411_v52 = vpop.eup %3277 }
 0x4a5   :  { %v1138_v38 = vpop.xlane.xlu1 %1137  ;;  %v921_v54 = vsel %vm408_vm2, %v4411_v52, 0.0 }
 0x4a6   :  { %v1139_v48 = vsub.f32 %v1130_v10, %v1138_v38 }
 0x4a7   :  { %799 = vrot.lane.b32.xlu1 %v4303_v12, %s3895_s13 }
 0x4a8   :  { %v1140_v12 = vmul.f32 1.442695, %v1139_v48 }
 0x4a9   :  { %v468_v39 = vpop.permute.xlu1 %467 }
 0x4aa   :  { %v474_v41 = vsel %vm472_vm3, %v468_v39, 0  ;;  %3281 = vpow2.f32 %v1140_v12 }
 0x4ab   :  { %2953 = vmatpush3.bf16.msra.mxu0 %v474_v41 }
 0x4ac   :  { %2964 = vmatprep.subr.bf16.mxu0 %v3884_v0  ;;  %v4413_v53 = vpop.eup %3279 }
 0x4ad   :  { %v1032_v56 = vsel %vm408_vm2, %v4413_v53, 0.0 }
 0x4b4   :  { %v4417_v55 = vpop.eup %3281 }
 0x4b5   :  { %v1142_v57 = vsel %vm408_vm2, %v4417_v55, 0.0 }
 0x4c3   :  { %794 = vadd.xlane.f32.xlu0 %v793_v51 }
 0x4c7   :  { %922 = vadd.xlane.f32.xlu0 %v921_v54 }
 0x4cb   :  { %1033 = vadd.xlane.f32.xlu1 %v1032_v56  ;;  %1143 = vadd.xlane.f32.xlu0 %v1142_v57 }
 0x4d2   :  { %v1248_v59 = vpop.xlane.xlu0 %1247 }
 0x4d3   :  { %v1249_v60 = vsub.f32 %v4382_v16, %v1248_v59 }
 0x4d5   :  { %v1250_v61 = vmul.f32 1.442695, %v1249_v60 }
 0x4d7   :  { %3283 = vpow2.f32 %v1250_v61 }
 0x4dc   :  { %1038 = vrot.lane.b32.xlu1 %v4315_v17, %s3893_s20 }
 0x4e0   :  { %1148 = vrot.lane.b32.xlu1 %v4315_v17, %s3894_s8 }
 0x4e1   :  { %v4428_v62 = vpop.eup %3283 }
 0x4e2   :  { %v1252_v63 = vsel %vm408_vm2, %v4428_v62, 0.0 }
 0x4e3   :  { %1253 = vadd.xlane.f32.xlu0 %v1252_v63 }
 0x4e4   :  { %1258 = vrot.lane.b32.xlu1 %v4315_v17, %s3895_s13 }
 0x4f9   :  { %927 = vrot.lane.b32.xlu0 %v4315_v17, %s3858_s22  ;;  %s3896_s22 = smov 24  }
 0x513   :  { %v463_v1 = vpop.xlane.xlu1 %462 }
 0x514   :  { %3285 = vrcp.f32 %v463_v1 }
 0x51b   :  { %v575_v2 = vpop.xlane.xlu0 %574 }
 0x51c   :  { %3287 = vrcp.f32 %v575_v2 }
 0x51e   :  { %v3286_v5 = vpop.eup %3285 }
 0x51f   :  { %v465_v6 = vmul.f32 %v3286_v5, %v4390_v28  ;;  %v690_v11 = vpop.permute.xlu0 %689 }
 0x520   :  { %v695_v14 = vsel %vm472_vm3, %v690_v11, 0 }
 0x521   :  { %v466_v7 = vpack.c.bf16 %v465_v6, %v465_v6 }
 0x523   :  { %2955 = vmatmul.mubr.msk.bf16.vlgmr.msra.gmra.mrb[4].mxu0 %vm408_vm2, %v466_v7  ;;  %v685_v9 = vpop.xlane.xlu1 %684 }
 0x524   :  { %2965 = vmatpush3.bf16.msra.mxu0 %v585_v8  ;;  %3289 = vrcp.f32 %v685_v9  ;;  %2966 = vmatprep.mubr.msk.bf16.mxu0 %vm3885_vm0, %v3884_v0  ;;  %v3255_v8 = vld [vmem:[#allocation11] sm:$0xff]  }
 0x525   :  { %2976 = vmatprep.subr.bf16.mxu0 %v3884_v0  ;;  %3043 = vmatpush3.bf16.msra.mxu1 %v3255_v8  ;;  %v2810_v8 = vld [vmem:[#allocation14] ss:$0 sm:$0xff] }
 0x526   :  { %v3288_v17 = vpop.eup %3287  ;;  %3044 = vmatprep.subr.bf16.mxu1 %v3884_v0 }
 0x527   :  { %v577_v10 = vmul.f32 %v3288_v17, %v4394_v33  ;;  %v800_v18 = vpop.permute.xlu1 %799 }
 0x528   :  { %v805_v20 = vsel %vm472_vm3, %v800_v18, 0 }
 0x529   :  { %v578_v13 = vpack.c.bf16 %v577_v10, %v577_v10 }
 0x52b   :  { %2967 = vmatmul.mubr.msk.bf16.vlgmr.msra.gmra.mrb[8].mxu0 %vm408_vm2, %v578_v13  ;;  %v3256_v13 = vld [vmem:[#allocation11 + $0x8] sm:$0xff]  }
 0x52c   :  { %2977 = vmatpush3.bf16.msra.mxu0 %v695_v14  ;;  %2978 = vmatprep.mubr.msk.bf16.mxu0 %vm3885_vm0, %v3884_v0 }
 0x52d   :  { %2988 = vmatprep.subr.bf16.mxu0 %v3884_v0  ;;  %3045 = vmatpush3.bf16.msra.mxu1 %v3256_v13  ;;  %v2811_v13 = vld [vmem:[#allocation16] ss:$0 sm:$0xff] }
 0x52e   :  { %v3290_v15 = vpop.eup %3289  ;;  %3058 = vmatprep.subr.bf16.mxu1 %v3884_v0 }
 0x52f   :  { %v687_v16 = vmul.f32 %v3290_v15, %v4398_v35 }
 0x531   :  { %v688_v19 = vpack.c.bf16 %v687_v16, %v687_v16 }
 0x533   :  { %2979 = vmatmul.mubr.msk.bf16.vlgmr.msra.gmra.mrb[12].mxu0 %vm408_vm2, %v688_v19 }
 0x534   :  { %2989 = vmatpush3.bf16.msra.mxu0 %v805_v20  ;;  %2990 = vmatprep.mubr.msk.bf16.mxu0 %vm3885_vm0, %v3884_v0 }
 0x535   :  { %3000 = vmatprep.subr.bf16.mxu0 %v3884_v0 }
 0x550   :  { %v795_v21 = vpop.xlane.xlu0 %794 }
 0x551   :  { %3291 = vrcp.f32 %v795_v21 }
 0x554   :  { %v923_v25 = vpop.xlane.xlu0 %922 }
 0x555   :  { %3293 = vrcp.f32 %v923_v25 }
 0x558   :  { %v1034_v26 = vpop.xlane.xlu1 %1033  ;;  %v1144_v27 = vpop.xlane.xlu0 %1143 }
 0x559   :  { %3295 = vrcp.f32 %v1034_v26 }
 0x55a   :  { %3297 = vrcp.f32 %v1144_v27 }
 0x55b   :  { %v3292_v22 = vpop.eup %3291 }
 0x55c   :  { %v797_v23 = vmul.f32 %v3292_v22, %v3276_v50  ;;  %v1039_v33 = vpop.permute.xlu1 %1038 }
 0x55d   :  { %v1044_v36 = vsel %vm472_vm3, %v1039_v33, 0 }
 0x55e   :  { %v798_v24 = vpack.c.bf16 %v797_v23, %v797_v23 }
 0x55f   :  { %v3294_v28 = vpop.eup %3293 }
 0x560   :  { %2991 = vmatmul.mubr.msk.bf16.vlgmr.msra.gmra.mrb[16].mxu0 %vm408_vm2, %v798_v24  ;;  %v925_v30 = vmul.f32 %v3294_v28, %v4411_v52  ;;  %v1149_v38 = vpop.permute.xlu1 %1148 }
 0x561   :  { %3002 = vmatprep.mubr.msk.bf16.mxu0 %vm3885_vm0, %v3884_v0  ;;  %v1154_v41 = vsel %vm472_vm3, %v1149_v38, 0 }
 0x562   :  { %v926_v34 = vpack.c.bf16 %v925_v30, %v925_v30 }
 0x563   :  { %v3296_v35 = vpop.eup %3295 }
 0x564   :  { %v1036_v37 = vmul.f32 %v3296_v35, %v4413_v53  ;;  %v3298_v40 = vpop.eup %3297  ;;  %v1259_v43 = vpop.permute.xlu1 %1258 }
 0x565   :  { %v1146_v42 = vmul.f32 %v3298_v40, %v4417_v55  ;;  %v1264_v46 = vsel %vm472_vm3, %v1259_v43, 0 }
 0x566   :  { %v1037_v39 = vpack.c.bf16 %v1036_v37, %v1036_v37 }
 0x567   :  { %v1147_v44 = vpack.c.bf16 %v1146_v42, %v1146_v42 }
 0x570   :  { %v1254_v29 = vpop.xlane.xlu0 %1253 }
 0x571   :  { %3299 = vrcp.f32 %v1254_v29 }
 0x574   :  { %v928_v31 = vpop.permute.xlu0 %927 }
 0x575   :  { %v933_v32 = vsel %vm472_vm3, %v928_v31, 0 }
 0x576   :  { %3001 = vmatpush3.bf16.msra.mxu0 %v933_v32 }
 0x577   :  { %3012 = vmatprep.subr.bf16.mxu0 %v3884_v0 }
 0x579   :  { %3003 = vmatmul.mubr.msk.bf16.vlgmr.msra.gmra.mrb[20].mxu0 %vm408_vm2, %v926_v34 }
 0x57a   :  { %3013 = vmatpush3.bf16.msra.mxu0 %v1044_v36  ;;  %3014 = vmatprep.mubr.msk.bf16.mxu0 %vm3885_vm0, %v3884_v0 }
 0x57b   :  { %3024 = vmatprep.subr.bf16.mxu0 %v3884_v0  ;;  %v3300_v45 = vpop.eup %3299 }
 0x57c   :  { %v1256_v47 = vmul.f32 %v3300_v45, %v4428_v62 }
 0x57e   :  { %v1257_v48 = vpack.c.bf16 %v1256_v47, %v1256_v47 }
 0x581   :  { %3015 = vmatmul.mubr.msk.bf16.vlgmr.msra.gmra.mrb[24].mxu0 %vm408_vm2, %v1037_v39 }
 0x582   :  { %3025 = vmatpush3.bf16.msra.mxu0 %v1154_v41  ;;  %3026 = vmatprep.mubr.msk.bf16.mxu0 %vm3885_vm0, %v3884_v0  ;;  %v2806_v41 = vld [vmem:[#allocation13] ss:$0 sm:$0xff] }
 0x583   :  { %3036 = vmatprep.subr.bf16.mxu0 %v3884_v0 }
 0x589   :  { %3027 = vmatmul.mubr.msk.bf16.vlgmr.msra.gmra.mrb[28].mxu0 %vm408_vm2, %v1147_v44 }
 0x58a   :  { %3037 = vmatpush3.bf16.msra.mxu0 %v1264_v46  ;;  %3038 = vmatprep.mubr.msk.bf16.mxu0 %vm3885_vm0, %v3884_v0 }
 0x58b   :  { %3050 = vmatprep.subr.bf16.mxu0 %v3884_v0 }
 0x591   :  { %3039 = vmatmul.mubr.msk.bf16.vlgmr.msra.gmra.mrb[32].mxu0 %vm408_vm2, %v1257_v48 }
 0x592   :  { %3054 = vmatprep.mubr.msk.bf16.mxu0 %vm3885_vm0, %v3884_v0 }
 0x5f6   :  { %v510_v49 = vpop.f32.mrb[4].mxu0 }
 0x5f7   :  { %v2956_v12 = vpop.f32.mrb[5].mxu0 }
 0x5f8   :  { %v513_v50 = vpop.f32.mrb[6].mxu0 }
 0x5f9   :  { %v2957_v51 = vpop.f32.mrb[7].mxu0 }
 0x5fe   :  { %v621_v52 = vpop.f32.mrb[8].mxu0 }
 0x5ff   :  { %v2968_v53 = vpop.f32.mrb[9].mxu0 }
 0x600   :  { %v624_v54 = vpop.f32.mrb[10].mxu0 }
 0x601   :  { %v2969_v55 = vpop.f32.mrb[11].mxu0 }
 0x606   :  { %v731_v56 = vpop.f32.mrb[12].mxu0 }
 0x607   :  { %v2980_v57 = vpop.f32.mrb[13].mxu0 }
 0x608   :  { %v734_v58 = vpop.f32.mrb[14].mxu0 }
 0x609   :  { %v2981_v59 = vpop.f32.mrb[15].mxu0 }
 0x633   :  { %v841_v60 = vpop.f32.mrb[16].mxu0 }
 0x634   :  { %v2992_v61 = vpop.f32.mrb[17].mxu0 }
 0x635   :  { %v844_v62 = vpop.f32.mrb[18].mxu0  ;;  %v4503_v61 = vld [vmem:[#allocation5] sm:$0xff]  }
 0x636   :  { %v2993_v63 = vpop.f32.mrb[19].mxu0 }
 0x64c   :  { %v969_v1 = vpop.f32.mrb[20].mxu0 }
 0x64d   :  { %v3004_v2 = vpop.f32.mrb[21].mxu0 }
 0x64e   :  { %v972_v5 = vpop.f32.mrb[22].mxu0 }
 0x64f   :  { %v3005_v6 = vpop.f32.mrb[23].mxu0 }
 0x654   :  { %v1080_v7 = vpop.f32.mrb[24].mxu0 }
 0x655   :  { %v3223_v9 = vpack.i.bf16 %v1080_v7, %v621_v52  ;;  %v3016_v17 = vpop.f32.mrb[25].mxu0 }
 0x656   :  { %v1083_v10 = vpop.f32.mrb[26].mxu0 }
 0x657   :  { %3224 = vrot.lane.b32.xlu1 %v3223_v9, %s3871_s1  ;;  %v3017_v11 = vpop.f32.mrb[27].mxu0 }
 0x65c   :  { %v1190_v14 = vpop.f32.mrb[28].mxu0 }
 0x65d   :  { %v3228_v15 = vpack.i.bf16 %v1190_v14, %v731_v56  ;;  %v3028_v16 = vpop.f32.mrb[29].mxu0 }
 0x65e   :  { %v1193_v18 = vpop.f32.mrb[30].mxu0 }
 0x65f   :  { %3229 = vrot.lane.b32.xlu1 %v3228_v15, %s3873_s2  ;;  %v3029_v19 = vpop.f32.mrb[31].mxu0 }
 0x660   :  { %v1525_v19 = vsel %vm408_vm2, %v4503_v61, 0 }
 0x664   :  { %v1300_v20 = vpop.f32.mrb[32].mxu0 }
 0x665   :  { %v3233_v21 = vpack.i.bf16 %v1300_v20, %v841_v60  ;;  %v3040_v22 = vpop.f32.mrb[33].mxu0  ;;  %v3257_v60 = vld [vmem:[#allocation17] sm:$0xff]   ;;  %v2812_v20 = vld [vmem:[#allocation19] ss:$0 sm:$0xff] }
 0x666   :  { %v1303_v23 = vpop.f32.mrb[34].mxu0  ;;  %3051 = vmatpush3.bf16.msra.mxu0 %v3257_v60 }
 0x667   :  { %3234 = vrot.lane.b32.xlu0 %v3233_v21, %s3896_s22  ;;  %v3041_v24 = vpop.f32.mrb[35].mxu0  ;;  %3052 = vmatprep.subr.bf16.mxu0 %v3884_v0 }
 0x6c9   :  { %v3225_v25 = vpop.permute.xlu1 %3224 }
 0x6ca   :  { %v3227_v27 = vunpack.i.h.bf16 %v3225_v25  ;;  %v3226_v28 = vunpack.i.l.bf16 %v3225_v25 }
 0x6cc   :  { %v1318_v32 = vsel %vm408_vm2, %v969_v1, %v3227_v27  ;;  %v859_v33 = vsel %vm408_vm2, %v510_v49, %v3226_v28 }
 0x6d1   :  { %v3230_v26 = vpop.permute.xlu1 %3229 }
 0x6d2   :  { %v3232_v29 = vunpack.i.h.bf16 %v3230_v26  ;;  %v3231_v30 = vunpack.i.l.bf16 %v3230_v26 }
 0x6d4   :  { %v1319_v36 = vsel %vm860_vm4, %v1318_v32, %v3232_v29  ;;  %v861_v37 = vsel %vm860_vm4, %v859_v33, %v3231_v30  ;;  %v4532_v33 = vld [vmem:[#allocation5 + $0x8] sm:$0xff]  }
 0x6d9   :  { %v3235_v31 = vpop.permute.xlu0 %3234 }
 0x6da   :  { %v3237_v34 = vunpack.i.h.bf16 %v3235_v31  ;;  %v3236_v35 = vunpack.i.l.bf16 %v3235_v31 }
 0x6dc   :  { %v1320_v38 = vsel %vm862_vm5, %v1319_v36, %v3237_v34  ;;  %v863_v39 = vsel %vm862_vm5, %v861_v37, %v3236_v35 }
 0x6dd   :  { %v1321_v40 = vpack.c.bf16 %v1320_v38, %v863_v39 }
 0x6df   :  { %3047 = vmatmul.mubr.msk.bf16.vlgmr.msra.gmra.mrb[32].mxu1 %vm356_vm1, %v1321_v40  ;;  %v1986_v40 = vsel %vm408_vm2, %v4532_v33, 0 }
 0x6e0   :  { %3060 = vmatprep.mubr.msk.bf16.mxu1 %vm3885_vm0, %v3884_v0  ;;  %3059 = vmatpush3.bf16.xpose.msra.mxu1 %v1525_v19 }
 0x6e1   :  { %3070 = vmatprep.subr.bf16.mxu1 %v3884_v0 }
 0x7b2   :  { %v1382_v42 = vpop.f32.mrb[32].mxu1 }
 0x7b3   :  { %v1383_v43 = vadd.f32 %v2806_v41, %v1382_v42  ;;  %v3048_v44 = vpop.f32.mrb[33].mxu1 }
 0x7b4   :  { %v1385_v45 = vpop.f32.mrb[34].mxu1 }
 0x7b5   :  { %v1386_v46 = vadd.f32 %v2806_v41, %v1385_v45  ;;  %v3049_v47 = vpop.f32.mrb[35].mxu1  ;;  %v1389_v48 = vadd.f32 %v1383_v43, %v4292_v3 }
 0x7b7   :  { %v1393_v49 = vsel %vm356_vm1, %v1389_v48, 0.0  ;;  %v1390_v12 = vadd.f32 %v1386_v46, %v4294_v4  ;;  %v3258_v4 = vld [vmem:[#allocation17 + $0x8] sm:$0xff]  }
 0x7b8   :  { %1394 = vadd.xlane.f32.xlu1 %v1393_v49  ;;  %3053 = vmatpush3.bf16.msra.mxu0 %v3258_v4 }
 0x7b9   :  { %v1396_v50 = vsel %vm356_vm1, %v1390_v12, 0.0  ;;  %3064 = vmatprep.subr.bf16.mxu0 %v3884_v0 }
 0x7ba   :  { %1397 = vadd.xlane.f32.xlu0 %v1396_v50  ;;  %v2816_v50 = vld [vmem:[#allocation7] ss:$0 sm:$0xff] }
 0x845   :  { %v1395_v51 = vpop.xlane.xlu1 %1394 }
 0x846   :  { %v1400_v52 = vmul.f32 0.03125, %v1395_v51 }
 0x847   :  { %v1398_v53 = vpop.xlane.xlu0 %1397 }
 0x848   :  { %v1402_v54 = vsub.f32 %v1389_v48, %v1400_v52  ;;  %v1401_v55 = vmul.f32 0.03125, %v1398_v53 }
 0x84a   :  { %v1403_v56 = vsub.f32 %v1390_v12, %v1401_v55  ;;  %v1404_v57 = vmul.f32 %v1402_v54, %v1402_v54 }
 0x84c   :  { %v1406_v58 = vsel %vm356_vm1, %v1404_v57, 0.0  ;;  %v1405_v59 = vmul.f32 %v1403_v56, %v1403_v56 }
 0x84d   :  { %1407 = vadd.xlane.f32.xlu0 %v1406_v58 }
 0x84e   :  { %v1409_v3 = vsel %vm356_vm1, %v1405_v59, 0.0 }
 0x84f   :  { %1410 = vadd.xlane.f32.xlu1 %v1409_v3 }
 0x863   :  { %1628 = vrot.lane.b32.xlu0 %v4503_v61, %s3887_s15 }
 0x8da   :  { %v1408_v62 = vpop.xlane.xlu0 %1407 }
 0x8db   :  { %v1412_v63 = vmul.f32 0.03125, %v1408_v62 }
 0x8dc   :  { %v1411_v1 = vpop.xlane.xlu1 %1410 }
 0x8dd   :  { %v1414_v2 = vadd.f32 1e-12, %v1412_v63  ;;  %v1413_v5 = vmul.f32 0.03125, %v1411_v1 }
 0x8de   :  { %v1629_v27 = vpop.permute.xlu0 %1628 }
 0x8df   :  { %3301 = vrsqrt.f32 %v1414_v2  ;;  %v1415_v6 = vadd.f32 1e-12, %v1413_v5  ;;  %v1634_v30 = vsel %vm408_vm2, %v1629_v27, 0 }
 0x8e1   :  { %3303 = vrsqrt.f32 %v1415_v6 }
 0x8e9   :  { %v3302_v7 = vpop.eup %3301 }
 0x8ea   :  { %v1418_v9 = vmul.f32 %v3302_v7, %v1402_v54 }
 0x8eb   :  { %v3304_v17 = vpop.eup %3303 }
 0x8ec   :  { %v1426_v10 = vmul.f32 %v2810_v8, %v1418_v9  ;;  %v1419_v11 = vmul.f32 %v3304_v17, %v1403_v56 }
 0x8ee   :  { %v1427_v14 = vmul.f32 %v2810_v8, %v1419_v11  ;;  %v4507_v15 = vadd.f32 %v2811_v13, %v1426_v10 }
 0x8f0   :  { %v4509_v16 = vadd.f32 %v2811_v13, %v1427_v14  ;;  %v2826_v13 = vld [vmem:[#allocation7 + $0x1] ss:$0 sm:$0xff] }
 0x8f2   :  { %v1436_v18 = vpack.c.bf16 %v4509_v16, %v4507_v15 }
 0x8f4   :  { %3055 = vmatmul.mubr.msk.bf16.vlgmr.msra.gmra.mrb[36].mxu0 %vm356_vm1, %v1436_v18 }
 0x8f5   :  { %3066 = vmatprep.mubr.msk.bf16.mxu0 %vm3885_vm0, %v3884_v0 }
 0x9c7   :  { %v1497_v21 = vpop.f32.mrb[36].mxu0 }
 0x9c8   :  { %v1498_v22 = vadd.f32 %v2812_v20, %v1497_v21  ;;  %v3056_v23 = vpop.f32.mrb[37].mxu0 }
 0x9c9   :  { %v1500_v24 = vpop.f32.mrb[38].mxu0 }
 0x9ca   :  { %v1504_v25 = vmul.f32 0.35355338, %v1498_v22  ;;  %v3057_v26 = vpop.f32.mrb[39].mxu0  ;;  %v1501_v29 = vadd.f32 %v2812_v20, %v1500_v24 }
 0x9cc   :  { %v1509_v28 = vpack.c.bf16 %v1504_v25, %v1504_v25  ;;  %v1505_v31 = vmul.f32 0.35355338, %v1501_v29 }
 0x9ce   :  { %1734 = vrot.lane.b32.xlu0 %v1509_v28, %s3890_s21  ;;  %1626 = vrot.lane.b32.xlu1 %v1509_v28, %s3887_s15  ;;  %v1970_v32 = vpack.c.bf16 %v1505_v31, %v1505_v31 }
 0x9cf   :  { %3061 = vmatmul.mubr.msk.bf16.vlgmr.msra.gmra.mrb[36].mxu1 %vm408_vm2, %v1509_v28 }
 0x9d0   :  { %3071 = vmatpush3.bf16.xpose.msra.mxu1 %v1634_v30  ;;  %3072 = vmatprep.mubr.msk.bf16.mxu1 %vm3885_vm0, %v3884_v0 }
 0x9d1   :  { %3082 = vmatprep.subr.bf16.mxu1 %v3884_v0 }
 0x9d2   :  { %1842 = vrot.lane.b32.xlu0 %v1509_v28, %s3892_s7  ;;  %1736 = vrot.lane.b32.xlu1 %v4503_v61, %s3890_s21 }
 0x9d6   :  { %2087 = vrot.lane.b32.xlu0 %v1970_v32, %s3887_s15  ;;  %1844 = vrot.lane.b32.xlu1 %v4503_v61, %s3892_s7 }
 0x9da   :  { %2195 = vrot.lane.b32.xlu0 %v1970_v32, %s3890_s21  ;;  %2089 = vrot.lane.b32.xlu1 %v4532_v33, %s3887_s15 }
 0x9de   :  { %2303 = vrot.lane.b32.xlu0 %v1970_v32, %s3892_s7  ;;  %2197 = vrot.lane.b32.xlu1 %v4532_v33, %s3890_s21 }
 0x9e2   :  { %2305 = vrot.lane.b32.xlu1 %v4532_v33, %s3892_s7 }
 0xa40   :  { %v1627_v34 = vpop.permute.xlu1 %1626  ;;  %v1735_v39 = vpop.permute.xlu0 %1734 }
 0xa41   :  { %3073 = vmatmul.mubr.msk.bf16.vlgmr.msra.gmra.mrb[40].mxu1 %vm408_vm2, %v1627_v34 }
 0xa42   :  { %3084 = vmatprep.mubr.msk.bf16.mxu1 %vm3885_vm0, %v3884_v0 }
 0xa44   :  { %v1737_v35 = vpop.permute.xlu1 %1736  ;;  %v1843_v41 = vpop.permute.xlu0 %1842 }
 0xa45   :  { %v1742_v36 = vsel %vm408_vm2, %v1737_v35, 0 }
 0xa46   :  { %3083 = vmatpush3.bf16.xpose.msra.mxu1 %v1742_v36 }
 0xa47   :  { %3094 = vmatprep.subr.bf16.mxu1 %v3884_v0 }
 0xa48   :  { %v1845_v37 = vpop.permute.xlu1 %1844  ;;  %v2088_v46 = vpop.permute.xlu0 %2087 }
 0xa49   :  { %v1850_v38 = vsel %vm408_vm2, %v1845_v37, 0 }
 0xa4c   :  { %v2090_v42 = vpop.permute.xlu1 %2089  ;;  %v2196_v49 = vpop.permute.xlu0 %2195 }
 0xa4d   :  { %3085 = vmatmul.mubr.msk.bf16.vlgmr.msra.gmra.mrb[44].mxu1 %vm408_vm2, %v1735_v39  ;;  %v2095_v43 = vsel %vm408_vm2, %v2090_v42, 0 }
 0xa4e   :  { %3095 = vmatpush3.bf16.xpose.msra.mxu1 %v1850_v38  ;;  %3096 = vmatprep.mubr.msk.bf16.mxu1 %vm3885_vm0, %v3884_v0 }
 0xa4f   :  { %3106 = vmatprep.subr.bf16.mxu1 %v3884_v0 }
 0xa50   :  { %v2198_v44 = vpop.permute.xlu1 %2197  ;;  %v2304_v12 = vpop.permute.xlu0 %2303 }
 0xa51   :  { %v2203_v45 = vsel %vm408_vm2, %v2198_v44, 0 }
 0xa54   :  { %v2306_v47 = vpop.permute.xlu1 %2305 }
 0xa55   :  { %3097 = vmatmul.mubr.msk.bf16.vlgmr.msra.gmra.mrb[48].mxu1 %vm408_vm2, %v1843_v41  ;;  %v2311_v48 = vsel %vm408_vm2, %v2306_v47, 0 }
 0xa56   :  { %3107 = vmatpush3.bf16.xpose.msra.mxu1 %v1986_v40  ;;  %3108 = vmatprep.mubr.msk.bf16.mxu1 %vm3885_vm0, %v3884_v0 }
 0xa57   :  { %3118 = vmatprep.subr.bf16.mxu1 %v3884_v0 }
 0xa5d   :  { %3109 = vmatmul.mubr.msk.bf16.vlgmr.msra.gmra.mrb[52].mxu1 %vm408_vm2, %v1970_v32 }
 0xa5e   :  { %3119 = vmatpush3.bf16.xpose.msra.mxu1 %v2095_v43  ;;  %3120 = vmatprep.mubr.msk.bf16.mxu1 %vm3885_vm0, %v3884_v0 }
 0xa5f   :  { %3130 = vmatprep.subr.bf16.mxu1 %v3884_v0 }
 0xa65   :  { %3121 = vmatmul.mubr.msk.bf16.vlgmr.msra.gmra.mrb[56].mxu1 %vm408_vm2, %v2088_v46 }
 0xa66   :  { %3131 = vmatpush3.bf16.xpose.msra.mxu1 %v2203_v45  ;;  %3132 = vmatprep.mubr.msk.bf16.mxu1 %vm3885_vm0, %v3884_v0 }
 0xa67   :  { %3142 = vmatprep.subr.bf16.mxu1 %v3884_v0 }
 0xa6d   :  { %3133 = vmatmul.mubr.msk.bf16.vlgmr.msra.gmra.mrb[60].mxu1 %vm408_vm2, %v2196_v49 }
 0xa6e   :  { %3143 = vmatpush3.bf16.xpose.msra.mxu1 %v2311_v48  ;;  %3144 = vmatprep.mubr.msk.bf16.mxu1 %vm3885_vm0, %v3884_v0 }
 0xa6f   :  { %3154 = vmatprep.subr.bf16.mxu1 %v3884_v0 }
 0xa75   :  { %3145 = vmatmul.mubr.msk.bf16.vlgmr.msra.gmra.mrb[64].mxu1 %vm408_vm2, %v2304_v12 }
 0xa76   :  { %3158 = vmatprep.mubr.msk.bf16.mxu1 %vm3885_vm0, %v3884_v0 }
 0xaa2   :  { %v1561_v51 = vpop.f32.mrb[36].mxu1 }
 0xaa3   :  { %v1562_v52 = vadd.f32 %v2816_v50, %v1561_v51  ;;  %v3062_v53 = vpop.f32.mrb[37].mxu1 }
 0xaa4   :  { %v1564_v54 = vpop.f32.mrb[38].mxu1 }
 0xaa5   :  { %v3063_v55 = vpop.f32.mrb[39].mxu1  ;;  %v1567_v56 = vsel %vm860_vm4, %v1562_v52, -inf }
 0xaa6   :  { %1568 = vmax.xlane.f32.xlu1 %v1567_v56 }
 0xb14   :  { %v1670_v57 = vpop.f32.mrb[40].mxu1 }
 0xb15   :  { %v1671_v58 = vadd.f32 %v2816_v50, %v1670_v57  ;;  %v3074_v59 = vpop.f32.mrb[41].mxu1 }
 0xb16   :  { %v1673_v3 = vpop.f32.mrb[42].mxu1 }
 0xb17   :  { %v3075_v60 = vpop.f32.mrb[43].mxu1  ;;  %v1676_v4 = vsel %vm860_vm4, %v1671_v58, -inf }
 0xb18   :  { %1677 = vmax.xlane.f32.xlu0 %v1676_v4 }
 0xb20   :  { %v1778_v62 = vpop.f32.mrb[44].mxu1 }
 0xb21   :  { %v1779_v63 = vadd.f32 %v2816_v50, %v1778_v62  ;;  %v3086_v1 = vpop.f32.mrb[45].mxu1 }
 0xb22   :  { %v1781_v2 = vpop.f32.mrb[46].mxu1 }
 0xb23   :  { %v3087_v5 = vpop.f32.mrb[47].mxu1  ;;  %v1784_v6 = vsel %vm860_vm4, %v1779_v63, -inf }
 0xb24   :  { %1785 = vmax.xlane.f32.xlu0 %v1784_v6 }
 0xb28   :  { %v1886_v7 = vpop.f32.mrb[48].mxu1 }
 0xb29   :  { %v1887_v8 = vadd.f32 %v2816_v50, %v1886_v7  ;;  %v3098_v9 = vpop.f32.mrb[49].mxu1 }
 0xb2a   :  { %v1889_v17 = vpop.f32.mrb[50].mxu1 }
 0xb2b   :  { %v3099_v10 = vpop.f32.mrb[51].mxu1  ;;  %v1892_v11 = vsel %vm860_vm4, %v1887_v8, -inf }
 0xb2c   :  { %1893 = vmax.xlane.f32.xlu1 %v1892_v11 }
 0xb30   :  { %v2022_v14 = vpop.f32.mrb[52].mxu1 }
 0xb31   :  { %v2023_v18 = vadd.f32 %v2826_v13, %v2022_v14  ;;  %v3110_v19 = vpop.f32.mrb[53].mxu1 }
 0xb32   :  { %v2025_v20 = vpop.f32.mrb[54].mxu1 }
 0xb33   :  { %v3111_v21 = vpop.f32.mrb[55].mxu1  ;;  %v2028_v22 = vsel %vm860_vm4, %v2023_v18, -inf  ;;  %v1569_v40 = vpop.xlane.xlu1 %1568 }
 0xb34   :  { %2029 = vmax.xlane.f32.xlu0 %v2028_v22  ;;  %v1570_v41 = vsub.f32 %v1562_v52, %v1569_v40 }
 0xb36   :  { %v1571_v42 = vmul.f32 1.442695, %v1570_v41 }
 0xb38   :  { %v2131_v23 = vpop.f32.mrb[56].mxu1  ;;  %3305 = vpow2.f32 %v1571_v42 }
 0xb39   :  { %v4581_v24 = vadd.f32 %v2826_v13, %v2131_v23  ;;  %v3122_v25 = vpop.f32.mrb[57].mxu1 }
 0xb3a   :  { %v2134_v26 = vpop.f32.mrb[58].mxu1 }
 0xb3b   :  { %v3123_v27 = vpop.f32.mrb[59].mxu1  ;;  %v2137_v28 = vsel %vm860_vm4, %v4581_v24, -inf }
 0xb3c   :  { %2138 = vmax.xlane.f32.xlu1 %v2137_v28 }
 0xb40   :  { %v2239_v29 = vpop.f32.mrb[60].mxu1 }
 0xb41   :  { %v2240_v30 = vadd.f32 %v2826_v13, %v2239_v29  ;;  %v3134_v31 = vpop.f32.mrb[61].mxu1 }
 0xb42   :  { %v2242_v32 = vpop.f32.mrb[62].mxu1  ;;  %v4591_v45 = vpop.eup %3305 }
 0xb43   :  { %v3135_v34 = vpop.f32.mrb[63].mxu1  ;;  %v2245_v35 = vsel %vm860_vm4, %v2240_v30, -inf  ;;  %v1573_v46 = vsel %vm860_vm4, %v4591_v45, 0.0 }
 0xb44   :  { %2246 = vmax.xlane.f32.xlu0 %v2245_v35 }
 0xb48   :  { %v2347_v36 = vpop.f32.mrb[64].mxu1 }
 0xb49   :  { %v3146_v37 = vpop.f32.mrb[65].mxu1  ;;  %v2348_v43 = vadd.f32 %v2826_v13, %v2347_v36 }
 0xb4a   :  { %v2350_v38 = vpop.f32.mrb[66].mxu1 }
 0xb4b   :  { %v3147_v39 = vpop.f32.mrb[67].mxu1  ;;  %v2353_v44 = vsel %vm860_vm4, %v2348_v43, -inf }
 0xb4d   :  { %1688 = vrot.lane.b32.xlu1 %v4503_v61, %s3888_s9 }
 0xb5a   :  { %1579 = vrot.lane.b32.xlu0 %v4503_v61, %s3886_s5 }
 0xb71   :  { %2354 = vmax.xlane.f32.xlu1 %v2353_v44 }
 0xb79   :  { %1574 = vadd.xlane.f32.xlu0 %v1573_v46 }
 0xb82   :  { %1796 = vrot.lane.b32.xlu1 %v4503_v61, %s3889_s24 }
 0xba5   :  { %v1678_v47 = vpop.xlane.xlu0 %1677 }
 0xba6   :  { %v1679_v48 = vsub.f32 %v1671_v58, %v1678_v47 }
 0xba8   :  { %v1680_v49 = vmul.f32 1.442695, %v1679_v48 }
 0xbaa   :  { %3307 = vpow2.f32 %v1680_v49 }
 0xbb1   :  { %v1786_v12 = vpop.xlane.xlu0 %1785 }
 0xbb2   :  { %v1787_v50 = vsub.f32 %v1779_v63, %v1786_v12 }
 0xbb4   :  { %v4597_v51 = vpop.eup %3307  ;;  %v1788_v52 = vmul.f32 1.442695, %v1787_v50 }
 0xbb5   :  { %v1682_v53 = vsel %vm860_vm4, %v4597_v51, 0.0 }
 0xbb6   :  { %3309 = vpow2.f32 %v1788_v52  ;;  %1683 = vadd.xlane.f32.xlu1 %v1682_v53 }
 0xbb9   :  { %v1894_v54 = vpop.xlane.xlu1 %1893 }
 0xbba   :  { %v1895_v55 = vsub.f32 %v1887_v8, %v1894_v54 }
 0xbbc   :  { %v1896_v56 = vmul.f32 1.442695, %v1895_v55 }
 0xbbe   :  { %3311 = vpow2.f32 %v1896_v56 }
 0xbc0   :  { %v4601_v57 = vpop.eup %3309 }
 0xbc1   :  { %v2030_v59 = vpop.xlane.xlu0 %2029  ;;  %v1790_v58 = vsel %vm860_vm4, %v4601_v57, 0.0 }
 0xbc2   :  { %v2031_v3 = vsub.f32 %v2023_v18, %v2030_v59  ;;  %1791 = vadd.xlane.f32.xlu0 %v1790_v58 }
 0xbc4   :  { %v2032_v60 = vmul.f32 1.442695, %v2031_v3 }
 0xbc6   :  { %3313 = vpow2.f32 %v2032_v60 }
 0xbc8   :  { %v4605_v4 = vpop.eup %3311 }
 0xbc9   :  { %v1898_v62 = vsel %vm860_vm4, %v4605_v4, 0.0  ;;  %v2139_v8 = vpop.xlane.xlu1 %2138 }
 0xbca   :  { %1899 = vadd.xlane.f32.xlu1 %v1898_v62  ;;  %v2140_v17 = vsub.f32 %v4581_v24, %v2139_v8 }
 0xbcc   :  { %v2141_v11 = vmul.f32 1.442695, %v2140_v17 }
 0xbcd   :  { %v1689_v18 = vpop.permute.xlu1 %1688 }
 0xbd0   :  { %v4609_v63 = vpop.eup %3313 }
 0xbd1   :  { %v2247_v1 = vpop.xlane.xlu0 %2246  ;;  %v2034_v2 = vsel %vm860_vm4, %v4609_v63, 0.0 }
 0xbd2   :  { %v2248_v5 = vsub.f32 %v2240_v30, %v2247_v1  ;;  %2035 = vadd.xlane.f32.xlu1 %v2034_v2 }
 0xbd4   :  { %v2249_v6 = vmul.f32 1.442695, %v2248_v5 }
 0xbd5   :  { %v1580_v7 = vpop.permute.xlu0 %1579 }
 0xbd6   :  { %3315 = vpow2.f32 %v2249_v6  ;;  %3065 = vmatpush3.bf16.msra.mxu0 %v1580_v7 }
 0xbd7   :  { %3076 = vmatprep.subr.bf16.mxu0 %v3884_v0  ;;  %3317 = vpow2.f32 %v2141_v11 }
 0xbd8   :  { %1904 = vrot.lane.b32.xlu0 %v4503_v61, %s3891_s27 }
 0xbe0   :  { %v4616_v9 = vpop.eup %3315 }
 0xbe1   :  { %v2251_v10 = vsel %vm860_vm4, %v4616_v9, 0.0  ;;  %v4621_v13 = vpop.eup %3317 }
 0xbe2   :  { %2252 = vadd.xlane.f32.xlu1 %v2251_v10  ;;  %v2143_v14 = vsel %vm860_vm4, %v4621_v13, 0.0 }
 0xbf7   :  { %2144 = vadd.xlane.f32.xlu0 %v2143_v14 }
 0xbfe   :  { %v2355_v19 = vpop.xlane.xlu1 %2354 }
 0xbff   :  { %v2356_v61 = vsub.f32 %v2348_v43, %v2355_v19 }
 0xc01   :  { %v2357_v20 = vmul.f32 1.442695, %v2356_v61 }
 0xc02   :  { %v1797_v27 = vpop.permute.xlu1 %1796 }
 0xc03   :  { %3319 = vpow2.f32 %v2357_v20 }
 0xc06   :  { %v1575_v21 = vpop.xlane.xlu0 %1574 }
 0xc07   :  { %3321 = vrcp.f32 %v1575_v21  ;;  %v3261_v21 = vld [vmem:[#allocation20] sm:$0xff]  }
 0xc08   :  { %3155 = vmatpush3.bf16.msra.mxu1 %v3261_v21  ;;  %v2840_v21 = vld [vmem:[#allocation23] ss:$0 sm:$0xff] }
 0xc09   :  { %3156 = vmatprep.subr.bf16.mxu1 %v3884_v0 }
 0xc0d   :  { %v4625_v22 = vpop.eup %3319  ;;  %2149 = vrot.lane.b32.xlu0 %v4532_v33, %s3888_s9 }
 0xc0e   :  { %v2359_v23 = vsel %vm860_vm4, %v4625_v22, 0.0 }
 0xc0f   :  { %2360 = vadd.xlane.f32.xlu1 %v2359_v23 }
 0xc11   :  { %v3322_v24 = vpop.eup %3321  ;;  %2257 = vrot.lane.b32.xlu0 %v4532_v33, %s3889_s24 }
 0xc12   :  { %v1577_v25 = vmul.f32 %v3322_v24, %v4591_v45 }
 0xc14   :  { %v1578_v26 = vpack.c.bf16 %v1577_v25, %v1577_v25 }
 0xc15   :  { %2365 = vrot.lane.b32.xlu0 %v4532_v33, %s3891_s27 }
 0xc16   :  { %3067 = vmatmul.mubr.msk.bf16.vlgmr.msra.gmra.mrb[40].mxu0 %vm860_vm4, %v1578_v26  ;;  %v3262_v26 = vld [vmem:[#allocation20 + $0x8] sm:$0xff]  }
 0xc17   :  { %3077 = vmatpush3.bf16.msra.mxu0 %v1689_v18  ;;  %3078 = vmatprep.mubr.msk.bf16.mxu0 %vm3885_vm0, %v3884_v0 }
 0xc18   :  { %3088 = vmatprep.subr.bf16.mxu0 %v3884_v0  ;;  %3157 = vmatpush3.bf16.msra.mxu1 %v3262_v26 }
 0xc19   :  { %3170 = vmatprep.subr.bf16.mxu1 %v3884_v0 }
 0xc20   :  { %2040 = vrot.lane.b32.xlu1 %v4532_v33, %s3886_s5 }
 0xc43   :  { %v1684_v28 = vpop.xlane.xlu1 %1683 }
 0xc44   :  { %3323 = vrcp.f32 %v1684_v28 }
 0xc4e   :  { %v3324_v29 = vpop.eup %3323 }
 0xc4f   :  { %v1686_v30 = vmul.f32 %v3324_v29, %v4597_v51  ;;  %v1792_v31 = vpop.xlane.xlu0 %1791 }
 0xc50   :  { %3325 = vrcp.f32 %v1792_v31 }
 0xc51   :  { %v1687_v32 = vpack.c.bf16 %v1686_v30, %v1686_v30 }
 0xc53   :  { %3079 = vmatmul.mubr.msk.bf16.vlgmr.msra.gmra.mrb[44].mxu0 %vm860_vm4, %v1687_v32  ;;  %v1905_v37 = vpop.permute.xlu0 %1904 }
 0xc54   :  { %3089 = vmatpush3.bf16.msra.mxu0 %v1797_v27  ;;  %3090 = vmatprep.mubr.msk.bf16.mxu0 %vm3885_vm0, %v3884_v0 }
 0xc55   :  { %3100 = vmatprep.subr.bf16.mxu0 %v3884_v0 }
 0xc57   :  { %v1900_v34 = vpop.xlane.xlu1 %1899 }
 0xc58   :  { %3327 = vrcp.f32 %v1900_v34 }
 0xc5a   :  { %v3326_v33 = vpop.eup %3325 }
 0xc5b   :  { %v1794_v35 = vmul.f32 %v3326_v33, %v4601_v57 }
 0xc5d   :  { %v1795_v36 = vpack.c.bf16 %v1794_v35, %v1794_v35 }
 0xc5f   :  { %3091 = vmatmul.mubr.msk.bf16.vlgmr.msra.gmra.mrb[48].mxu0 %vm860_vm4, %v1795_v36  ;;  %v2036_v41 = vpop.xlane.xlu1 %2035 }
 0xc60   :  { %3101 = vmatpush3.bf16.msra.mxu0 %v1905_v37  ;;  %3102 = vmatprep.mubr.msk.bf16.mxu0 %vm3885_vm0, %v3884_v0  ;;  %3329 = vrcp.f32 %v2036_v41 }
 0xc61   :  { %3112 = vmatprep.subr.bf16.mxu0 %v3884_v0 }
 0xc62   :  { %v3328_v38 = vpop.eup %3327 }
 0xc63   :  { %v1902_v39 = vmul.f32 %v3328_v38, %v4605_v4 }
 0xc65   :  { %v1903_v40 = vpack.c.bf16 %v1902_v39, %v1902_v39 }
 0xc67   :  { %3103 = vmatmul.mubr.msk.bf16.vlgmr.msra.gmra.mrb[52].mxu0 %vm860_vm4, %v1903_v40 }
 0xc68   :  { %3114 = vmatprep.mubr.msk.bf16.mxu0 %vm3885_vm0, %v3884_v0 }
 0xc6a   :  { %v3330_v44 = vpop.eup %3329 }
 0xc6b   :  { %v2038_v46 = vmul.f32 %v3330_v44, %v4609_v63 }
 0xc6d   :  { %v2039_v48 = vpack.c.bf16 %v2038_v46, %v2038_v46 }
 0xc6f   :  { %v2253_v43 = vpop.xlane.xlu1 %2252 }
 0xc84   :  { %v2145_v42 = vpop.xlane.xlu0 %2144 }
 0xc85   :  { %3331 = vrcp.f32 %v2145_v42 }
 0xc86   :  { %3333 = vrcp.f32 %v2253_v43 }
 0xc88   :  { %v2150_v49 = vpop.permute.xlu0 %2149 }
 0xc8c   :  { %v2258_v52 = vpop.permute.xlu0 %2257 }
 0xc8f   :  { %v3332_v12 = vpop.eup %3331 }
 0xc90   :  { %v2147_v50 = vmul.f32 %v3332_v12, %v4621_v13  ;;  %v3334_v53 = vpop.eup %3333  ;;  %v2366_v56 = vpop.permute.xlu0 %2365 }
 0xc91   :  { %v2255_v54 = vmul.f32 %v3334_v53, %v4616_v9 }
 0xc92   :  { %v2148_v51 = vpack.c.bf16 %v2147_v50, %v2147_v50 }
 0xc93   :  { %v2256_v55 = vpack.c.bf16 %v2255_v54, %v2255_v54 }
 0xc9c   :  { %v2361_v45 = vpop.xlane.xlu1 %2360 }
 0xc9d   :  { %3335 = vrcp.f32 %v2361_v45 }
 0xca0   :  { %v2041_v47 = vpop.permute.xlu1 %2040 }
 0xca1   :  { %3113 = vmatpush3.bf16.msra.mxu0 %v2041_v47 }
 0xca2   :  { %3124 = vmatprep.subr.bf16.mxu0 %v3884_v0 }
 0xca4   :  { %3115 = vmatmul.mubr.msk.bf16.vlgmr.msra.gmra.mrb[56].mxu0 %vm860_vm4, %v2039_v48 }
 0xca5   :  { %3125 = vmatpush3.bf16.msra.mxu0 %v2150_v49  ;;  %3126 = vmatprep.mubr.msk.bf16.mxu0 %vm3885_vm0, %v3884_v0 }
 0xca6   :  { %3136 = vmatprep.subr.bf16.mxu0 %v3884_v0 }
 0xca7   :  { %v3336_v57 = vpop.eup %3335 }
 0xca8   :  { %v2363_v59 = vmul.f32 %v3336_v57, %v4625_v22 }
 0xcaa   :  { %v2364_v58 = vpack.c.bf16 %v2363_v59, %v2363_v59 }
 0xcac   :  { %3127 = vmatmul.mubr.msk.bf16.vlgmr.msra.gmra.mrb[60].mxu0 %vm860_vm4, %v2148_v51 }
 0xcad   :  { %3137 = vmatpush3.bf16.msra.mxu0 %v2258_v52  ;;  %3138 = vmatprep.mubr.msk.bf16.mxu0 %vm3885_vm0, %v3884_v0  ;;  %v2836_v52 = vld [vmem:[#allocation22] ss:$0 sm:$0xff] }
 0xcae   :  { %3148 = vmatprep.subr.bf16.mxu0 %v3884_v0 }
 0xcb4   :  { %3139 = vmatmul.mubr.msk.bf16.vlgmr.msra.gmra.mrb[64].mxu0 %vm860_vm4, %v2256_v55 }
 0xcb5   :  { %3149 = vmatpush3.bf16.msra.mxu0 %v2366_v56  ;;  %3150 = vmatprep.mubr.msk.bf16.mxu0 %vm3885_vm0, %v3884_v0 }
 0xcb6   :  { %3162 = vmatprep.subr.bf16.mxu0 %v3884_v0 }
 0xcbc   :  { %3151 = vmatmul.mubr.msk.bf16.vlgmr.msra.gmra.mrb[68].mxu0 %vm860_vm4, %v2364_v58 }
 0xcbd   :  { %3166 = vmatprep.mubr.msk.bf16.mxu0 %vm3885_vm0, %v3884_v0 }
 0xce9   :  { %v1619_v3 = vpop.f32.mrb[40].mxu0 }
 0xcea   :  { %v3068_v60 = vpop.f32.mrb[41].mxu0 }
 0xceb   :  { %v1622_v4 = vpop.f32.mrb[42].mxu0 }
 0xcec   :  { %v3069_v62 = vpop.f32.mrb[43].mxu0 }
 0xd26   :  { %v1728_v63 = vpop.f32.mrb[44].mxu0 }
 0xd27   :  { %v3080_v1 = vpop.f32.mrb[45].mxu0 }
 0xd28   :  { %v1731_v2 = vpop.f32.mrb[46].mxu0 }
 0xd29   :  { %v3081_v5 = vpop.f32.mrb[47].mxu0 }
 0xd32   :  { %v1836_v6 = vpop.f32.mrb[48].mxu0 }
 0xd33   :  { %v3092_v7 = vpop.f32.mrb[49].mxu0 }
 0xd34   :  { %v1839_v8 = vpop.f32.mrb[50].mxu0 }
 0xd35   :  { %v3093_v9 = vpop.f32.mrb[51].mxu0 }
 0xd3a   :  { %v1944_v17 = vpop.f32.mrb[52].mxu0 }
 0xd3b   :  { %v3104_v10 = vpop.f32.mrb[53].mxu0 }
 0xd3c   :  { %v1947_v11 = vpop.f32.mrb[54].mxu0 }
 0xd3d   :  { %v3105_v13 = vpop.f32.mrb[55].mxu0 }
 0xd77   :  { %v2080_v14 = vpop.f32.mrb[56].mxu0 }
 0xd78   :  { %v3116_v18 = vpop.f32.mrb[57].mxu0 }
 0xd79   :  { %v2083_v19 = vpop.f32.mrb[58].mxu0 }
 0xd7a   :  { %v3117_v61 = vpop.f32.mrb[59].mxu0 }
 0xd7f   :  { %v2189_v20 = vpop.f32.mrb[60].mxu0 }
 0xd80   :  { %v3238_v22 = vpack.i.bf16 %v2189_v20, %v1728_v63  ;;  %v3128_v23 = vpop.f32.mrb[61].mxu0 }
 0xd81   :  { %v2192_v24 = vpop.f32.mrb[62].mxu0 }
 0xd82   :  { %3239 = vrot.lane.b32.xlu1 %v3238_v22, %s3871_s1  ;;  %v3129_v25 = vpop.f32.mrb[63].mxu0 }
 0xd83   :  { %v2841_v25 = vld [vmem:[#allocation25] ss:$0 sm:$0xff] }
 0xd87   :  { %v2297_v27 = vpop.f32.mrb[64].mxu0 }
 0xd88   :  { %v3243_v28 = vpack.i.bf16 %v2297_v27, %v1836_v6  ;;  %v3140_v29 = vpop.f32.mrb[65].mxu0 }
 0xd89   :  { %v2300_v30 = vpop.f32.mrb[66].mxu0 }
 0xd8a   :  { %3244 = vrot.lane.b32.xlu0 %v3243_v28, %s3873_s2  ;;  %v3141_v31 = vpop.f32.mrb[67].mxu0  ;;  %v3265_v30 = vld [vmem:[#allocation29] sm:$0xff]   ;;  %s3897_s2 = smov [#allocation35]  }
 0xd8b   :  { %v3266_v31 = vld [vmem:[#allocation29 + $0x8] sm:$0xff]   ;;  %s2764_s12 = sshll.u32 %s3897_s2, 4  ;;  %s2765_s12 = int_to_ptr.vmem [resolvable:$true] %s2764_s12 }
 0xd8c   :  { %s3811_s16 = scalar_lea.vmem %s2765_s12, 256  ;;  %p3816_p1 = scmp.lt.s32.totalorder %s2765_s12, %s2765_s12 }
 0xd8d   :  { %p3812_p0 = scmp.ne.s32.totalorder %s2765_s12, %s3811_s16  ;;  %p3817_p2 = scmp.lt.s32.totalorder %s3811_s16, %s3811_s16 }
 0xd8f   :  { %v2405_v32 = vpop.f32.mrb[68].mxu0  ;;  %p3818_p3 = por %p3817_p2, %p3816_p1 }
 0xd90   :  { %v3248_v34 = vpack.i.bf16 %v2405_v32, %v1944_v17  ;;  %v3152_v33 = vpop.f32.mrb[69].mxu0  ;;  %v3263_v17 = vld [vmem:[#allocation26] sm:$0xff]  }
 0xd91   :  { %v2408_v35 = vpop.f32.mrb[70].mxu0  ;;  %3163 = vmatpush3.bf16.msra.mxu0 %v3263_v17  ;;  %v3267_v32 = vld [vmem:[#allocation29 + $0x10] sm:$0xff]   ;;  %v2842_v33 = vld [vmem:[#allocation28] ss:$0 sm:$0xff]  ;;  %p3819_p4 = pnand %p3818_p3, %p3812_p0 }
 0xd92   :  { %3249 = vrot.lane.b32.xlu1 %v3248_v34, %s3896_s22  ;;  %v3153_v36 = vpop.f32.mrb[71].mxu0  ;;  %3164 = vmatprep.subr.bf16.mxu0 %v3884_v0  ;;  %v3268_v34 = vld [vmem:[#allocation29 + $0x18] sm:$0xff]  }
 0xdf4   :  { %v3240_v37 = vpop.permute.xlu1 %3239 }
 0xdf5   :  { %v3242_v39 = vunpack.i.h.bf16 %v3240_v37  ;;  %v3241_v40 = vunpack.i.l.bf16 %v3240_v37 }
 0xdf7   :  { %v2423_v44 = vsel %vm408_vm2, %v2080_v14, %v3242_v39  ;;  %v1962_v45 = vsel %vm408_vm2, %v1619_v3, %v3241_v40 }
 0xdfc   :  { %v3245_v38 = vpop.permute.xlu0 %3244 }
 0xdfd   :  { %v3247_v41 = vunpack.i.h.bf16 %v3245_v38  ;;  %v3246_v42 = vunpack.i.l.bf16 %v3245_v38 }
 0xdff   :  { %v2424_v48 = vsel %vm860_vm4, %v2423_v44, %v3247_v41  ;;  %v1963_v49 = vsel %vm860_vm4, %v1962_v45, %v3246_v42 }
 0xe04   :  { %v3250_v43 = vpop.permute.xlu1 %3249 }
 0xe05   :  { %v3252_v46 = vunpack.i.h.bf16 %v3250_v43  ;;  %v3251_v47 = vunpack.i.l.bf16 %v3250_v43 }
 0xe07   :  { %v2425_v12 = vsel %vm862_vm5, %v2424_v48, %v3252_v46  ;;  %v1964_v50 = vsel %vm862_vm5, %v1963_v49, %v3251_v47 }
 0xe08   :  { %v2426_v51 = vpack.c.bf16 %v2425_v12, %v1964_v50 }
 0xe0a   :  { %3159 = vmatmul.mubr.msk.bf16.vlgmr.msra.gmra.mrb[68].mxu1 %vm356_vm1, %v2426_v51 }
 0xe0b   :  { %3178 = vmatprep.mubr.msk.bf16.mxu1 %vm3885_vm0, %v3884_v0  ;;  %3171 = vmatpush3.bf16.msra.mxu1 %v3265_v30 }
 0xe0c   :  { %3172 = vmatprep.subr.bf16.mxu1 %v3884_v0 }
 0xe0f   :  { %3173 = vmatpush3.bf16.msra.mxu1 %v3266_v31 }
 0xe10   :  { %3174 = vmatprep.subr.bf16.mxu1 %v3884_v0 }
 0xe13   :  { %3175 = vmatpush3.bf16.msra.mxu1 %v3267_v32 }
 0xe14   :  { %3176 = vmatprep.subr.bf16.mxu1 %v3884_v0 }
 0xe17   :  { %3177 = vmatpush3.bf16.msra.mxu1 %v3268_v34 }
 0xedd   :  { %v2487_v53 = vpop.f32.mrb[68].mxu1 }
 0xede   :  { %v2488_v54 = vadd.f32 %v2836_v52, %v2487_v53  ;;  %v3160_v55 = vpop.f32.mrb[69].mxu1 }
 0xedf   :  { %v2490_v56 = vpop.f32.mrb[70].mxu1 }
 0xee0   :  { %v2491_v57 = vadd.f32 %v2836_v52, %v2490_v56  ;;  %v3161_v59 = vpop.f32.mrb[71].mxu1  ;;  %v2494_v58 = vadd.f32 %v2488_v54, %v4507_v15 }
 0xee1   :  { %v2846_v59 = vld [vmem:[#allocation31] ss:$0 sm:$0xff] }
 0xee2   :  { %v2498_v3 = vsel %vm356_vm1, %v2494_v58, 0.0  ;;  %v2495_v60 = vadd.f32 %v2491_v57, %v4509_v16  ;;  %v3264_v16 = vld [vmem:[#allocation26 + $0x8] sm:$0xff]  }
 0xee3   :  { %2499 = vadd.xlane.f32.xlu0 %v2498_v3  ;;  %3165 = vmatpush3.bf16.msra.mxu0 %v3264_v16 }
 0xee4   :  { %v2501_v4 = vsel %vm356_vm1, %v2495_v60, 0.0 }
 0xee5   :  { %2502 = vadd.xlane.f32.xlu1 %v2501_v4 }
 0xf70   :  { %v2500_v62 = vpop.xlane.xlu0 %2499 }
 0xf71   :  { %v2504_v63 = vmul.f32 0.03125, %v2500_v62 }
 0xf72   :  { %v2503_v1 = vpop.xlane.xlu1 %2502 }
 0xf73   :  { %v2506_v2 = vsub.f32 %v2494_v58, %v2504_v63  ;;  %v2505_v5 = vmul.f32 0.03125, %v2503_v1 }
 0xf75   :  { %v2507_v6 = vsub.f32 %v2495_v60, %v2505_v5  ;;  %v2508_v7 = vmul.f32 %v2506_v2, %v2506_v2 }
 0xf77   :  { %v2510_v8 = vsel %vm356_vm1, %v2508_v7, 0.0  ;;  %v2509_v9 = vmul.f32 %v2507_v6, %v2507_v6 }
 0xf78   :  { %2511 = vadd.xlane.f32.xlu0 %v2510_v8 }
 0xf79   :  { %v2513_v15 = vsel %vm356_vm1, %v2509_v9, 0.0 }
 0xf7c   :  { %2514 = vadd.xlane.f32.xlu0 %v2513_v15 }
0x1005   :  { %v2512_v10 = vpop.xlane.xlu0 %2511 }
0x1006   :  { %v2516_v11 = vmul.f32 0.03125, %v2512_v10 }
0x1008   :  { %v2518_v13 = vadd.f32 1e-12, %v2516_v11 }
0x1009   :  { %v2515_v14 = vpop.xlane.xlu0 %2514 }
0x100a   :  { %3337 = vrsqrt.f32 %v2518_v13  ;;  %v2517_v18 = vmul.f32 0.03125, %v2515_v14 }
0x100c   :  { %v2519_v19 = vadd.f32 1e-12, %v2517_v18 }
0x100e   :  { %3339 = vrsqrt.f32 %v2519_v19 }
0x1014   :  { %v3338_v61 = vpop.eup %3337 }
0x1015   :  { %v2522_v20 = vmul.f32 %v3338_v61, %v2506_v2 }
0x1017   :  { %v2530_v23 = vmul.f32 %v2840_v21, %v2522_v20 }
0x1018   :  { %v3340_v22 = vpop.eup %3339 }
0x1019   :  { %v2523_v24 = vmul.f32 %v3340_v22, %v2507_v6  ;;  %v2538_v27 = vadd.f32 %v2841_v25, %v2530_v23 }
0x101b   :  { %v2531_v26 = vmul.f32 %v2840_v21, %v2523_v24  ;;  %v2852_v24 = vld [vmem:[#allocation32] ss:$0 sm:$0xff] }
0x101d   :  { %v2539_v28 = vadd.f32 %v2841_v25, %v2531_v26 }
0x101f   :  { %v2540_v29 = vpack.c.bf16 %v2539_v28, %v2538_v27 }
0x1021   :  { %3167 = vmatmul.mubr.msk.bf16.vlgmr.msra.gmra.mrb[72].mxu0 %vm356_vm1, %v2540_v29 }
0x10f4   :  { %v2601_v35 = vpop.f32.mrb[72].mxu0 }
0x10f5   :  { %v2602_v36 = vadd.f32 %v2842_v33, %v2601_v35  ;;  %v3168_v37 = vpop.f32.mrb[73].mxu0 }
0x10f6   :  { %v2604_v38 = vpop.f32.mrb[74].mxu0 }
0x10f7   :  { %v2608_v39 = vmul.f32 %v2602_v36, %v2602_v36  ;;  %v2605_v40 = vadd.f32 %v2842_v33, %v2604_v38  ;;  %v3169_v41 = vpop.f32.mrb[75].mxu0 }
0x10f9   :  { %v2610_v42 = vmul.f32 %v2608_v39, %v2602_v36  ;;  %v2609_v43 = vmul.f32 %v2605_v40, %v2605_v40 }
0x10fb   :  { %v2612_v44 = vmul.f32 0.044715, %v2610_v42  ;;  %v2611_v45 = vmul.f32 %v2609_v43, %v2605_v40 }
0x10fd   :  { %v2614_v46 = vadd.f32 %v2612_v44, %v2602_v36  ;;  %v2613_v47 = vmul.f32 0.044715, %v2611_v45 }
0x10ff   :  { %v2616_v48 = vmul.f32 0.7978846, %v2614_v46  ;;  %v2615_v49 = vadd.f32 %v2613_v47, %v2605_v40 }
0x1101   :  { %3341 = vtanh.f32 %v2616_v48  ;;  %v2617_v0 = vmul.f32 0.7978846, %v2615_v49 }
0x1103   :  { %3343 = vtanh.f32 %v2617_v0 }
0x110b   :  { %v3342_v12 = vpop.eup %3341 }
0x110c   :  { %v2620_v50 = vadd.f32 1.0, %v3342_v12 }
0x110d   :  { %v3344_v51 = vpop.eup %3343 }
0x110e   :  { %v2622_v52 = vmul.f32 0.5, %v2620_v50  ;;  %v2621_v53 = vadd.f32 1.0, %v3344_v51 }
0x1110   :  { %v2623_v54 = vmul.f32 0.5, %v2621_v53  ;;  %v2624_v55 = vmul.f32 %v2622_v52, %v2602_v36 }
0x1112   :  { %v2625_v56 = vmul.f32 %v2623_v54, %v2605_v40 }
0x1114   :  { %v2626_v57 = vpack.c.bf16 %v2625_v56, %v2624_v55 }
0x1116   :  { %3179 = vmatmul.mubr.msk.bf16.vlgmr.msra.gmra.mrb[72].mxu1 %vm2666_vm6, %v2626_v57 }
0x11e9   :  { %v2704_v58 = vpop.f32.mrb[72].mxu1 }
0x11ea   :  { %v2705_v3 = vadd.f32 %v2846_v59, %v2704_v58  ;;  %v3180_v60 = vpop.f32.mrb[73].mxu1 }
0x11eb   :  { %v2707_v4 = vpop.f32.mrb[74].mxu1 }
0x11ec   :  { %v2708_v62 = vadd.f32 %v2846_v59, %v2707_v4  ;;  %v3181_v63 = vpop.f32.mrb[75].mxu1  ;;  %v2711_v1 = vadd.f32 %v2705_v3, %v2538_v27  ;;  %v2853_v27 = vld [vmem:[#allocation34] ss:$0 sm:$0xff] }
0x11ee   :  { %v2715_v2 = vsel %vm356_vm1, %v2711_v1, 0.0  ;;  %v2712_v5 = vadd.f32 %v2708_v62, %v2539_v28 }
0x11ef   :  { %2716 = vadd.xlane.f32.xlu1 %v2715_v2 }
0x11f0   :  { %v2718_v6 = vsel %vm356_vm1, %v2712_v5, 0.0 }
0x11f1   :  { %2719 = vadd.xlane.f32.xlu0 %v2718_v6 }
0x127c   :  { %v2717_v7 = vpop.xlane.xlu1 %2716 }
0x127d   :  { %v2721_v8 = vmul.f32 0.03125, %v2717_v7 }
0x127e   :  { %v2720_v9 = vpop.xlane.xlu0 %2719 }
0x127f   :  { %v2723_v15 = vsub.f32 %v2711_v1, %v2721_v8  ;;  %v2722_v17 = vmul.f32 0.03125, %v2720_v9 }
0x1281   :  { %v2724_v16 = vsub.f32 %v2712_v5, %v2722_v17  ;;  %v2725_v10 = vmul.f32 %v2723_v15, %v2723_v15 }
0x1283   :  { %v2727_v11 = vsel %vm356_vm1, %v2725_v10, 0.0  ;;  %v2726_v13 = vmul.f32 %v2724_v16, %v2724_v16 }
0x1284   :  { %2728 = vadd.xlane.f32.xlu1 %v2727_v11 }
0x1285   :  { %v2730_v14 = vsel %vm356_vm1, %v2726_v13, 0.0 }
0x1286   :  { %2731 = vadd.xlane.f32.xlu0 %v2730_v14 }
0x1311   :  { %v2729_v18 = vpop.xlane.xlu1 %2728 }
0x1312   :  { %v2733_v19 = vmul.f32 0.03125, %v2729_v18 }
0x1313   :  { %v2732_v61 = vpop.xlane.xlu0 %2731 }
0x1314   :  { %v2735_v20 = vadd.f32 1e-12, %v2733_v19  ;;  %v2734_v21 = vmul.f32 0.03125, %v2732_v61 }
0x1316   :  { %3345 = vrsqrt.f32 %v2735_v20  ;;  %v2736_v22 = vadd.f32 1e-12, %v2734_v21 }
0x1318   :  { %3347 = vrsqrt.f32 %v2736_v22 }
0x1320   :  { %v3346_v23 = vpop.eup %3345 }
0x1321   :  { %v2739_v25 = vmul.f32 %v3346_v23, %v2723_v15 }
0x1322   :  { %v3348_v26 = vpop.eup %3347 }
0x1323   :  { %v2740_v28 = vmul.f32 %v3348_v26, %v2724_v16  ;;  %v2747_v29 = vmul.f32 %v2852_v24, %v2739_v25 }
0x1325   :  { %v2748_v30 = vmul.f32 %v2852_v24, %v2740_v28  ;;  %v2755_v31 = vadd.f32 %v2853_v27, %v2747_v29 }
0x1327   :  { %v2756_v32 = vadd.f32 %v2853_v27, %v2748_v30  ;;  %2757 = vst.msk [vmem:[#allocation35] sm:$0xff] %vm356_vm1, %v2755_v31 }
0x1329   :  { %2758 = vst.msk [vmem:[#allocation35 + $0x8] sm:$0xff] %vm356_vm1, %v2756_v32 }
0x132a   :  { %3822 = shalt.err (!%p3819_p4)
}
0x132b   :  { %s4770_s29 = sld [smem:[#allocation56_spill]] }
0x1331   :  { %s3823_s18 = scalar_lea.hbm %s4770_s29, 256 }
0x1332   :  { %p3824_p5 = scmp.ne.s32.totalorder %s4770_s29, %s3823_s18  ;;  %p3827_p6 = scmp.lt.u32.totalorder %s3823_s18, %s4770_s29 }
0x1334   :  { %p3829_p7 = pnand %p3827_p6, %p3824_p5 }
0x1336   :  { %3832 = shalt.err (!%p3829_p7)
}
0x1337   :  { %2770 = dma.vmem_to_hbm [thread:$0]  %s2765_s12, 256, %s4770_s29, [#allocation4], %s3870_s19, %s3870_s19, %s3871_s1  }
0x1338   :  { %3855 = dma.done.wait [#allocation4], 256  }
0x1339   :  { %3856 = vsyncadd [#allocation4], 4294967040 }
0x133a   :  { %2774 = vsyncpa [#allocation3], 1 }
0x133b   :  { %2775 = vsyncpa [#allocation6], 1 }
0x133c   :  { %2776 = vsyncpa [#allocation9], 1 }
0x133d   :  { %2777 = vsyncpa [#allocation12], 1 }
0x133e   :  { %2778 = vsyncpa [#allocation15], 1 }
0x133f   :  { %2779 = vsyncpa [#allocation18], 1 }
0x1340   :  { %2780 = vsyncpa [#allocation21], 1 }
0x1341   :  { %2781 = vsyncpa [#allocation24], 1 }
0x1342   :  { %2782 = vsyncpa [#allocation27], 1 }
0x1343   :  { %2783 = vsyncpa [#allocation30], 1 }
0x1344   :  { %2784 = vsyncpa [#allocation33], 1 }
0x1345   :  { %2785 = vsyncpa [#allocation4], 1 }

</bundles_post_ra>
